<compile_context>
chip_gen: v5e
topology: v5e:2x2
jax: 0.10.0
libtpu: 0.0.40
codegen_flags: <defaults>
</compile_context>

<pallas_src>
import functools

import jax
import jax.numpy as jnp
from jax import lax
from jax.experimental import pallas as pl
from jax.experimental.pallas import tpu as pltpu

N_EMBED = 512          # C (matches the module's n_embed)
BLOCK_SIZE = 512       # max context (tril buffer size in the module)


def _head_kernel(x_ref, wq_ref, wkv_ref, o_ref, k_s, v_s, *, tq, head_size):
    # x_ref: (1, T, C) bf16   wq_ref: (C, H) bf16   wkv_ref: (C, 2H) bf16
    # o_ref: (1, TQ, H) f32   k_s/v_s: (T, H) bf16 VMEM scratch (cached per batch)
    C = x_ref.shape[2]
    H = head_size
    qi = pl.program_id(1)

    # ---- once per batch: full-sequence K/V projection, cached in VMEM --------
    @pl.when(qi == 0)
    def _():
        x_full = x_ref[0]                                            # (T, C) bf16
        kv = jnp.dot(x_full, wkv_ref[...],
                     preferred_element_type=jnp.float32)             # (T, 2H) f32
        k_s[...] = kv[:, 0:H].astype(jnp.bfloat16)
        v_s[...] = kv[:, H:2 * H].astype(jnp.bfloat16)

    # ---- per query tile: project q for this tile only -------------------------
    q_start = pl.multiple_of(qi * tq, tq)
    x_tile = x_ref[0, pl.ds(q_start, tq), :]                         # (TQ, C) bf16
    qf = jnp.dot(x_tile, wq_ref[...],
                 preferred_element_type=jnp.float32)                 # (TQ, H) f32
    # NOTE: the module scales by n_embed (C)**-0.5, not head_size**-0.5.
    scale = jnp.float32(C) ** jnp.float32(-0.5)
    q_tile = (qf * scale).astype(jnp.bfloat16)                       # (TQ, H) bf16

    # ---- flash-style online softmax over causally visible kv blocks ----------
    # Off-diagonal blocks (j < qi) are fully visible: no mask work at all.
    # NT dot_general (contract on head dim of both operands) is the canonical
    # transpose_rhs MXU form — no per-block XLU transpose is emitted.
    nt_dims = (((1,), (1,)), ((), ()))

    def kv_body(j, carry):
        m_i, l_i, acc = carry
        k_start = pl.multiple_of(j * tq, tq)
        k_blk = k_s[pl.ds(k_start, tq), :]                           # (TQ, H) bf16
        v_blk = v_s[pl.ds(k_start, tq), :]                           # (TQ, H) bf16
        s = lax.dot_general(q_tile, k_blk, nt_dims,
                            preferred_element_type=jnp.float32)      # (TQ, TQ) f32
        m_new = jnp.maximum(m_i, jnp.max(s, axis=-1, keepdims=True))
        alpha = jnp.exp(m_i - m_new)
        p = jnp.exp(s - m_new)
        l_new = alpha * l_i + jnp.sum(p, axis=-1, keepdims=True)
        acc_new = alpha * acc + jnp.dot(p.astype(jnp.bfloat16), v_blk,
                                        preferred_element_type=jnp.float32)
        return m_new, l_new, acc_new

    m0 = jnp.full((tq, 1), -jnp.inf, jnp.float32)
    l0 = jnp.zeros((tq, 1), jnp.float32)
    a0 = jnp.zeros((tq, H), jnp.float32)
    m_i, l_i, acc = lax.fori_loop(0, qi, kv_body, (m0, l0, a0))

    # Diagonal block (j == qi): the only block that needs the causal mask.
    k_blk = k_s[pl.ds(q_start, tq), :]
    v_blk = v_s[pl.ds(q_start, tq), :]
    s = lax.dot_general(q_tile, k_blk, nt_dims,
                        preferred_element_type=jnp.float32)          # (TQ, TQ) f32
    row = lax.broadcasted_iota(jnp.int32, (tq, tq), 0)
    col = lax.broadcasted_iota(jnp.int32, (tq, tq), 1)
    s = jnp.where(col <= row, s, -jnp.inf)
    m_new = jnp.maximum(m_i, jnp.max(s, axis=-1, keepdims=True))
    alpha = jnp.exp(m_i - m_new)
    p = jnp.exp(s - m_new)
    l_i = alpha * l_i + jnp.sum(p, axis=-1, keepdims=True)
    acc = alpha * acc + jnp.dot(p.astype(jnp.bfloat16), v_blk,
                                preferred_element_type=jnp.float32)

    # TODO(synk): Dropout(p=0.2) on the attention weights omitted (eval mode).
    out = acc * pl.reciprocal(l_i, approx=True)   # EUP vrcp: free at finalize
    o_ref[0] = out.astype(o_ref.dtype)


def head_forward(x, w_q, w_k, w_v, *, tq=128):
    """x: (B, T, C) float32; w_*: (C, H) float32 (transposed nn.Linear weights)."""
    B, T, C = x.shape
    H = w_q.shape[1]
    assert C == w_q.shape[0] == w_k.shape[0] == w_v.shape[0]
    assert T <= BLOCK_SIZE

    tq = min(tq, T)
    assert T % tq == 0, "sequence length must be a multiple of the query tile"
    nq = T // tq

    # bf16 MXU operands prepared in the wrapper: halves HBM->VMEM DMA bytes.
    x_bf = x.astype(jnp.bfloat16)
    wq_bf = w_q.astype(jnp.bfloat16)
    wkv_bf = jnp.concatenate([w_k, w_v], axis=1).astype(jnp.bfloat16)   # (C, 2H)

    kernel = functools.partial(_head_kernel, tq=tq, head_size=H)

    return pl.pallas_call(
        kernel,
        out_shape=jax.ShapeDtypeStruct((B, T, H), x.dtype),
        grid_spec=pltpu.PrefetchScalarGridSpec(
            num_scalar_prefetch=0,
            grid=(B, nq),
            in_specs=[
                # full sequence for this batch: stays resident across query tiles
                pl.BlockSpec((1, T, C), lambda b, q: (b, 0, 0)),
                # q weight and fused k|v weight, constant across the grid
                pl.BlockSpec((C, H), lambda b, q: (0, 0)),
                pl.BlockSpec((C, 2 * H), lambda b, q: (0, 0)),
            ],
            out_specs=pl.BlockSpec((1, tq, H), lambda b, q: (b, q, 0)),
            scratch_shapes=[
                pltpu.VMEM((T, H), jnp.bfloat16),   # k (cached per batch)
                pltpu.VMEM((T, H), jnp.bfloat16),   # v (cached per batch)
            ],
        ),
        compiler_params=pltpu.CompilerParams(
            # Batch axis parallel (megacore); the query-tile axis MUST stay
            # "arbitrary": k_s/v_s are written at qi==0 and reused sequentially.
            dimension_semantics=("parallel", "arbitrary"),
        ),
    )(x_bf, wq_bf, wkv_bf)


def reference_head(x, w_q, w_k, w_v):
    """Pure-JAX reference matching the PyTorch forward (eval mode)."""
    B, T, C = x.shape
    q = x @ w_q
    k = x @ w_k
    v = x @ w_v
    wei = (q @ jnp.swapaxes(k, -2, -1)) * (C ** -0.5)
    mask = jnp.tril(jnp.ones((T, T), dtype=bool))
    wei = jnp.where(mask[None, :, :], wei, -jnp.inf)
    wei = jax.nn.softmax(wei, axis=-1)
    return wei @ v


if __name__ == "__main__":
    B = 2
    T = 512               # = block_size -> nq=4: exercises multi-tile flash path
    C = N_EMBED           # 512
    H = 64                # head_size

    key = jax.random.PRNGKey(0)
    kx, kq, kk, kv = jax.random.split(key, 4)

    x = jax.random.normal(kx, (B, T, C), dtype=jnp.float32)

    # nn.Linear(n_embed, head_size, bias=False): weight ~ U(-1/sqrt(C), 1/sqrt(C)),
    # stored here already transposed to (C, H).
    bound = 1.0 / (C ** 0.5)
    w_q = jax.random.uniform(kq, (C, H), jnp.float32, -bound, bound)
    w_k = jax.random.uniform(kk, (C, H), jnp.float32, -bound, bound)
    w_v = jax.random.uniform(kv, (C, H), jnp.float32, -bound, bound)

    out = head_forward(x, w_q, w_k, w_v)
    out = jax.block_until_ready(out)

    ref = reference_head(x, w_q, w_k, w_v)
    assert out.shape == (B, T, H), out.shape
    # bf16 MXU operands (f32 accumulation) -> relaxed tolerance vs the f32 reference.
    assert jnp.allclose(out, ref, atol=2.5e-2, rtol=2.5e-2), float(
        jnp.max(jnp.abs(out - ref))
    )

    print("KERNEL_OK")
</pallas_src>

<mosaic_0001>
module attributes {stable_mosaic.version = 11 : i64} {
  func.func @_head_kernel(%arg0: i32, %arg1: i32, %arg2: memref<1x512x512xbf16, #tpu.memory_space<vmem>>, %arg3: memref<512x64xbf16, #tpu.memory_space<vmem>>, %arg4: memref<512x128xbf16, #tpu.memory_space<vmem>>, %arg5: memref<1x128x64xf32, #tpu.memory_space<vmem>>, %arg6: memref<512x64xbf16, #tpu.memory_space<vmem>>, %arg7: memref<512x64xbf16, #tpu.memory_space<vmem>>) attributes {dimension_semantics = [#tpu.dimension_semantics<parallel>, #tpu.dimension_semantics<arbitrary>], iteration_bounds = array<i64: 2, 4>, scalar_prefetch = 0 : i64, scratch_operands = 2 : i64, tpu.core_type = #tpu.core_type<tc>, window_params = [{transform_indices = @transform_0, window_bounds = array<i64: 1, 512, 512>}, {pipeline_mode = #tpu.pipeline_mode<synchronous>, transform_indices = @transform_1, window_bounds = array<i64: 512, 64>}, {pipeline_mode = #tpu.pipeline_mode<synchronous>, transform_indices = @transform_2, window_bounds = array<i64: 512, 128>}, {transform_indices = @transform_3, window_bounds = array<i64: 1, 128, 64>}]} {
    %c0_i32 = arith.constant 0 : i32
    %0 = arith.cmpi eq, %arg1, %c0_i32 : i32
    %1 = arith.extui %0 : i1 to i32
    %c0_i32_0 = arith.constant 0 : i32
    %2 = arith.cmpi ne, %1, %c0_i32_0 : i32
    scf.if %2 {
      %c0_20 = arith.constant 0 : index
      %c0_21 = arith.constant 0 : index
      %c0_22 = arith.constant 0 : index
      %53 = vector.load %arg2[%c0_20, %c0_21, %c0_22] : memref<1x512x512xbf16, #tpu.memory_space<vmem>>, vector<1x512x512xbf16>
      %54 = vector.shape_cast %53 : vector<1x512x512xbf16> to vector<512x512xbf16>
      %c0_23 = arith.constant 0 : index
      %c0_24 = arith.constant 0 : index
      %55 = vector.load %arg4[%c0_23, %c0_24] : memref<512x128xbf16, #tpu.memory_space<vmem>>, vector<512x128xbf16>
      %cst_25 = arith.constant dense<0.000000e+00> : vector<512x128xf32>
      %56 = tpu.matmul %54, %55, %cst_25 {dimension_numbers = #tpu.dot_dimension_numbers<[1], [0], [0], [1], [0, 0, 1, 1], [], []>} : vector<512x512xbf16>, vector<512x128xbf16>, vector<512x128xf32> -> vector<512x128xf32>
      %57 = vector.extract_strided_slice %56 {offsets = [0, 0], sizes = [512, 64], strides = [1, 1]} : vector<512x128xf32> to vector<512x64xf32>
      %58 = arith.truncf %57 : vector<512x64xf32> to vector<512x64xbf16>
      %c0_26 = arith.constant 0 : index
      %c0_27 = arith.constant 0 : index
      %59 = vector.load %arg6[%c0_26, %c0_27] : memref<512x64xbf16, #tpu.memory_space<vmem>>, vector<512x64xbf16>
      tpu.vector_store %arg6[%c0_26, %c0_27], %58 {strides = array<i32>} : memref<512x64xbf16, #tpu.memory_space<vmem>>, vector<512x64xbf16>,
      %60 = vector.extract_strided_slice %56 {offsets = [0, 64], sizes = [512, 64], strides = [1, 1]} : vector<512x128xf32> to vector<512x64xf32>
      %61 = arith.truncf %60 : vector<512x64xf32> to vector<512x64xbf16>
      %c0_28 = arith.constant 0 : index
      %c0_29 = arith.constant 0 : index
      %62 = vector.load %arg7[%c0_28, %c0_29] : memref<512x64xbf16, #tpu.memory_space<vmem>>, vector<512x64xbf16>
      tpu.vector_store %arg7[%c0_28, %c0_29], %61 {strides = array<i32>} : memref<512x64xbf16, #tpu.memory_space<vmem>>, vector<512x64xbf16>,
    } else {
    }
    %c128_i32 = arith.constant 128 : i32
    %3 = arith.muli %arg1, %c128_i32 : i32
    %4 = tpu.assume_multiple %3, 128 : i32
    %c0 = arith.constant 0 : index
    %5 = arith.index_cast %4 : i32 to index
    %c0_1 = arith.constant 0 : index
    %6 = vector.load %arg2[%c0, %5, %c0_1] : memref<1x512x512xbf16, #tpu.memory_space<vmem>>, vector<1x128x512xbf16>
    %7 = vector.shape_cast %6 : vector<1x128x512xbf16> to vector<128x512xbf16>
    %c0_2 = arith.constant 0 : index
    %c0_3 = arith.constant 0 : index
    %8 = vector.load %arg3[%c0_2, %c0_3] : memref<512x64xbf16, #tpu.memory_space<vmem>>, vector<512x64xbf16>
    %cst = arith.constant dense<0.000000e+00> : vector<128x64xf32>
    %9 = tpu.matmul %7, %8, %cst {dimension_numbers = #tpu.dot_dimension_numbers<[1], [0], [0], [1], [0, 0, 1, 1], [], []>} : vector<128x512xbf16>, vector<512x64xbf16>, vector<128x64xf32> -> vector<128x64xf32>
    %cst_4 = arith.constant 5.120000e+02 : f32
    %cst_5 = arith.constant -5.000000e-01 : f32
    %10 = math.powf %cst_4, %cst_5 : f32
    %11 = vector.broadcast %10 : f32 to vector<128x64xf32>
    %12 = arith.mulf %9, %11 : vector<128x64xf32>
    %13 = arith.truncf %12 : vector<128x64xf32> to vector<128x64xbf16>
    %cst_6 = arith.constant 0xFF800000 : f32
    %14 = vector.broadcast %cst_6 : f32 to vector<128x1xf32>
    %cst_7 = arith.constant 0.000000e+00 : f32
    %15 = vector.broadcast %cst_7 : f32 to vector<128x1xf32>
    %cst_8 = arith.constant 0.000000e+00 : f32
    %16 = vector.broadcast %cst_8 : f32 to vector<128x64xf32>
    %c0_i32_9 = arith.constant 0 : i32
    %17 = arith.subi %arg1, %c0_i32_9 : i32
    %18 = arith.addi %c0_i32_9, %17 : i32
    %c1_i32 = arith.constant 1 : i32
    %19:3 = scf.for %arg8 = %c0_i32_9 to %18 step %c1_i32 iter_args(%arg9 = %14, %arg10 = %15, %arg11 = %16) -> (vector<128x1xf32>, vector<128x1xf32>, vector<128x64xf32>)  : i32 {
      %c128_i32_20 = arith.constant 128 : i32
      %53 = arith.muli %arg8, %c128_i32_20 : i32
      %54 = tpu.assume_multiple %53, 128 : i32
      %55 = arith.index_cast %54 : i32 to index
      %c0_21 = arith.constant 0 : index
      %56 = vector.load %arg6[%55, %c0_21] : memref<512x64xbf16, #tpu.memory_space<vmem>>, vector<128x64xbf16>
      %57 = arith.index_cast %54 : i32 to index
      %c0_22 = arith.constant 0 : index
      %58 = vector.load %arg7[%57, %c0_22] : memref<512x64xbf16, #tpu.memory_space<vmem>>, vector<128x64xbf16>
      %cst_23 = arith.constant dense<0.000000e+00> : vector<128x128xf32>
      %59 = tpu.matmul %13, %56, %cst_23 {dimension_numbers = #tpu.dot_dimension_numbers<[1], [1], [0], [0], [0, 0, 1, 0], [], []>} : vector<128x64xbf16>, vector<128x64xbf16>, vector<128x128xf32> -> vector<128x128xf32>
      %cst_24 = arith.constant dense<0xFF800000> : vector<128xf32>
      %60 = vector.multi_reduction <maximumf>, %59, %cst_24 [1] : vector<128x128xf32> to vector<128xf32>
      %61 = vector.shape_cast %60 : vector<128xf32> to vector<128x1xf32>
      %62 = arith.maximumf %arg9, %61 : vector<128x1xf32>
      %63 = arith.subf %arg9, %62 : vector<128x1xf32>
      %64 = math.exp %63 : vector<128x1xf32>
      %65 = vector.broadcast %62 : vector<128x1xf32> to vector<128x128xf32>
      %66 = arith.subf %59, %65 : vector<128x128xf32>
      %67 = math.exp %66 : vector<128x128xf32>
      %68 = arith.mulf %64, %arg10 : vector<128x1xf32>
      %cst_25 = arith.constant dense<0.000000e+00> : vector<128xf32>
      %69 = vector.multi_reduction <add>, %67, %cst_25 [1] : vector<128x128xf32> to vector<128xf32>
      %70 = vector.shape_cast %69 : vector<128xf32> to vector<128x1xf32>
      %71 = arith.addf %68, %70 : vector<128x1xf32>
      %72 = vector.broadcast %64 : vector<128x1xf32> to vector<128x64xf32>
      %73 = arith.mulf %72, %arg11 : vector<128x64xf32>
      %74 = arith.truncf %67 : vector<128x128xf32> to vector<128x128xbf16>
      %cst_26 = arith.constant dense<0.000000e+00> : vector<128x64xf32>
      %75 = tpu.matmul %74, %58, %cst_26 {dimension_numbers = #tpu.dot_dimension_numbers<[1], [0], [0], [1], [0, 0, 1, 1], [], []>} : vector<128x128xbf16>, vector<128x64xbf16>, vector<128x64xf32> -> vector<128x64xf32>
      %76 = arith.addf %73, %75 : vector<128x64xf32>
      scf.yield %62, %71, %76 : vector<128x1xf32>, vector<128x1xf32>, vector<128x64xf32>
    }
    %20 = arith.index_cast %4 : i32 to index
    %c0_10 = arith.constant 0 : index
    %21 = vector.load %arg6[%20, %c0_10] : memref<512x64xbf16, #tpu.memory_space<vmem>>, vector<128x64xbf16>
    %22 = arith.index_cast %4 : i32 to index
    %c0_11 = arith.constant 0 : index
    %23 = vector.load %arg7[%22, %c0_11] : memref<512x64xbf16, #tpu.memory_space<vmem>>, vector<128x64xbf16>
    %cst_12 = arith.constant dense<0.000000e+00> : vector<128x128xf32>
    %24 = tpu.matmul %13, %21, %cst_12 {dimension_numbers = #tpu.dot_dimension_numbers<[1], [1], [0], [0], [0, 0, 1, 0], [], []>} : vector<128x64xbf16>, vector<128x64xbf16>, vector<128x128xf32> -> vector<128x128xf32>
    %25 = tpu.iota {dimensions = array<i32: 0>} : vector<128x128xi32>
    %26 = tpu.iota {dimensions = array<i32: 1>} : vector<128x128xi32>
    %27 = arith.cmpi sle, %26, %25 : vector<128x128xi32>
    %cst_13 = arith.constant 0xFF800000 : f32
    %28 = vector.broadcast %cst_13 : f32 to vector<128x128xf32>
    %29 = arith.select %27, %24, %28 : vector<128x128xi1>, vector<128x128xf32>
    %cst_14 = arith.constant dense<0xFF800000> : vector<128xf32>
    %30 = vector.multi_reduction <maximumf>, %29, %cst_14 [1] : vector<128x128xf32> to vector<128xf32>
    %31 = vector.shape_cast %30 : vector<128xf32> to vector<128x1xf32>
    %32 = arith.maximumf %19#0, %31 : vector<128x1xf32>
    %33 = arith.subf %19#0, %32 : vector<128x1xf32>
    %34 = math.exp %33 : vector<128x1xf32>
    %35 = vector.broadcast %32 : vector<128x1xf32> to vector<128x128xf32>
    %36 = arith.subf %29, %35 : vector<128x128xf32>
    %37 = math.exp %36 : vector<128x128xf32>
    %38 = arith.mulf %34, %19#1 : vector<128x1xf32>
    %cst_15 = arith.constant dense<0.000000e+00> : vector<128xf32>
    %39 = vector.multi_reduction <add>, %37, %cst_15 [1] : vector<128x128xf32> to vector<128xf32>
    %40 = vector.shape_cast %39 : vector<128xf32> to vector<128x1xf32>
    %41 = arith.addf %38, %40 : vector<128x1xf32>
    %42 = vector.broadcast %34 : vector<128x1xf32> to vector<128x64xf32>
    %43 = arith.mulf %42, %19#2 : vector<128x64xf32>
    %44 = arith.truncf %37 : vector<128x128xf32> to vector<128x128xbf16>
    %cst_16 = arith.constant dense<0.000000e+00> : vector<128x64xf32>
    %45 = tpu.matmul %44, %23, %cst_16 {dimension_numbers = #tpu.dot_dimension_numbers<[1], [0], [0], [1], [0, 0, 1, 1], [], []>} : vector<128x128xbf16>, vector<128x64xbf16>, vector<128x64xf32> -> vector<128x64xf32>
    %46 = arith.addf %43, %45 : vector<128x64xf32>
    %47 = tpu.reciprocal %41 {approx = true} : vector<128x1xf32> -> vector<128x1xf32>
    %48 = vector.broadcast %47 : vector<128x1xf32> to vector<128x64xf32>
    %49 = arith.mulf %46, %48 : vector<128x64xf32>
    %c0_17 = arith.constant 0 : index
    %c0_18 = arith.constant 0 : index
    %c0_19 = arith.constant 0 : index
    %50 = vector.load %arg5[%c0_17, %c0_18, %c0_19] : memref<1x128x64xf32, #tpu.memory_space<vmem>>, vector<1x128x64xf32>
    %51 = vector.shape_cast %50 : vector<1x128x64xf32> to vector<128x64xf32>
    %52 = vector.shape_cast %49 : vector<128x64xf32> to vector<1x128x64xf32>
    tpu.vector_store %arg5[%c0_17, %c0_18, %c0_19], %52 {strides = array<i32>} : memref<1x128x64xf32, #tpu.memory_space<vmem>>, vector<1x128x64xf32>,
    return
  }
  func.func @transform_0(%arg0: i32, %arg1: i32) -> (i32, i32, i32) {
    %c0_i32 = arith.constant 0 : i32
    %c0_i32_0 = arith.constant 0 : i32
    %c0_i32_1 = arith.constant 0 : i32
    return %arg0, %c0_i32, %c0_i32_0 : i32, i32, i32
  }
  func.func @transform_1(%arg0: i32, %arg1: i32) -> (i32, i32) {
    %c0_i32 = arith.constant 0 : i32
    %c0_i32_0 = arith.constant 0 : i32
    %c0_i32_1 = arith.constant 0 : i32
    return %c0_i32, %c0_i32_0 : i32, i32
  }
  func.func @transform_2(%arg0: i32, %arg1: i32) -> (i32, i32) {
    %c0_i32 = arith.constant 0 : i32
    %c0_i32_0 = arith.constant 0 : i32
    %c0_i32_1 = arith.constant 0 : i32
    return %c0_i32, %c0_i32_0 : i32, i32
  }
  func.func @transform_3(%arg0: i32, %arg1: i32) -> (i32, i32, i32) {
    %c0_i32 = arith.constant 0 : i32
    %c0_i32_0 = arith.constant 0 : i32
    return %arg0, %arg1, %c0_i32 : i32, i32, i32
  }
}

</mosaic_0001>

<bundles_post_ra>
// kernel: tpu_custom_call.1
= control target key start
LH: loop header
LB: loop body
LE: loop exit
PB: predicated region body
PF: predicated region fallthrough
CT: control target
= control target key end

     0   :  { %8 = vsyncpa [#allocation5], 0  ;;  %s10031_s0 = inlined_call_operand.hbm [shape: bf16[2,512,512], index: 0, kind: input, shape index: {}]   ;;  %s10032_s1 = inlined_call_operand.vmem [shape: bf16[512,64], index: 1, kind: input, shape index: {}]   ;;  %s10033_s2 = inlined_call_operand.vmem [shape: bf16[512,128], index: 2, kind: input, shape index: {}]   ;;  %s10034_s3 = inlined_call_operand.vmem [shape: f32[2,512,64], index: 3, kind: output, shape index: {}]  }
   0x1   :  { %10 = vsyncpa [#allocation5 + $0x1], 0  ;;  %s7752_s12 = smov 0   ;;  %s7754_s13 = smov 0  }
   0x2   :  { %s7756_s14 = smov 0   ;;  %s7758_s15 = smov 0  }
   0x3   :  { %s7760_s16 = smov 0   ;;  %s7762_s17 = smov 0  }
   0x4   :  { %s7764_s18 = smov 0   ;;  %s7766_s19 = smov 0  }
   0x5 LB: > { %s4491_s20 = sadd.s32 4294967295, %s7339_s19   ;;  %s25_s21 = sadd.s32 1, %s7331_s17  ;;  %s7339_s19 = sphi %s7766_s19, %s16_s19   ;;  %s7335_s18 = sphi %s7764_s18, %s10356_s18   ;;  %s7331_s17 = sphi %s7762_s17, %s10355_s17   ;;  %s7327_s16 = sphi %s7760_s16, %s10354_s16   ;;  %s7323_s15 = sphi %s7758_s15, %s10353_s15   ;;  %s7319_s14 = sphi %s7756_s14, %s10352_s14   ;;  %s7315_s13 = sphi %s7754_s13, %s10351_s13   ;;  %s7311_s12 = sphi %s7752_s12, %s10350_s12  }
   0x6   : > { %p26_p0 = scmp.ge.s32.totalorder %s25_s21, 4  ;;  %s28_s22 = sadd.s32 1, %s7335_s18 }
   0x7   : > { %s35_s23 = sadd.s32 1, %s7319_s14  ;;  %p42_p1 = scmp.ne.s32.totalorder %s7319_s14, %s7315_s13 }
   0x8   : > { %s10358_s21 = smov (%p26_p0, %s25_s21), 0  ;;  %s10360_s22 = smov (!%p26_p0, %s28_s22), %s7335_s18 }
   0x9   : > { %p43_p2 = scmp.eq.s32.totalorder %s7339_s19, 0  ;;  %p48_p3 = scmp.ne.s32.totalorder %s7315_s13, %s7311_s12 }
   0xa   : > { %p30_p4 = scmp.ge.s32.totalorder %s10360_s22, 2  ;;  %p49_p5 = scmp.eq.s32.totalorder %s4491_s20, 0 }
   0xb   : > { %p7801_p6 = por %p43_p2, %p42_p1  ;;  %p5851_p8 = scmp.lt.s32.totalorder %s7339_s19, 8 }
   0xc   : > { %s10362_s22 = smov (%p30_p4, %s10360_s22), 0  ;;  %p7807_p7 = por %p49_p5, %p48_p3 }
   0xd   : > { %s32_s26 = ssub.s32 %s7335_s18, %s10362_s22  ;;  %s148_s27 = sand.u32 1, %s7319_s14  }
   0xe   : > { %p33_p9 = scmp.eq.s32.totalorder %s32_s26, 0  ;;  %s4495_s28 = sshll.u32 %s148_s27, 10 }
   0xf   : > { %s5555_s29 = sshll.u32 %s7335_s18, 10  ;;  %s152_s8 = scalar_lea.vmem [#allocation4], %s4495_s28 }
  0x10   : > { %s7817_s30 = scalar_select %p33_p9, %s7319_s14, %s35_s23  }
  0x11   : > { %s157_s6 = scalar_lea.hbm %s10031_s0, %s5555_s29  ;;  %s160_s9 = sshll.u32 %s152_s8, 4  ;;  %s161_s9 = int_to_ptr.vmem [resolvable:$true] %s160_s9 }
  0x12   : > { %s158_s7 = sshll.u32 %s157_s6, 4  ;;  %p5848_p10 = pnand %p5851_p8, %p7801_p6  ;;  %s159_s7 = int_to_ptr.hbm [resolvable:$true] %s158_s7 }
  0x13   : > { %p4498_p11 = scmp.ge.s32.totalorder %s7339_s19, 1  ;;  %p168_p12 = scmp.lt.s32.totalorder %s7339_s19, 9 }
  0x14   : > { %s149_s10 = scalar_lea.sflag [#allocation5], %s148_s27  ;;  %s7729_s11 = smov 256  }
  0x15   : > { %s7730_s12 = smov 16   ;;  %p169_p13 = pnand %p4498_p11, %p168_p12 }
  0x16   : > { %5850 = dma.hbm_to_vmem [thread:$0]  (!%p5848_p10), %s159_s7, 16384, %s161_s9, %s149_s10, %s7729_s11, %s7729_s11, %s7730_s12  }
  0x17   : > { %172 = sbr.rel (%p169_p13) target bundleno = 2240 (0x8c0), region = 32 }
  0x1c   : > { %s174_s20 = sand.u32 1, %s7315_s13  }
  0x1d   : > { %s4499_s23 = sshll.u32 %s174_s20, 10  ;;  %s175_s26 = scalar_lea.sflag [#allocation5], %s174_s20 }
  0x1e   : > { %s7829_s28 = scalar_lea.vmem [#allocation4], %s4499_s23 }
  0x1f   : > { %7306 = dma.done.wait (%p7807_p7), %s175_s26, 16384  }
  0x20   : > { %7308 = vsyncadd (%p7807_p7), %s175_s26, 4294950912  ;;  %s4500_s24 = sshll.u32 %s7323_s15, 4  ;;  %p207_p0 = scmp.lt.s32.totalorder %s7327_s16, 1 }
  0x21   : > { %p209_p1 = scmp.lt.s32.totalorder %s4500_s24, 63  ;;  %p4503_p2 = scmp.ne.s32.totalorder %s7323_s15, 0 }
  0x22   : > { %s10364_s16 = smov (!%p207_p0, %s7327_s16), 1  ;;  %s7731_s25 = smov (!%p4503_p2), 64  }
  0x23   : > { %s10366_s24 = smov (!%p209_p1, %s4500_s24), 63  ;;  %s4501_s27 = sshll.u32 %s10364_s16, 6 }
  0x24   : > { %s212_s29 = sadd.s32 %s4501_s27, %s10366_s24  ;;  %219 = sbr.rel (%p4503_p2) target bundleno = 833 (0x341), region = 40 }
  0x25   : > { %s4502_s4 = sshll.u32 %s212_s29, 3 }
  0x26   : > { %s7841_s7 = scalar_lea.vmem %s10034_s3, %s4502_s4 }
  0x29   : > { %v5691_v0 = vld [vmem:[%s10033_s2 + $0x38] sm:$0xff]  ;;  %v5690_v4 = vld [vmem:[%s10033_s2 + $0x30] sm:$0xff]  ;;  %v5689_v8 = vld [vmem:[%s10033_s2 + $0x28] sm:$0xff]  ;;  %vm1984_vm0 = vcmask 519168  }
  0x2a   : > { %v5699_v1 = vld [vmem:[%s10033_s2 + $0x78] sm:$0xff]  ;;  %1244 = vmatpush.bf16.msra.mxu0 %v5691_v0  ;;  %v5698_v5 = vld [vmem:[%s10033_s2 + $0x70] sm:$0xff]  ;;  %v5697_v9 = vld [vmem:[%s10033_s2 + $0x68] sm:$0xff] }
  0x2b   : > { %v5707_v2 = vld [vmem:[%s10033_s2 + $0xb8] sm:$0xff]  ;;  %1413 = vmatpush.bf16.msra.mxu1 %v5699_v1  ;;  %v5706_v6 = vld [vmem:[%s10033_s2 + $0xb0] sm:$0xff]  ;;  %v5705_v10 = vld [vmem:[%s10033_s2 + $0xa8] sm:$0xff] }
  0x2c   : > { %v5715_v3 = vld [vmem:[%s10033_s2 + $0xf8] sm:$0xff]  ;;  %1582 = vmatpush.bf16.msra.mxu2 %v5707_v2  ;;  %v5714_v7 = vld [vmem:[%s10033_s2 + $0xf0] sm:$0xff]  ;;  %v5713_v11 = vld [vmem:[%s10033_s2 + $0xe8] sm:$0xff] }
  0x2d   : > { %1751 = vmatpush.bf16.msra.mxu3 %v5715_v3  ;;  %v5688_v12 = vld [vmem:[%s10033_s2 + $0x20] sm:$0xff]  ;;  %v5687_v16 = vld [vmem:[%s10033_s2 + $0x18] sm:$0xff]  ;;  %v5686_v20 = vld [vmem:[%s10033_s2 + $0x10] sm:$0xff] }
  0x2e   : > { %1245 = vmatpush.bf16.msra.mxu0 %v5690_v4  ;;  %v5696_v13 = vld [vmem:[%s10033_s2 + $0x60] sm:$0xff]  ;;  %v5695_v17 = vld [vmem:[%s10033_s2 + $0x58] sm:$0xff]  ;;  %v5694_v21 = vld [vmem:[%s10033_s2 + $0x50] sm:$0xff] }
  0x2f   : > { %1414 = vmatpush.bf16.msra.mxu1 %v5698_v5  ;;  %v5704_v14 = vld [vmem:[%s10033_s2 + $0xa0] sm:$0xff]  ;;  %v5703_v18 = vld [vmem:[%s10033_s2 + $0x98] sm:$0xff]  ;;  %v5702_v22 = vld [vmem:[%s10033_s2 + $0x90] sm:$0xff] }
  0x30   : > { %1583 = vmatpush.bf16.msra.mxu2 %v5706_v6  ;;  %v5712_v15 = vld [vmem:[%s10033_s2 + $0xe0] sm:$0xff]  ;;  %v5711_v19 = vld [vmem:[%s10033_s2 + $0xd8] sm:$0xff]  ;;  %v5710_v23 = vld [vmem:[%s10033_s2 + $0xd0] sm:$0xff] }
  0x31   : > { %1752 = vmatpush.bf16.msra.mxu3 %v5714_v7  ;;  %v5685_v24 = vld [vmem:[%s10033_s2 + $0x8] sm:$0xff]  ;;  %v5684_v28 = vld [vmem:[%s10033_s2] sm:$0xff]  ;;  %v5558_v33 = vld [vmem:[%s7829_s28 + $0xc] sm:$0xf0] }
  0x32   : > { %1246 = vmatpush.bf16.msra.mxu0 %v5689_v8  ;;  %v5693_v25 = vld [vmem:[%s10033_s2 + $0x48] sm:$0xff]  ;;  %v5692_v29 = vld [vmem:[%s10033_s2 + $0x40] sm:$0xff]  ;;  %v4508_v35 = vld [vmem:[%s7829_s28 + $0x10] sm:$0xf0] }
  0x33   : > { %1415 = vmatpush.bf16.msra.mxu1 %v5697_v9  ;;  %v5701_v26 = vld [vmem:[%s10033_s2 + $0x88] sm:$0xff]  ;;  %v5700_v30 = vld [vmem:[%s10033_s2 + $0x80] sm:$0xff]  ;;  %v5559_v37 = vld [vmem:[%s7829_s28 + $0x14] sm:$0xf0] }
  0x34   : > { %1584 = vmatpush.bf16.msra.mxu2 %v5705_v10  ;;  %v5709_v27 = vld [vmem:[%s10033_s2 + $0xc8] sm:$0xff]  ;;  %v5708_v31 = vld [vmem:[%s10033_s2 + $0xc0] sm:$0xff]  ;;  %v4516_v39 = vld [vmem:[%s7829_s28 + $0x18] sm:$0xf0] }
  0x35   : > { %1753 = vmatpush.bf16.msra.mxu3 %v5713_v11  ;;  %v4506_v32 = vld [vmem:[%s7829_s28] sm:$0xf]  ;;  %v5556_v34 = vld [vmem:[%s7829_s28 + $0x4] sm:$0xf]  ;;  %v4514_v36 = vld [vmem:[%s7829_s28 + $0x8] sm:$0xf] }
  0x36   : > { %1247 = vmatpush.bf16.msra.mxu0 %v5688_v12  ;;  %v5557_v38 = vld [vmem:[%s7829_s28 + $0xc] sm:$0xf]  ;;  %v4507_v40 = vor.u32 %v5558_v33, %v4506_v32  ;;  %v4511_v41 = vor.u32 %v5556_v34, %v4508_v35  ;;  %v4515_v42 = vor.u32 %v5559_v37, %v4514_v36  ;;  %v4522_v44 = vld [vmem:[%s7829_s28 + $0x20] sm:$0xf]  ;;  %v5562_v45 = vld [vmem:[%s7829_s28 + $0x2c] sm:$0xf0] }
  0x37   : > { %1416 = vmatpush.bf16.msra.mxu1 %v5696_v13  ;;  %v4519_v43 = vor.u32 %v5557_v38, %v4516_v39  ;;  %v5560_v46 = vld [vmem:[%s7829_s28 + $0x24] sm:$0xf]  ;;  %v4524_v47 = vld [vmem:[%s7829_s28 + $0x30] sm:$0xf0]  ;;  %v4530_v48 = vld [vmem:[%s7829_s28 + $0x28] sm:$0xf]  ;;  %v4523_v52 = vor.u32 %v5562_v45, %v4522_v44 }
  0x38   : > { %1585 = vmatpush.bf16.msra.mxu2 %v5704_v14  ;;  %v5563_v49 = vld [vmem:[%s7829_s28 + $0x34] sm:$0xf0]  ;;  %v5561_v50 = vld [vmem:[%s7829_s28 + $0x2c] sm:$0xf]  ;;  %v4532_v51 = vld [vmem:[%s7829_s28 + $0x38] sm:$0xf0]  ;;  %v4527_v53 = vor.u32 %v5560_v46, %v4524_v47 }
  0x39   : > { %1754 = vmatpush.bf16.msra.mxu3 %v5712_v15  ;;  %v4531_v54 = vor.u32 %v5563_v49, %v4530_v48  ;;  %v4535_v55 = vor.u32 %v5561_v50, %v4532_v51  ;;  %v4538_v56 = vld [vmem:[%s7829_s28 + $0x40] sm:$0xf]  ;;  %v5566_v57 = vld [vmem:[%s7829_s28 + $0x4c] sm:$0xf0]  ;;  %v5564_v58 = vld [vmem:[%s7829_s28 + $0x44] sm:$0xf] }
  0x3a   : > { %1248 = vmatpush.bf16.msra.mxu0 %v5687_v16  ;;  %v4540_v59 = vld [vmem:[%s7829_s28 + $0x50] sm:$0xf0]  ;;  %v4546_v60 = vld [vmem:[%s7829_s28 + $0x48] sm:$0xf]  ;;  %v5567_v61 = vld [vmem:[%s7829_s28 + $0x54] sm:$0xf0]  ;;  %v4539_v0 = vor.u32 %v5566_v57, %v4538_v56 }
  0x3b   : > { %1417 = vmatpush.bf16.msra.mxu1 %v5695_v17  ;;  %v5565_v62 = vld [vmem:[%s7829_s28 + $0x4c] sm:$0xf]  ;;  %v4548_v63 = vld [vmem:[%s7829_s28 + $0x58] sm:$0xf0]  ;;  %v4543_v1 = vor.u32 %v5564_v58, %v4540_v59  ;;  %v4547_v2 = vor.u32 %v5567_v61, %v4546_v60  ;;  %v4554_v4 = vld [vmem:[%s7829_s28 + $0x60] sm:$0xf] }
  0x3c   : > { %1586 = vmatpush.bf16.msra.mxu2 %v5703_v18  ;;  %v4551_v3 = vor.u32 %v5565_v62, %v4548_v63  ;;  %v5570_v5 = vld [vmem:[%s7829_s28 + $0x6c] sm:$0xf0]  ;;  %v5568_v6 = vld [vmem:[%s7829_s28 + $0x64] sm:$0xf]  ;;  %v4556_v7 = vld [vmem:[%s7829_s28 + $0x70] sm:$0xf0] }
  0x3d   : > { %1755 = vmatpush.bf16.msra.mxu3 %v5711_v19  ;;  %v4562_v8 = vld [vmem:[%s7829_s28 + $0x68] sm:$0xf]  ;;  %v5571_v9 = vld [vmem:[%s7829_s28 + $0x74] sm:$0xf0]  ;;  %v5569_v10 = vld [vmem:[%s7829_s28 + $0x6c] sm:$0xf]  ;;  %v4555_v12 = vor.u32 %v5570_v5, %v4554_v4  ;;  %v4559_v13 = vor.u32 %v5568_v6, %v4556_v7 }
  0x3e   : > { %1249 = vmatpush.bf16.msra.mxu0 %v5686_v20  ;;  %v4564_v11 = vld [vmem:[%s7829_s28 + $0x78] sm:$0xf0]  ;;  %v4563_v14 = vor.u32 %v5571_v9, %v4562_v8  ;;  %v4570_v16 = vld [vmem:[%s7829_s28 + $0x80] sm:$0xf]  ;;  %v5574_v17 = vld [vmem:[%s7829_s28 + $0x8c] sm:$0xf0] }
  0x3f   : > { %1418 = vmatpush.bf16.msra.mxu1 %v5694_v21  ;;  %v4567_v15 = vor.u32 %v5569_v10, %v4564_v11  ;;  %v5572_v18 = vld [vmem:[%s7829_s28 + $0x84] sm:$0xf]  ;;  %v4572_v19 = vld [vmem:[%s7829_s28 + $0x90] sm:$0xf0]  ;;  %v4578_v20 = vld [vmem:[%s7829_s28 + $0x88] sm:$0xf] }
  0x40   : > { %1587 = vmatpush.bf16.msra.mxu2 %v5702_v22  ;;  %v5575_v21 = vld [vmem:[%s7829_s28 + $0x94] sm:$0xf0]  ;;  %v5573_v22 = vld [vmem:[%s7829_s28 + $0x8c] sm:$0xf]  ;;  %v4594_v32 = vld [vmem:[%s7829_s28 + $0xa8] sm:$0xf] }
  0x41   : > { %1756 = vmatpush.bf16.msra.mxu3 %v5710_v23  ;;  %v4580_v23 = vld [vmem:[%s7829_s28 + $0x98] sm:$0xf0]  ;;  %v5579_v33 = vld [vmem:[%s7829_s28 + $0xb4] sm:$0xf0]  ;;  %v5577_v34 = vld [vmem:[%s7829_s28 + $0xac] sm:$0xf] }
  0x42   : > { %1250 = vmatpush.bf16.msra.mxu0 %v5685_v24  ;;  %v4571_v24 = vor.u32 %v5574_v17, %v4570_v16  ;;  %v4596_v35 = vld [vmem:[%s7829_s28 + $0xb8] sm:$0xf0]  ;;  %v4595_v38 = vor.u32 %v5579_v33, %v4594_v32  ;;  %v4610_v44 = vld [vmem:[%s7829_s28 + $0xc8] sm:$0xf]  ;;  %v5583_v45 = vld [vmem:[%s7829_s28 + $0xd4] sm:$0xf0] }
  0x43   : > { %1419 = vmatpush.bf16.msra.mxu1 %v5693_v25  ;;  %v4575_v25 = vor.u32 %v5572_v18, %v4572_v19  ;;  %v4599_v39 = vor.u32 %v5577_v34, %v4596_v35  ;;  %v5581_v46 = vld [vmem:[%s7829_s28 + $0xcc] sm:$0xf]  ;;  %v4612_v47 = vld [vmem:[%s7829_s28 + $0xd8] sm:$0xf0]  ;;  %v4611_v50 = vor.u32 %v5583_v45, %v4610_v44  ;;  %v4626_v56 = vld [vmem:[%s7829_s28 + $0xe8] sm:$0xf] }
  0x44   : > { %1588 = vmatpush.bf16.msra.mxu2 %v5701_v26  ;;  %v4579_v26 = vor.u32 %v5575_v21, %v4578_v20  ;;  %v4615_v51 = vor.u32 %v5581_v46, %v4612_v47  ;;  %v5587_v57 = vld [vmem:[%s7829_s28 + $0xf4] sm:$0xf0]  ;;  %v5585_v58 = vld [vmem:[%s7829_s28 + $0xec] sm:$0xf]  ;;  %v4628_v59 = vld [vmem:[%s7829_s28 + $0xf8] sm:$0xf0] }
  0x45   : > { %1757 = vmatpush.bf16.msra.mxu3 %v5709_v27  ;;  %v4583_v27 = vor.u32 %v5573_v22, %v4580_v23  ;;  %v4627_v62 = vor.u32 %v5587_v57, %v4626_v56  ;;  %v4631_v63 = vor.u32 %v5585_v58, %v4628_v59  ;;  %v4642_v4 = vld [vmem:[%s7829_s28 + $0x108] sm:$0xf]  ;;  %v5591_v5 = vld [vmem:[%s7829_s28 + $0x114] sm:$0xf0]  ;;  %v5589_v6 = vld [vmem:[%s7829_s28 + $0x10c] sm:$0xf] }
  0x46   : > { %1251 = vmatpush.bf16.msra.mxu0 %v5684_v28  ;;  %v4586_v28 = vld [vmem:[%s7829_s28 + $0xa0] sm:$0xf]  ;;  %v4644_v7 = vld [vmem:[%s7829_s28 + $0x118] sm:$0xf0]  ;;  %v5594_v22 = vld [vmem:[%s7829_s28 + $0x12c] sm:$0xf0] }
  0x47   : > { %1420 = vmatpush.bf16.msra.mxu1 %v5692_v29  ;;  %v5578_v29 = vld [vmem:[%s7829_s28 + $0xac] sm:$0xf0]  ;;  %v4650_v21 = vld [vmem:[%s7829_s28 + $0x120] sm:$0xf]  ;;  %v5597_v56 = vld [vmem:[%s7829_s28 + $0x14c] sm:$0xf] }
  0x48   : > { %1589 = vmatpush.bf16.msra.mxu2 %v5700_v30  ;;  %v5576_v30 = vld [vmem:[%s7829_s28 + $0xa4] sm:$0xf]  ;;  %v4587_v36 = vor.u32 %v5578_v29, %v4586_v28  ;;  %v5593_v28 = vld [vmem:[%s7829_s28 + $0x12c] sm:$0xf]  ;;  %v4660_v29 = vld [vmem:[%s7829_s28 + $0x138] sm:$0xf0]  ;;  %v4651_v33 = vor.u32 %v5594_v22, %v4650_v21 }
  0x49   : > { %1758 = vmatpush.bf16.msra.mxu3 %v5708_v31  ;;  %1252 = vmatmul.bf16.vlgmr.msra.gmra.mxu0 %v4507_v40  ;;  %v4588_v31 = vld [vmem:[%s7829_s28 + $0xb0] sm:$0xf0]  ;;  %v4602_v40 = vld [vmem:[%s7829_s28 + $0xc0] sm:$0xf]  ;;  %v4676_v57 = vld [vmem:[%s7829_s28 + $0x158] sm:$0xf0] }
  0x4a   : > { %1421 = vmatmul.bf16.vlgmr.msra.gmra.mxu1 %v4511_v41  ;;  %v4591_v37 = vor.u32 %v5576_v30, %v4588_v31  ;;  %v5582_v41 = vld [vmem:[%s7829_s28 + $0xcc] sm:$0xf0]  ;;  %v4692_v21 = vld [vmem:[%s7829_s28 + $0x178] sm:$0xf0] }
  0x4b   : > { %1590 = vmatmul.bf16.vlgmr.msra.gmra.mxu2 %v4515_v42  ;;  %v5580_v42 = vld [vmem:[%s7829_s28 + $0xc4] sm:$0xf]  ;;  %v4603_v48 = vor.u32 %v5582_v41, %v4602_v40 }
  0x4c   : > { %1759 = vmatmul.bf16.vlgmr.msra.gmra.mxu3 %v4519_v43  ;;  %v4604_v43 = vld [vmem:[%s7829_s28 + $0xd0] sm:$0xf0] }
  0x4d   : > { %v4607_v49 = vor.u32 %v5580_v42, %v4604_v43 }
  0x59   : > { %1257 = vmatmul.bf16.gmra.mxu0 %v4523_v52  ;;  %v4618_v52 = vld [vmem:[%s7829_s28 + $0xe0] sm:$0xf] }
  0x5a   : > { %1426 = vmatmul.bf16.gmra.mxu1 %v4527_v53  ;;  %v5586_v53 = vld [vmem:[%s7829_s28 + $0xec] sm:$0xf0] }
  0x5b   : > { %1595 = vmatmul.bf16.gmra.mxu2 %v4531_v54  ;;  %v5584_v54 = vld [vmem:[%s7829_s28 + $0xe4] sm:$0xf]  ;;  %v4619_v60 = vor.u32 %v5586_v53, %v4618_v52  ;;  %v4668_v53 = vld [vmem:[%s7829_s28 + $0x150] sm:$0xf0] }
  0x5c   : > { %1764 = vmatmul.bf16.gmra.mxu3 %v4535_v55  ;;  %v4620_v55 = vld [vmem:[%s7829_s28 + $0xf0] sm:$0xf0]  ;;  %v5596_v52 = vld [vmem:[%s7829_s28 + $0x144] sm:$0xf] }
  0x5d   : > { %v4623_v61 = vor.u32 %v5584_v54, %v4620_v55  ;;  %v4674_v54 = vld [vmem:[%s7829_s28 + $0x148] sm:$0xf]  ;;  %v5599_v55 = vld [vmem:[%s7829_s28 + $0x154] sm:$0xf0] }
  0x69   : > { %1262 = vmatmul.bf16.gmra.mxu0 %v4539_v0  ;;  %v4634_v0 = vld [vmem:[%s7829_s28 + $0x100] sm:$0xf] }
  0x6a   : > { %1431 = vmatmul.bf16.gmra.mxu1 %v4543_v1  ;;  %v5590_v1 = vld [vmem:[%s7829_s28 + $0x10c] sm:$0xf0] }
  0x6b   : > { %1600 = vmatmul.bf16.gmra.mxu2 %v4547_v2  ;;  %v5588_v2 = vld [vmem:[%s7829_s28 + $0x104] sm:$0xf]  ;;  %v4635_v8 = vor.u32 %v5590_v1, %v4634_v0 }
  0x6c   : > { %1769 = vmatmul.bf16.gmra.mxu3 %v4551_v3  ;;  %v4636_v3 = vld [vmem:[%s7829_s28 + $0x110] sm:$0xf0] }
  0x6d   : > { %v4639_v9 = vor.u32 %v5588_v2, %v4636_v3  ;;  %v4675_v2 = vor.u32 %v5599_v55, %v4674_v54  ;;  %v4679_v3 = vor.u32 %v5597_v56, %v4676_v57 }
  0x79   : > { %1267 = vmatmul.bf16.gmra.mxu0 %v4555_v12  ;;  %v4643_v12 = vor.u32 %v5591_v5, %v4642_v4 }
  0x7a   : > { %1436 = vmatmul.bf16.gmra.mxu1 %v4559_v13  ;;  %v4647_v13 = vor.u32 %v5589_v6, %v4644_v7 }
  0x7b   : > { %1605 = vmatmul.bf16.gmra.mxu2 %v4563_v14 }
  0x7c   : > { %1774 = vmatmul.bf16.gmra.mxu3 %v4567_v15 }
  0x89   : > { %1272 = vmatmul.bf16.gmra.mxu0 %v4571_v24  ;;  %v5592_v24 = vld [vmem:[%s7829_s28 + $0x124] sm:$0xf] }
  0x8a   : > { %1441 = vmatmul.bf16.gmra.mxu1 %v4575_v25  ;;  %v4652_v25 = vld [vmem:[%s7829_s28 + $0x130] sm:$0xf0] }
  0x8b   : > { %1610 = vmatmul.bf16.gmra.mxu2 %v4579_v26  ;;  %v4658_v26 = vld [vmem:[%s7829_s28 + $0x128] sm:$0xf]  ;;  %v4655_v34 = vor.u32 %v5592_v24, %v4652_v25 }
  0x8c   : > { %1779 = vmatmul.bf16.gmra.mxu3 %v4583_v27  ;;  %v5595_v27 = vld [vmem:[%s7829_s28 + $0x134] sm:$0xf0] }
  0x99   : > { %1277 = vmatmul.bf16.gmra.mxu0 %v4587_v36 }
  0x9a   : > { %1446 = vmatmul.bf16.gmra.mxu1 %v4591_v37 }
  0x9b   : > { %1615 = vmatmul.bf16.gmra.mxu2 %v4595_v38  ;;  %v4659_v38 = vor.u32 %v5595_v27, %v4658_v26 }
  0x9c   : > { %1784 = vmatmul.bf16.gmra.mxu3 %v4599_v39  ;;  %v4663_v39 = vor.u32 %v5593_v28, %v4660_v29 }
  0xa9   : > { %1282 = vmatmul.bf16.gmra.mxu0 %v4603_v48 }
  0xaa   : > { %1451 = vmatmul.bf16.gmra.mxu1 %v4607_v49  ;;  %v4666_v49 = vld [vmem:[%s7829_s28 + $0x140] sm:$0xf] }
  0xab   : > { %1620 = vmatmul.bf16.gmra.mxu2 %v4611_v50  ;;  %v5598_v50 = vld [vmem:[%s7829_s28 + $0x14c] sm:$0xf0] }
  0xac   : > { %1789 = vmatmul.bf16.gmra.mxu3 %v4615_v51 }
  0xb9   : > { %1287 = vmatmul.bf16.gmra.mxu0 %v4619_v60 }
  0xba   : > { %1456 = vmatmul.bf16.gmra.mxu1 %v4623_v61  ;;  %v4667_v61 = vor.u32 %v5598_v50, %v4666_v49  ;;  %v4708_v49 = vld [vmem:[%s7829_s28 + $0x198] sm:$0xf0] }
  0xbb   : > { %1625 = vmatmul.bf16.gmra.mxu2 %v4627_v62  ;;  %v4671_v62 = vor.u32 %v5596_v52, %v4668_v53 }
  0xbc   : > { %1794 = vmatmul.bf16.gmra.mxu3 %v4631_v63 }
  0xc6   : > { %v1253_v10 = vpop.f32.mrf.mxu0 }
  0xc7   : > { %v1422_v11 = vpop.f32.mrf.mxu1 }
  0xc8   : > { %v1423_v14 = vadd.f32 %v1422_v11, %v1253_v10 }
  0xc9   : > { %1292 = vmatmul.bf16.gmra.mxu0 %v4635_v8 }
  0xca   : > { %1461 = vmatmul.bf16.gmra.mxu1 %v4639_v9 }
  0xcb   : > { %1630 = vmatmul.bf16.gmra.mxu2 %v4643_v12 }
  0xcc   : > { %1799 = vmatmul.bf16.gmra.mxu3 %v4647_v13  ;;  %v4682_v13 = vld [vmem:[%s7829_s28 + $0x160] sm:$0xf] }
  0xce   : > { %v1591_v15 = vpop.f32.mrf.mxu2  ;;  %v1255_v18 = vpop.f32.mrf.mxu0 }
  0xcf   : > { %v1760_v16 = vpop.f32.mrf.mxu3  ;;  %v1592_v17 = vadd.f32 %v1591_v15, %v1423_v14  ;;  %v1424_v19 = vpop.f32.mrf.mxu1  ;;  %v5602_v14 = vld [vmem:[%s7829_s28 + $0x16c] sm:$0xf0] }
  0xd0   : > { %v1425_v30 = vadd.f32 %v1424_v19, %v1255_v18  ;;  %v4690_v18 = vld [vmem:[%s7829_s28 + $0x168] sm:$0xf]  ;;  %v5603_v19 = vld [vmem:[%s7829_s28 + $0x174] sm:$0xf0]  ;;  %v4683_v25 = vor.u32 %v5602_v14, %v4682_v13  ;;  %v4724_v13 = vld [vmem:[%s7829_s28 + $0x1b8] sm:$0xf0] }
  0xd1   : > { %v1761_v20 = vadd.f32 %v1760_v16, %v1592_v17  ;;  %v5600_v16 = vld [vmem:[%s7829_s28 + $0x164] sm:$0xf]  ;;  %v4684_v17 = vld [vmem:[%s7829_s28 + $0x170] sm:$0xf0] }
  0xd2   : > { %v4687_v26 = vor.u32 %v5600_v16, %v4684_v17 }
  0xd3   : > { %v1920_v23 = vpack.c.bf16 %v1761_v20, %v1761_v20  ;;  %v5601_v20 = vld [vmem:[%s7829_s28 + $0x16c] sm:$0xf] }
  0xd5   : > { %1985 = vst.msk [vmem:[#allocation2] sm:$0xf] %vm1984_vm0, %v1920_v23  ;;  %2113 = vrot.lane.b32.xlu0 %v1920_v23, %s7731_s25 }
  0xd6   : > { %v1593_v31 = vpop.f32.mrf.mxu2  ;;  %v1258_v36 = vpop.f32.mrf.mxu0 }
  0xd7   : > { %v1762_v32 = vpop.f32.mrf.mxu3  ;;  %v1594_v35 = vadd.f32 %v1593_v31, %v1425_v30  ;;  %v1427_v37 = vpop.f32.mrf.mxu1  ;;  %v4691_v30 = vor.u32 %v5603_v19, %v4690_v18  ;;  %v4695_v31 = vor.u32 %v5601_v20, %v4692_v21 }
  0xd8   : > { %v1428_v42 = vadd.f32 %v1427_v37, %v1258_v36 }
  0xd9   : > { %v1763_v40 = vadd.f32 %v1762_v32, %v1594_v35  ;;  %1297 = vmatmul.bf16.gmra.mxu0 %v4651_v33 }
  0xda   : > { %1466 = vmatmul.bf16.gmra.mxu1 %v4655_v34 }
  0xdb   : > { %v1921_v41 = vpack.c.bf16 %v1763_v40, %v1763_v40  ;;  %1635 = vmatmul.bf16.gmra.mxu2 %v4659_v38 }
  0xdc   : > { %1804 = vmatmul.bf16.gmra.mxu3 %v4663_v39 }
  0xdd   : > { %1986 = vst.msk [vmem:[#allocation2 + $0x4] sm:$0xf] %vm1984_vm0, %v1921_v41  ;;  %2115 = vrot.lane.b32.xlu0 %v1921_v41, %s7731_s25  ;;  %v4698_v41 = vld [vmem:[%s7829_s28 + $0x180] sm:$0xf] }
  0xde   : > { %v1596_v43 = vpop.f32.mrf.mxu2  ;;  %v1260_v46 = vpop.f32.mrf.mxu0 }
  0xdf   : > { %v1765_v44 = vpop.f32.mrf.mxu3  ;;  %v1597_v45 = vadd.f32 %v1596_v43, %v1428_v42  ;;  %v1429_v47 = vpop.f32.mrf.mxu1  ;;  %v5606_v42 = vld [vmem:[%s7829_s28 + $0x18c] sm:$0xf0] }
  0xe0   : > { %v1430_v58 = vadd.f32 %v1429_v47, %v1260_v46  ;;  %v4706_v46 = vld [vmem:[%s7829_s28 + $0x188] sm:$0xf]  ;;  %v5607_v47 = vld [vmem:[%s7829_s28 + $0x194] sm:$0xf0]  ;;  %v4699_v53 = vor.u32 %v5606_v42, %v4698_v41  ;;  %v4740_v41 = vld [vmem:[%s7829_s28 + $0x1d8] sm:$0xf0] }
  0xe1   : > { %v1766_v48 = vadd.f32 %v1765_v44, %v1597_v45  ;;  %v5604_v44 = vld [vmem:[%s7829_s28 + $0x184] sm:$0xf]  ;;  %v4700_v45 = vld [vmem:[%s7829_s28 + $0x190] sm:$0xf0] }
  0xe2   : > { %v4703_v54 = vor.u32 %v5604_v44, %v4700_v45 }
  0xe3   : > { %v1922_v51 = vpack.c.bf16 %v1766_v48, %v1766_v48  ;;  %v5605_v48 = vld [vmem:[%s7829_s28 + $0x18c] sm:$0xf] }
  0xe5   : > { %1987 = vst.msk [vmem:[#allocation2 + $0x8] sm:$0xf] %vm1984_vm0, %v1922_v51  ;;  %2117 = vrot.lane.b32.xlu1 %v1922_v51, %s7731_s25 }
  0xe6   : > { %v1598_v59 = vpop.f32.mrf.mxu2  ;;  %v1263_v0 = vpop.f32.mrf.mxu0 }
  0xe7   : > { %v1767_v60 = vpop.f32.mrf.mxu3  ;;  %v1599_v63 = vadd.f32 %v1598_v59, %v1430_v58  ;;  %v1432_v1 = vpop.f32.mrf.mxu1  ;;  %v4707_v58 = vor.u32 %v5607_v47, %v4706_v46  ;;  %v4711_v59 = vor.u32 %v5605_v48, %v4708_v49 }
  0xe8   : > { %v1433_v6 = vadd.f32 %v1432_v1, %v1263_v0 }
  0xe9   : > { %v1768_v4 = vadd.f32 %v1767_v60, %v1599_v63  ;;  %1302 = vmatmul.bf16.gmra.mxu0 %v4667_v61 }
  0xea   : > { %1471 = vmatmul.bf16.gmra.mxu1 %v4671_v62 }
  0xeb   : > { %v1923_v5 = vpack.c.bf16 %v1768_v4, %v1768_v4  ;;  %1640 = vmatmul.bf16.gmra.mxu2 %v4675_v2 }
  0xec   : > { %1809 = vmatmul.bf16.gmra.mxu3 %v4679_v3 }
  0xed   : > { %1988 = vst.msk [vmem:[#allocation2 + $0xc] sm:$0xf] %vm1984_vm0, %v1923_v5  ;;  %2119 = vrot.lane.b32.xlu1 %v1923_v5, %s7731_s25  ;;  %v4714_v5 = vld [vmem:[%s7829_s28 + $0x1a0] sm:$0xf] }
  0xee   : > { %v1601_v7 = vpop.f32.mrf.mxu2  ;;  %v1265_v10 = vpop.f32.mrf.mxu0 }
  0xef   : > { %v1770_v8 = vpop.f32.mrf.mxu3  ;;  %v1602_v9 = vadd.f32 %v1601_v7, %v1433_v6  ;;  %v1434_v11 = vpop.f32.mrf.mxu1  ;;  %v5610_v6 = vld [vmem:[%s7829_s28 + $0x1ac] sm:$0xf0] }
  0xf0   : > { %v1435_v22 = vadd.f32 %v1434_v11, %v1265_v10  ;;  %v4722_v10 = vld [vmem:[%s7829_s28 + $0x1a8] sm:$0xf]  ;;  %v5611_v11 = vld [vmem:[%s7829_s28 + $0x1b4] sm:$0xf0]  ;;  %v4715_v17 = vor.u32 %v5610_v6, %v4714_v5  ;;  %v4756_v5 = vld [vmem:[%s7829_s28 + $0x1f8] sm:$0xf0] }
  0xf1   : > { %v1771_v12 = vadd.f32 %v1770_v8, %v1602_v9  ;;  %v5608_v8 = vld [vmem:[%s7829_s28 + $0x1a4] sm:$0xf]  ;;  %v4716_v9 = vld [vmem:[%s7829_s28 + $0x1b0] sm:$0xf0] }
  0xf2   : > { %v4719_v18 = vor.u32 %v5608_v8, %v4716_v9 }
  0xf3   : > { %v1924_v15 = vpack.c.bf16 %v1771_v12, %v1771_v12  ;;  %v5609_v12 = vld [vmem:[%s7829_s28 + $0x1ac] sm:$0xf] }
  0xf5   : > { %1989 = vst.msk [vmem:[#allocation2 + $0x10] sm:$0xf] %vm1984_vm0, %v1924_v15  ;;  %2121 = vrot.lane.b32.xlu2 %v1924_v15, %s7731_s25 }
  0xf6   : > { %v1603_v23 = vpop.f32.mrf.mxu2  ;;  %v1268_v28 = vpop.f32.mrf.mxu0 }
  0xf7   : > { %v1772_v24 = vpop.f32.mrf.mxu3  ;;  %v1604_v27 = vadd.f32 %v1603_v23, %v1435_v22  ;;  %v1437_v29 = vpop.f32.mrf.mxu1  ;;  %v4723_v22 = vor.u32 %v5611_v11, %v4722_v10  ;;  %v4727_v23 = vor.u32 %v5609_v12, %v4724_v13 }
  0xf8   : > { %v1438_v34 = vadd.f32 %v1437_v29, %v1268_v28 }
  0xf9   : > { %v1773_v32 = vadd.f32 %v1772_v24, %v1604_v27  ;;  %1307 = vmatmul.bf16.gmra.mxu0 %v4683_v25 }
  0xfa   : > { %1476 = vmatmul.bf16.gmra.mxu1 %v4687_v26 }
  0xfb   : > { %v1925_v33 = vpack.c.bf16 %v1773_v32, %v1773_v32  ;;  %1645 = vmatmul.bf16.gmra.mxu2 %v4691_v30 }
  0xfc   : > { %1814 = vmatmul.bf16.gmra.mxu3 %v4695_v31 }
  0xfd   : > { %1990 = vst.msk [vmem:[#allocation2 + $0x14] sm:$0xf] %vm1984_vm0, %v1925_v33  ;;  %2123 = vrot.lane.b32.xlu2 %v1925_v33, %s7731_s25  ;;  %v4730_v33 = vld [vmem:[%s7829_s28 + $0x1c0] sm:$0xf] }
  0xfe   : > { %v1606_v35 = vpop.f32.mrf.mxu2  ;;  %v1270_v38 = vpop.f32.mrf.mxu0 }
  0xff   : > { %v1775_v36 = vpop.f32.mrf.mxu3  ;;  %v1607_v37 = vadd.f32 %v1606_v35, %v1438_v34  ;;  %v1439_v39 = vpop.f32.mrf.mxu1  ;;  %v5614_v34 = vld [vmem:[%s7829_s28 + $0x1cc] sm:$0xf0] }
 0x100   : > { %v1440_v50 = vadd.f32 %v1439_v39, %v1270_v38  ;;  %v4738_v38 = vld [vmem:[%s7829_s28 + $0x1c8] sm:$0xf]  ;;  %v5615_v39 = vld [vmem:[%s7829_s28 + $0x1d4] sm:$0xf0]  ;;  %v4731_v45 = vor.u32 %v5614_v34, %v4730_v33  ;;  %v4772_v33 = vld [vmem:[%s7829_s28 + $0x218] sm:$0xf0] }
 0x101   : > { %v1776_v40 = vadd.f32 %v1775_v36, %v1607_v37  ;;  %v5612_v36 = vld [vmem:[%s7829_s28 + $0x1c4] sm:$0xf]  ;;  %v4732_v37 = vld [vmem:[%s7829_s28 + $0x1d0] sm:$0xf0] }
 0x102   : > { %v4735_v46 = vor.u32 %v5612_v36, %v4732_v37 }
 0x103   : > { %v1926_v43 = vpack.c.bf16 %v1776_v40, %v1776_v40  ;;  %v5613_v40 = vld [vmem:[%s7829_s28 + $0x1cc] sm:$0xf] }
 0x105   : > { %1991 = vst.msk [vmem:[#allocation2 + $0x18] sm:$0xf] %vm1984_vm0, %v1926_v43  ;;  %2125 = vrot.lane.b32.xlu0 %v1926_v43, %s7731_s25 }
 0x106   : > { %v1608_v51 = vpop.f32.mrf.mxu2  ;;  %v1273_v56 = vpop.f32.mrf.mxu0 }
 0x107   : > { %v1777_v52 = vpop.f32.mrf.mxu3  ;;  %v1609_v55 = vadd.f32 %v1608_v51, %v1440_v50  ;;  %v1442_v57 = vpop.f32.mrf.mxu1  ;;  %v4739_v50 = vor.u32 %v5615_v39, %v4738_v38  ;;  %v4743_v51 = vor.u32 %v5613_v40, %v4740_v41 }
 0x108   : > { %v1443_v62 = vadd.f32 %v1442_v57, %v1273_v56 }
 0x109   : > { %v1778_v60 = vadd.f32 %v1777_v52, %v1609_v55  ;;  %1312 = vmatmul.bf16.gmra.mxu0 %v4699_v53 }
 0x10a   : > { %1481 = vmatmul.bf16.gmra.mxu1 %v4703_v54 }
 0x10b   : > { %v1927_v61 = vpack.c.bf16 %v1778_v60, %v1778_v60  ;;  %1650 = vmatmul.bf16.gmra.mxu2 %v4707_v58 }
 0x10c   : > { %1819 = vmatmul.bf16.gmra.mxu3 %v4711_v59 }
 0x10d   : > { %1992 = vst.msk [vmem:[#allocation2 + $0x1c] sm:$0xf] %vm1984_vm0, %v1927_v61  ;;  %2127 = vrot.lane.b32.xlu1 %v1927_v61, %s7731_s25  ;;  %v4746_v61 = vld [vmem:[%s7829_s28 + $0x1e0] sm:$0xf] }
 0x10e   : > { %v1611_v63 = vpop.f32.mrf.mxu2  ;;  %v1275_v2 = vpop.f32.mrf.mxu0 }
 0x10f   : > { %v1780_v0 = vpop.f32.mrf.mxu3  ;;  %v1612_v1 = vadd.f32 %v1611_v63, %v1443_v62  ;;  %v1444_v3 = vpop.f32.mrf.mxu1  ;;  %v5618_v62 = vld [vmem:[%s7829_s28 + $0x1ec] sm:$0xf0] }
 0x110   : > { %v1445_v14 = vadd.f32 %v1444_v3, %v1275_v2  ;;  %v4754_v2 = vld [vmem:[%s7829_s28 + $0x1e8] sm:$0xf]  ;;  %v5619_v3 = vld [vmem:[%s7829_s28 + $0x1f4] sm:$0xf0]  ;;  %v4747_v9 = vor.u32 %v5618_v62, %v4746_v61 }
 0x111   : > { %v1781_v4 = vadd.f32 %v1780_v0, %v1612_v1  ;;  %v5616_v0 = vld [vmem:[%s7829_s28 + $0x1e4] sm:$0xf]  ;;  %v4748_v1 = vld [vmem:[%s7829_s28 + $0x1f0] sm:$0xf0]  ;;  %v4786_v61 = vld [vmem:[%s7829_s28 + $0x228] sm:$0xf] }
 0x112   : > { %v4751_v10 = vor.u32 %v5616_v0, %v4748_v1  ;;  %v5627_v62 = vld [vmem:[%s7829_s28 + $0x234] sm:$0xf0]  ;;  %v4788_v0 = vld [vmem:[%s7829_s28 + $0x238] sm:$0xf0] }
 0x113   : > { %v1928_v7 = vpack.c.bf16 %v1781_v4, %v1781_v4  ;;  %v5617_v4 = vld [vmem:[%s7829_s28 + $0x1ec] sm:$0xf] }
 0x115   : > { %1993 = vst.msk [vmem:[#allocation2 + $0x20] sm:$0xf] %vm1984_vm0, %v1928_v7  ;;  %2129 = vrot.lane.b32.xlu2 %v1928_v7, %s7731_s25 }
 0x116   : > { %v1613_v15 = vpop.f32.mrf.mxu2  ;;  %v1278_v20 = vpop.f32.mrf.mxu0 }
 0x117   : > { %v1782_v16 = vpop.f32.mrf.mxu3  ;;  %v1614_v19 = vadd.f32 %v1613_v15, %v1445_v14  ;;  %v1447_v21 = vpop.f32.mrf.mxu1  ;;  %v4755_v14 = vor.u32 %v5619_v3, %v4754_v2  ;;  %v4759_v15 = vor.u32 %v5617_v4, %v4756_v5 }
 0x118   : > { %v1448_v26 = vadd.f32 %v1447_v21, %v1278_v20 }
 0x119   : > { %v1783_v24 = vadd.f32 %v1782_v16, %v1614_v19  ;;  %1317 = vmatmul.bf16.gmra.mxu0 %v4715_v17 }
 0x11a   : > { %1486 = vmatmul.bf16.gmra.mxu1 %v4719_v18 }
 0x11b   : > { %v1929_v25 = vpack.c.bf16 %v1783_v24, %v1783_v24  ;;  %1655 = vmatmul.bf16.gmra.mxu2 %v4723_v22 }
 0x11c   : > { %1824 = vmatmul.bf16.gmra.mxu3 %v4727_v23 }
 0x11d   : > { %1994 = vst.msk [vmem:[#allocation2 + $0x24] sm:$0xf] %vm1984_vm0, %v1929_v25  ;;  %2131 = vrot.lane.b32.xlu0 %v1929_v25, %s7731_s25  ;;  %v4762_v25 = vld [vmem:[%s7829_s28 + $0x200] sm:$0xf] }
 0x11e   : > { %v1616_v27 = vpop.f32.mrf.mxu2  ;;  %v1280_v30 = vpop.f32.mrf.mxu0 }
 0x11f   : > { %v1785_v28 = vpop.f32.mrf.mxu3  ;;  %v1617_v29 = vadd.f32 %v1616_v27, %v1448_v26  ;;  %v1449_v31 = vpop.f32.mrf.mxu1  ;;  %v5622_v26 = vld [vmem:[%s7829_s28 + $0x20c] sm:$0xf0] }
 0x120   : > { %v1450_v42 = vadd.f32 %v1449_v31, %v1280_v30  ;;  %v4770_v30 = vld [vmem:[%s7829_s28 + $0x208] sm:$0xf]  ;;  %v5623_v31 = vld [vmem:[%s7829_s28 + $0x214] sm:$0xf0]  ;;  %v4763_v37 = vor.u32 %v5622_v26, %v4762_v25  ;;  %v5628_v26 = vld [vmem:[%s7829_s28 + $0x244] sm:$0xf] }
 0x121   : > { %v1786_v32 = vadd.f32 %v1785_v28, %v1617_v29  ;;  %v5620_v28 = vld [vmem:[%s7829_s28 + $0x204] sm:$0xf]  ;;  %v4764_v29 = vld [vmem:[%s7829_s28 + $0x210] sm:$0xf0] }
 0x122   : > { %v4767_v38 = vor.u32 %v5620_v28, %v4764_v29  ;;  %v4802_v28 = vld [vmem:[%s7829_s28 + $0x248] sm:$0xf]  ;;  %v5631_v29 = vld [vmem:[%s7829_s28 + $0x254] sm:$0xf0] }
 0x123   : > { %v1930_v35 = vpack.c.bf16 %v1786_v32, %v1786_v32  ;;  %v5621_v32 = vld [vmem:[%s7829_s28 + $0x20c] sm:$0xf] }
 0x125   : > { %1995 = vst.msk [vmem:[#allocation2 + $0x28] sm:$0xf] %vm1984_vm0, %v1930_v35  ;;  %2133 = vrot.lane.b32.xlu1 %v1930_v35, %s7731_s25 }
 0x126   : > { %v1618_v43 = vpop.f32.mrf.mxu2  ;;  %v1283_v48 = vpop.f32.mrf.mxu0 }
 0x127   : > { %v1787_v44 = vpop.f32.mrf.mxu3  ;;  %v1619_v47 = vadd.f32 %v1618_v43, %v1450_v42  ;;  %v1452_v49 = vpop.f32.mrf.mxu1  ;;  %v4771_v42 = vor.u32 %v5623_v31, %v4770_v30  ;;  %v4775_v43 = vor.u32 %v5621_v32, %v4772_v33  ;;  %v5629_v30 = vld [vmem:[%s7829_s28 + $0x24c] sm:$0xf]  ;;  %v4804_v31 = vld [vmem:[%s7829_s28 + $0x258] sm:$0xf0] }
 0x128   : > { %v1453_v54 = vadd.f32 %v1452_v49, %v1283_v48 }
 0x129   : > { %v1788_v52 = vadd.f32 %v1787_v44, %v1619_v47  ;;  %1322 = vmatmul.bf16.gmra.mxu0 %v4731_v45 }
 0x12a   : > { %1491 = vmatmul.bf16.gmra.mxu1 %v4735_v46 }
 0x12b   : > { %v1931_v53 = vpack.c.bf16 %v1788_v52, %v1788_v52  ;;  %1660 = vmatmul.bf16.gmra.mxu2 %v4739_v50 }
 0x12c   : > { %1829 = vmatmul.bf16.gmra.mxu3 %v4743_v51 }
 0x12d   : > { %1996 = vst.msk [vmem:[#allocation2 + $0x2c] sm:$0xf] %vm1984_vm0, %v1931_v53  ;;  %2135 = vrot.lane.b32.xlu2 %v1931_v53, %s7731_s25 }
 0x12e   : > { %v1621_v55 = vpop.f32.mrf.mxu2  ;;  %v1285_v58 = vpop.f32.mrf.mxu0 }
 0x12f   : > { %v1790_v56 = vpop.f32.mrf.mxu3  ;;  %v1622_v57 = vadd.f32 %v1621_v55, %v1453_v54  ;;  %v1454_v59 = vpop.f32.mrf.mxu1 }
 0x130   : > { %v1455_v6 = vadd.f32 %v1454_v59, %v1285_v58  ;;  %v5624_v59 = vld [vmem:[%s7829_s28 + $0x224] sm:$0xf] }
 0x131   : > { %v1791_v60 = vadd.f32 %v1790_v56, %v1622_v57  ;;  %v4778_v56 = vld [vmem:[%s7829_s28 + $0x220] sm:$0xf]  ;;  %v5626_v57 = vld [vmem:[%s7829_s28 + $0x22c] sm:$0xf0] }
 0x132   : > { %v4779_v4 = vor.u32 %v5626_v57, %v4778_v56  ;;  %v4812_v56 = vld [vmem:[%s7829_s28 + $0x270] sm:$0xf0]  ;;  %v4818_v57 = vld [vmem:[%s7829_s28 + $0x268] sm:$0xf] }
 0x133   : > { %v1932_v63 = vpack.c.bf16 %v1791_v60, %v1791_v60  ;;  %v4780_v60 = vld [vmem:[%s7829_s28 + $0x230] sm:$0xf0] }
 0x134   : > { %v4783_v5 = vor.u32 %v5624_v59, %v4780_v60  ;;  %v5633_v59 = vld [vmem:[%s7829_s28 + $0x26c] sm:$0xf]  ;;  %v4820_v60 = vld [vmem:[%s7829_s28 + $0x278] sm:$0xf0] }
 0x135   : > { %1997 = vst.msk [vmem:[#allocation2 + $0x30] sm:$0xf] %vm1984_vm0, %v1932_v63  ;;  %2137 = vrot.lane.b32.xlu0 %v1932_v63, %s7731_s25  ;;  %v5625_v63 = vld [vmem:[%s7829_s28 + $0x22c] sm:$0xf] }
 0x136   : > { %v1623_v7 = vpop.f32.mrf.mxu2  ;;  %v1288_v12 = vpop.f32.mrf.mxu0 }
 0x137   : > { %v1792_v8 = vpop.f32.mrf.mxu3  ;;  %v1624_v11 = vadd.f32 %v1623_v7, %v1455_v6  ;;  %v1457_v13 = vpop.f32.mrf.mxu1 }
 0x138   : > { %v1458_v18 = vadd.f32 %v1457_v13, %v1288_v12 }
 0x139   : > { %v1793_v16 = vadd.f32 %v1792_v8, %v1624_v11  ;;  %1327 = vmatmul.bf16.gmra.mxu0 %v4747_v9  ;;  %v4787_v9 = vor.u32 %v5627_v62, %v4786_v61 }
 0x13a   : > { %1496 = vmatmul.bf16.gmra.mxu1 %v4751_v10  ;;  %v4791_v10 = vor.u32 %v5625_v63, %v4788_v0 }
 0x13b   : > { %v1933_v17 = vpack.c.bf16 %v1793_v16, %v1793_v16  ;;  %1665 = vmatmul.bf16.gmra.mxu2 %v4755_v14 }
 0x13c   : > { %1834 = vmatmul.bf16.gmra.mxu3 %v4759_v15 }
 0x13d   : > { %1998 = vst.msk [vmem:[#allocation2 + $0x34] sm:$0xf] %vm1984_vm0, %v1933_v17  ;;  %2139 = vrot.lane.b32.xlu1 %v1933_v17, %s7731_s25 }
 0x13e   : > { %v1626_v19 = vpop.f32.mrf.mxu2  ;;  %v1290_v22 = vpop.f32.mrf.mxu0 }
 0x13f   : > { %v1795_v20 = vpop.f32.mrf.mxu3  ;;  %v1627_v21 = vadd.f32 %v1626_v19, %v1458_v18  ;;  %v1459_v23 = vpop.f32.mrf.mxu1 }
 0x140   : > { %v1460_v34 = vadd.f32 %v1459_v23, %v1290_v22  ;;  %v4794_v23 = vld [vmem:[%s7829_s28 + $0x240] sm:$0xf] }
 0x141   : > { %v1796_v24 = vadd.f32 %v1795_v20, %v1627_v21 }
 0x143   : > { %v1934_v27 = vpack.c.bf16 %v1796_v24, %v1796_v24  ;;  %v5630_v24 = vld [vmem:[%s7829_s28 + $0x24c] sm:$0xf0] }
 0x145   : > { %1999 = vst.msk [vmem:[#allocation2 + $0x38] sm:$0xf] %vm1984_vm0, %v1934_v27  ;;  %2141 = vrot.lane.b32.xlu2 %v1934_v27, %s7731_s25  ;;  %v4796_v27 = vld [vmem:[%s7829_s28 + $0x250] sm:$0xf0] }
 0x146   : > { %v1628_v35 = vpop.f32.mrf.mxu2  ;;  %v1293_v41 = vpop.f32.mrf.mxu0 }
 0x147   : > { %v1797_v36 = vpop.f32.mrf.mxu3  ;;  %v1629_v39 = vadd.f32 %v1628_v35, %v1460_v34  ;;  %v2114_v40 = vpop.permute.xlu0 %2113  ;;  %v4795_v35 = vor.u32 %v5630_v24, %v4794_v23  ;;  %v4834_v23 = vld [vmem:[%s7829_s28 + $0x288] sm:$0xf]  ;;  %v5639_v24 = vld [vmem:[%s7829_s28 + $0x294] sm:$0xf0] }
 0x148   : > { %2305 = vst.msk [vmem:[#allocation3] sm:$0xf] %vm1984_vm0, %v2114_v40  ;;  %v1462_v44 = vpop.f32.mrf.mxu1 }
 0x149   : > { %v1798_v45 = vadd.f32 %v1797_v36, %v1629_v39  ;;  %1332 = vmatmul.bf16.gmra.mxu0 %v4763_v37  ;;  %v1463_v47 = vadd.f32 %v1462_v44, %v1293_v41  ;;  %v4799_v36 = vor.u32 %v5628_v26, %v4796_v27  ;;  %v4807_v39 = vor.u32 %v5629_v30, %v4804_v31  ;;  %v4836_v26 = vld [vmem:[%s7829_s28 + $0x298] sm:$0xf0] }
 0x14a   : > { %1501 = vmatmul.bf16.gmra.mxu1 %v4767_v38  ;;  %v4803_v38 = vor.u32 %v5631_v29, %v4802_v28 }
 0x14b   : > { %v1935_v46 = vpack.c.bf16 %v1798_v45, %v1798_v45  ;;  %1670 = vmatmul.bf16.gmra.mxu2 %v4771_v42 }
 0x14c   : > { %1839 = vmatmul.bf16.gmra.mxu3 %v4775_v43 }
 0x14d   : > { %2000 = vst.msk [vmem:[#allocation2 + $0x3c] sm:$0xf] %vm1984_vm0, %v1935_v46  ;;  %2143 = vrot.lane.b32.xlu0 %v1935_v46, %s7731_s25 }
 0x14e   : > { %v1631_v48 = vpop.f32.mrf.mxu2  ;;  %v1295_v53 = vpop.f32.mrf.mxu0 }
 0x14f   : > { %v1800_v49 = vpop.f32.mrf.mxu3  ;;  %v1632_v50 = vadd.f32 %v1631_v48, %v1463_v47  ;;  %v2122_v51 = vpop.permute.xlu2 %2121 }
 0x150   : > { %v2116_v52 = vpop.permute.xlu0 %2115  ;;  %2309 = vst.msk [vmem:[#allocation3 + $0x10] sm:$0xf] %vm1984_vm0, %v2122_v51  ;;  %v1464_v54 = vpop.f32.mrf.mxu1 }
 0x151   : > { %v1801_v55 = vadd.f32 %v1800_v49, %v1632_v50  ;;  %2306 = vst.msk [vmem:[#allocation3 + $0x4] sm:$0xf] %vm1984_vm0, %v2116_v52  ;;  %v1465_v1 = vadd.f32 %v1464_v54, %v1295_v53  ;;  %v4810_v52 = vld [vmem:[%s7829_s28 + $0x260] sm:$0xf]  ;;  %v5634_v53 = vld [vmem:[%s7829_s28 + $0x26c] sm:$0xf0] }
 0x152   : > { %v4811_v0 = vor.u32 %v5634_v53, %v4810_v52  ;;  %v4844_v52 = vld [vmem:[%s7829_s28 + $0x2b0] sm:$0xf0]  ;;  %v4850_v53 = vld [vmem:[%s7829_s28 + $0x2a8] sm:$0xf] }
 0x153   : > { %v1936_v58 = vpack.c.bf16 %v1801_v55, %v1801_v55  ;;  %v5632_v55 = vld [vmem:[%s7829_s28 + $0x264] sm:$0xf] }
 0x155   : > { %2001 = vst.msk [vmem:[#allocation2 + $0x40] sm:$0xf] %vm1984_vm0, %v1936_v58  ;;  %2145 = vrot.lane.b32.xlu1 %v1936_v58, %s7731_s25  ;;  %v5635_v58 = vld [vmem:[%s7829_s28 + $0x274] sm:$0xf0] }
 0x156   : > { %v1633_v2 = vpop.f32.mrf.mxu2  ;;  %v1298_v11 = vpop.f32.mrf.mxu0 }
 0x157   : > { %v1802_v3 = vpop.f32.mrf.mxu3  ;;  %v1634_v6 = vadd.f32 %v1633_v2, %v1465_v1  ;;  %v2124_v7 = vpop.permute.xlu2 %2123  ;;  %v4815_v1 = vor.u32 %v5632_v55, %v4812_v56  ;;  %v5641_v55 = vld [vmem:[%s7829_s28 + $0x2ac] sm:$0xf]  ;;  %v4852_v56 = vld [vmem:[%s7829_s28 + $0x2b8] sm:$0xf0] }
 0x158   : > { %v2118_v8 = vpop.permute.xlu1 %2117  ;;  %2310 = vst.msk [vmem:[#allocation3 + $0x14] sm:$0xf] %vm1984_vm0, %v2124_v7  ;;  %v1467_v12 = vpop.f32.mrf.mxu1 }
 0x159   : > { %v1803_v13 = vadd.f32 %v1802_v3, %v1634_v6  ;;  %2307 = vst.msk [vmem:[#allocation3 + $0x8] sm:$0xf] %vm1984_vm0, %v2118_v8  ;;  %1337 = vmatmul.bf16.gmra.mxu0 %v4779_v4  ;;  %v1468_v15 = vadd.f32 %v1467_v12, %v1298_v11  ;;  %v4819_v4 = vor.u32 %v5635_v58, %v4818_v57 }
 0x15a   : > { %1506 = vmatmul.bf16.gmra.mxu1 %v4783_v5  ;;  %v4823_v5 = vor.u32 %v5633_v59, %v4820_v60 }
 0x15b   : > { %v1937_v14 = vpack.c.bf16 %v1803_v13, %v1803_v13  ;;  %1675 = vmatmul.bf16.gmra.mxu2 %v4787_v9 }
 0x15c   : > { %1844 = vmatmul.bf16.gmra.mxu3 %v4791_v10 }
 0x15d   : > { %2002 = vst.msk [vmem:[#allocation2 + $0x44] sm:$0xf] %vm1984_vm0, %v1937_v14  ;;  %2147 = vrot.lane.b32.xlu2 %v1937_v14, %s7731_s25 }
 0x15e   : > { %v1636_v16 = vpop.f32.mrf.mxu2  ;;  %v1300_v20 = vpop.f32.mrf.mxu0 }
 0x15f   : > { %v1805_v17 = vpop.f32.mrf.mxu3  ;;  %v1637_v18 = vadd.f32 %v1636_v16, %v1468_v15 }
 0x160   : > { %v2120_v19 = vpop.permute.xlu1 %2119  ;;  %v1469_v21 = vpop.f32.mrf.mxu1 }
 0x161   : > { %2308 = vst.msk [vmem:[#allocation3 + $0xc] sm:$0xf] %vm1984_vm0, %v2120_v19  ;;  %v1806_v22 = vadd.f32 %v1805_v17, %v1637_v18  ;;  %v1470_v32 = vadd.f32 %v1469_v21, %v1300_v20  ;;  %v4826_v18 = vld [vmem:[%s7829_s28 + $0x280] sm:$0xf]  ;;  %v5638_v19 = vld [vmem:[%s7829_s28 + $0x28c] sm:$0xf0] }
 0x162   : > { %v5636_v21 = vld [vmem:[%s7829_s28 + $0x284] sm:$0xf]  ;;  %v4827_v30 = vor.u32 %v5638_v19, %v4826_v18  ;;  %v4860_v18 = vld [vmem:[%s7829_s28 + $0x2d0] sm:$0xf0]  ;;  %v4866_v19 = vld [vmem:[%s7829_s28 + $0x2c8] sm:$0xf] }
 0x163   : > { %v1938_v25 = vpack.c.bf16 %v1806_v22, %v1806_v22  ;;  %v4828_v22 = vld [vmem:[%s7829_s28 + $0x290] sm:$0xf0] }
 0x164   : > { %v4831_v31 = vor.u32 %v5636_v21, %v4828_v22  ;;  %v5645_v21 = vld [vmem:[%s7829_s28 + $0x2cc] sm:$0xf]  ;;  %v4868_v22 = vld [vmem:[%s7829_s28 + $0x2d8] sm:$0xf0] }
 0x165   : > { %2003 = vst.msk [vmem:[#allocation2 + $0x48] sm:$0xf] %vm1984_vm0, %v1938_v25  ;;  %2149 = vrot.lane.b32.xlu0 %v1938_v25, %s7731_s25  ;;  %v5637_v25 = vld [vmem:[%s7829_s28 + $0x28c] sm:$0xf] }
 0x166   : > { %v1638_v33 = vpop.f32.mrf.mxu2  ;;  %v1303_v40 = vpop.f32.mrf.mxu0 }
 0x167   : > { %v1807_v34 = vpop.f32.mrf.mxu3  ;;  %v1639_v37 = vadd.f32 %v1638_v33, %v1470_v32 }
 0x168   : > { %v1472_v41 = vpop.f32.mrf.mxu1 }
 0x169   : > { %v1808_v42 = vadd.f32 %v1807_v34, %v1639_v37  ;;  %1342 = vmatmul.bf16.gmra.mxu0 %v4795_v35  ;;  %v1473_v44 = vadd.f32 %v1472_v41, %v1303_v40  ;;  %v4835_v34 = vor.u32 %v5639_v24, %v4834_v23  ;;  %v4839_v35 = vor.u32 %v5637_v25, %v4836_v26 }
 0x16a   : > { %1511 = vmatmul.bf16.gmra.mxu1 %v4799_v36 }
 0x16b   : > { %v1939_v43 = vpack.c.bf16 %v1808_v42, %v1808_v42  ;;  %1680 = vmatmul.bf16.gmra.mxu2 %v4803_v38 }
 0x16c   : > { %1849 = vmatmul.bf16.gmra.mxu3 %v4807_v39 }
 0x16d   : > { %2004 = vst.msk [vmem:[#allocation2 + $0x4c] sm:$0xf] %vm1984_vm0, %v1939_v43  ;;  %2151 = vrot.lane.b32.xlu1 %v1939_v43, %s7731_s25 }
 0x16e   : > { %v1641_v45 = vpop.f32.mrf.mxu2  ;;  %v1305_v49 = vpop.f32.mrf.mxu0 }
 0x16f   : > { %v1810_v46 = vpop.f32.mrf.mxu3  ;;  %v1642_v47 = vadd.f32 %v1641_v45, %v1473_v44  ;;  %v2130_v48 = vpop.permute.xlu2 %2129 }
 0x170   : > { %2313 = vst.msk [vmem:[#allocation3 + $0x20] sm:$0xf] %vm1984_vm0, %v2130_v48  ;;  %v1474_v50 = vpop.f32.mrf.mxu1  ;;  %v4842_v48 = vld [vmem:[%s7829_s28 + $0x2a0] sm:$0xf] }
 0x171   : > { %v1811_v51 = vadd.f32 %v1810_v46, %v1642_v47  ;;  %v1475_v61 = vadd.f32 %v1474_v50, %v1305_v49  ;;  %v5642_v49 = vld [vmem:[%s7829_s28 + $0x2ac] sm:$0xf0] }
 0x172   : > { %v4843_v60 = vor.u32 %v5642_v49, %v4842_v48  ;;  %v4876_v48 = vld [vmem:[%s7829_s28 + $0x2f0] sm:$0xf0]  ;;  %v4882_v49 = vld [vmem:[%s7829_s28 + $0x2e8] sm:$0xf] }
 0x173   : > { %v1940_v54 = vpack.c.bf16 %v1811_v51, %v1811_v51  ;;  %v5640_v51 = vld [vmem:[%s7829_s28 + $0x2a4] sm:$0xf] }
 0x175   : > { %2005 = vst.msk [vmem:[#allocation2 + $0x50] sm:$0xf] %vm1984_vm0, %v1940_v54  ;;  %2153 = vrot.lane.b32.xlu2 %v1940_v54, %s7731_s25  ;;  %v5643_v54 = vld [vmem:[%s7829_s28 + $0x2b4] sm:$0xf0] }
 0x176   : > { %v1643_v62 = vpop.f32.mrf.mxu2  ;;  %v1308_v6 = vpop.f32.mrf.mxu0 }
 0x177   : > { %v1812_v63 = vpop.f32.mrf.mxu3  ;;  %v1644_v2 = vadd.f32 %v1643_v62, %v1475_v61  ;;  %v2126_v3 = vpop.permute.xlu0 %2125  ;;  %v4847_v61 = vor.u32 %v5640_v51, %v4844_v52  ;;  %v5649_v51 = vld [vmem:[%s7829_s28 + $0x2ec] sm:$0xf]  ;;  %v4884_v52 = vld [vmem:[%s7829_s28 + $0x2f8] sm:$0xf0] }
 0x178   : > { %2311 = vst.msk [vmem:[#allocation3 + $0x18] sm:$0xf] %vm1984_vm0, %v2126_v3  ;;  %v1477_v7 = vpop.f32.mrf.mxu1 }
 0x179   : > { %v1813_v8 = vadd.f32 %v1812_v63, %v1644_v2  ;;  %1347 = vmatmul.bf16.gmra.mxu0 %v4811_v0  ;;  %v1478_v10 = vadd.f32 %v1477_v7, %v1308_v6  ;;  %v4851_v0 = vor.u32 %v5643_v54, %v4850_v53 }
 0x17a   : > { %1516 = vmatmul.bf16.gmra.mxu1 %v4815_v1  ;;  %v4855_v1 = vor.u32 %v5641_v55, %v4852_v56 }
 0x17b   : > { %v1941_v9 = vpack.c.bf16 %v1813_v8, %v1813_v8  ;;  %1685 = vmatmul.bf16.gmra.mxu2 %v4819_v4 }
 0x17c   : > { %1854 = vmatmul.bf16.gmra.mxu3 %v4823_v5 }
 0x17d   : > { %2006 = vst.msk [vmem:[#allocation2 + $0x54] sm:$0xf] %vm1984_vm0, %v1941_v9  ;;  %2155 = vrot.lane.b32.xlu0 %v1941_v9, %s7731_s25 }
 0x17e   : > { %v1646_v11 = vpop.f32.mrf.mxu2  ;;  %v1310_v15 = vpop.f32.mrf.mxu0 }
 0x17f   : > { %v1815_v12 = vpop.f32.mrf.mxu3  ;;  %v1647_v13 = vadd.f32 %v1646_v11, %v1478_v10  ;;  %v2128_v14 = vpop.permute.xlu1 %2127 }
 0x180   : > { %2312 = vst.msk [vmem:[#allocation3 + $0x1c] sm:$0xf] %vm1984_vm0, %v2128_v14  ;;  %v1479_v16 = vpop.f32.mrf.mxu1  ;;  %v4858_v14 = vld [vmem:[%s7829_s28 + $0x2c0] sm:$0xf] }
 0x181   : > { %v1816_v17 = vadd.f32 %v1815_v12, %v1647_v13  ;;  %v1480_v27 = vadd.f32 %v1479_v16, %v1310_v15  ;;  %v5646_v15 = vld [vmem:[%s7829_s28 + $0x2cc] sm:$0xf0] }
 0x182   : > { %v4859_v26 = vor.u32 %v5646_v15, %v4858_v14  ;;  %v4892_v14 = vld [vmem:[%s7829_s28 + $0x310] sm:$0xf0]  ;;  %v4898_v15 = vld [vmem:[%s7829_s28 + $0x308] sm:$0xf] }
 0x183   : > { %v1942_v20 = vpack.c.bf16 %v1816_v17, %v1816_v17  ;;  %v5644_v17 = vld [vmem:[%s7829_s28 + $0x2c4] sm:$0xf] }
 0x185   : > { %2007 = vst.msk [vmem:[#allocation2 + $0x58] sm:$0xf] %vm1984_vm0, %v1942_v20  ;;  %2157 = vrot.lane.b32.xlu1 %v1942_v20, %s7731_s25  ;;  %v5647_v20 = vld [vmem:[%s7829_s28 + $0x2d4] sm:$0xf0] }
 0x186   : > { %v1648_v28 = vpop.f32.mrf.mxu2  ;;  %v1313_v36 = vpop.f32.mrf.mxu0 }
 0x187   : > { %v1817_v29 = vpop.f32.mrf.mxu3  ;;  %v1649_v32 = vadd.f32 %v1648_v28, %v1480_v27  ;;  %v2136_v33 = vpop.permute.xlu2 %2135  ;;  %v4863_v27 = vor.u32 %v5644_v17, %v4860_v18  ;;  %v5653_v17 = vld [vmem:[%s7829_s28 + $0x30c] sm:$0xf]  ;;  %v4900_v18 = vld [vmem:[%s7829_s28 + $0x318] sm:$0xf0] }
 0x188   : > { %2316 = vst.msk [vmem:[#allocation3 + $0x2c] sm:$0xf] %vm1984_vm0, %v2136_v33  ;;  %v1482_v37 = vpop.f32.mrf.mxu1 }
 0x189   : > { %v1818_v38 = vadd.f32 %v1817_v29, %v1649_v32  ;;  %1352 = vmatmul.bf16.gmra.mxu0 %v4827_v30  ;;  %v1483_v40 = vadd.f32 %v1482_v37, %v1313_v36  ;;  %v4867_v30 = vor.u32 %v5647_v20, %v4866_v19 }
 0x18a   : > { %1521 = vmatmul.bf16.gmra.mxu1 %v4831_v31  ;;  %v4871_v31 = vor.u32 %v5645_v21, %v4868_v22 }
 0x18b   : > { %v1943_v39 = vpack.c.bf16 %v1818_v38, %v1818_v38  ;;  %1690 = vmatmul.bf16.gmra.mxu2 %v4835_v34 }
 0x18c   : > { %1859 = vmatmul.bf16.gmra.mxu3 %v4839_v35 }
 0x18d   : > { %2008 = vst.msk [vmem:[#allocation2 + $0x5c] sm:$0xf] %vm1984_vm0, %v1943_v39  ;;  %2159 = vrot.lane.b32.xlu2 %v1943_v39, %s7731_s25 }
 0x18e   : > { %v1651_v41 = vpop.f32.mrf.mxu2  ;;  %v1315_v45 = vpop.f32.mrf.mxu0 }
 0x18f   : > { %v1820_v42 = vpop.f32.mrf.mxu3  ;;  %v1652_v43 = vadd.f32 %v1651_v41, %v1483_v40  ;;  %v2132_v44 = vpop.permute.xlu0 %2131 }
 0x190   : > { %2314 = vst.msk [vmem:[#allocation3 + $0x24] sm:$0xf] %vm1984_vm0, %v2132_v44  ;;  %v1484_v46 = vpop.f32.mrf.mxu1  ;;  %v4874_v44 = vld [vmem:[%s7829_s28 + $0x2e0] sm:$0xf] }
 0x191   : > { %v1821_v47 = vadd.f32 %v1820_v42, %v1652_v43  ;;  %v1485_v57 = vadd.f32 %v1484_v46, %v1315_v45  ;;  %v5650_v45 = vld [vmem:[%s7829_s28 + $0x2ec] sm:$0xf0] }
 0x192   : > { %v4875_v56 = vor.u32 %v5650_v45, %v4874_v44  ;;  %v4908_v44 = vld [vmem:[%s7829_s28 + $0x330] sm:$0xf0]  ;;  %v4914_v45 = vld [vmem:[%s7829_s28 + $0x328] sm:$0xf] }
 0x193   : > { %v1944_v50 = vpack.c.bf16 %v1821_v47, %v1821_v47  ;;  %v5648_v47 = vld [vmem:[%s7829_s28 + $0x2e4] sm:$0xf] }
 0x195   : > { %2009 = vst.msk [vmem:[#allocation2 + $0x60] sm:$0xf] %vm1984_vm0, %v1944_v50  ;;  %2161 = vrot.lane.b32.xlu0 %v1944_v50, %s7731_s25  ;;  %v5651_v50 = vld [vmem:[%s7829_s28 + $0x2f4] sm:$0xf0] }
 0x196   : > { %v1653_v58 = vpop.f32.mrf.mxu2  ;;  %v1318_v2 = vpop.f32.mrf.mxu0 }
 0x197   : > { %v1822_v59 = vpop.f32.mrf.mxu3  ;;  %v1654_v62 = vadd.f32 %v1653_v58, %v1485_v57  ;;  %v2134_v63 = vpop.permute.xlu1 %2133  ;;  %v4879_v57 = vor.u32 %v5648_v47, %v4876_v48  ;;  %v5657_v47 = vld [vmem:[%s7829_s28 + $0x32c] sm:$0xf]  ;;  %v4916_v48 = vld [vmem:[%s7829_s28 + $0x338] sm:$0xf0] }
 0x198   : > { %2315 = vst.msk [vmem:[#allocation3 + $0x28] sm:$0xf] %vm1984_vm0, %v2134_v63  ;;  %v1487_v3 = vpop.f32.mrf.mxu1 }
 0x199   : > { %v1823_v4 = vadd.f32 %v1822_v59, %v1654_v62  ;;  %1357 = vmatmul.bf16.gmra.mxu0 %v4843_v60  ;;  %v1488_v6 = vadd.f32 %v1487_v3, %v1318_v2  ;;  %v4883_v60 = vor.u32 %v5651_v50, %v4882_v49 }
 0x19a   : > { %1526 = vmatmul.bf16.gmra.mxu1 %v4847_v61  ;;  %v4887_v61 = vor.u32 %v5649_v51, %v4884_v52 }
 0x19b   : > { %v1945_v5 = vpack.c.bf16 %v1823_v4, %v1823_v4  ;;  %1695 = vmatmul.bf16.gmra.mxu2 %v4851_v0 }
 0x19c   : > { %1864 = vmatmul.bf16.gmra.mxu3 %v4855_v1 }
 0x19d   : > { %2010 = vst.msk [vmem:[#allocation2 + $0x64] sm:$0xf] %vm1984_vm0, %v1945_v5  ;;  %2163 = vrot.lane.b32.xlu1 %v1945_v5, %s7731_s25 }
 0x19e   : > { %v1656_v7 = vpop.f32.mrf.mxu2  ;;  %v1320_v11 = vpop.f32.mrf.mxu0 }
 0x19f   : > { %v1825_v8 = vpop.f32.mrf.mxu3  ;;  %v1657_v9 = vadd.f32 %v1656_v7, %v1488_v6  ;;  %v2142_v10 = vpop.permute.xlu2 %2141 }
 0x1a0   : > { %2319 = vst.msk [vmem:[#allocation3 + $0x38] sm:$0xf] %vm1984_vm0, %v2142_v10  ;;  %v1489_v12 = vpop.f32.mrf.mxu1  ;;  %v4890_v10 = vld [vmem:[%s7829_s28 + $0x300] sm:$0xf] }
 0x1a1   : > { %v1826_v13 = vadd.f32 %v1825_v8, %v1657_v9  ;;  %v1490_v23 = vadd.f32 %v1489_v12, %v1320_v11  ;;  %v5654_v11 = vld [vmem:[%s7829_s28 + $0x30c] sm:$0xf0] }
 0x1a2   : > { %v4891_v22 = vor.u32 %v5654_v11, %v4890_v10  ;;  %v4924_v10 = vld [vmem:[%s7829_s28 + $0x350] sm:$0xf0]  ;;  %v4930_v11 = vld [vmem:[%s7829_s28 + $0x348] sm:$0xf] }
 0x1a3   : > { %v1946_v16 = vpack.c.bf16 %v1826_v13, %v1826_v13  ;;  %v5652_v13 = vld [vmem:[%s7829_s28 + $0x304] sm:$0xf] }
 0x1a5   : > { %2011 = vst.msk [vmem:[#allocation2 + $0x68] sm:$0xf] %vm1984_vm0, %v1946_v16  ;;  %2165 = vrot.lane.b32.xlu2 %v1946_v16, %s7731_s25  ;;  %v5655_v16 = vld [vmem:[%s7829_s28 + $0x314] sm:$0xf0] }
 0x1a6   : > { %v1658_v24 = vpop.f32.mrf.mxu2  ;;  %v1323_v32 = vpop.f32.mrf.mxu0 }
 0x1a7   : > { %v1827_v25 = vpop.f32.mrf.mxu3  ;;  %v1659_v28 = vadd.f32 %v1658_v24, %v1490_v23  ;;  %v2138_v29 = vpop.permute.xlu0 %2137  ;;  %v4895_v23 = vor.u32 %v5652_v13, %v4892_v14  ;;  %v5661_v13 = vld [vmem:[%s7829_s28 + $0x34c] sm:$0xf]  ;;  %v4932_v14 = vld [vmem:[%s7829_s28 + $0x358] sm:$0xf0] }
 0x1a8   : > { %2317 = vst.msk [vmem:[#allocation3 + $0x30] sm:$0xf] %vm1984_vm0, %v2138_v29  ;;  %v1492_v33 = vpop.f32.mrf.mxu1 }
 0x1a9   : > { %v1828_v34 = vadd.f32 %v1827_v25, %v1659_v28  ;;  %1362 = vmatmul.bf16.gmra.mxu0 %v4859_v26  ;;  %v1493_v36 = vadd.f32 %v1492_v33, %v1323_v32  ;;  %v4899_v26 = vor.u32 %v5655_v16, %v4898_v15 }
 0x1aa   : > { %1531 = vmatmul.bf16.gmra.mxu1 %v4863_v27  ;;  %v4903_v27 = vor.u32 %v5653_v17, %v4900_v18 }
 0x1ab   : > { %v1947_v35 = vpack.c.bf16 %v1828_v34, %v1828_v34  ;;  %1700 = vmatmul.bf16.gmra.mxu2 %v4867_v30 }
 0x1ac   : > { %1869 = vmatmul.bf16.gmra.mxu3 %v4871_v31 }
 0x1ad   : > { %2012 = vst.msk [vmem:[#allocation2 + $0x6c] sm:$0xf] %vm1984_vm0, %v1947_v35  ;;  %2167 = vrot.lane.b32.xlu0 %v1947_v35, %s7731_s25 }
 0x1ae   : > { %v1661_v37 = vpop.f32.mrf.mxu2  ;;  %v1325_v41 = vpop.f32.mrf.mxu0 }
 0x1af   : > { %v1830_v38 = vpop.f32.mrf.mxu3  ;;  %v1662_v39 = vadd.f32 %v1661_v37, %v1493_v36  ;;  %v2140_v40 = vpop.permute.xlu1 %2139 }
 0x1b0   : > { %2318 = vst.msk [vmem:[#allocation3 + $0x34] sm:$0xf] %vm1984_vm0, %v2140_v40  ;;  %v1494_v42 = vpop.f32.mrf.mxu1  ;;  %v4906_v40 = vld [vmem:[%s7829_s28 + $0x320] sm:$0xf] }
 0x1b1   : > { %v1831_v43 = vadd.f32 %v1830_v38, %v1662_v39  ;;  %v1495_v53 = vadd.f32 %v1494_v42, %v1325_v41  ;;  %v5658_v41 = vld [vmem:[%s7829_s28 + $0x32c] sm:$0xf0] }
 0x1b2   : > { %v4907_v52 = vor.u32 %v5658_v41, %v4906_v40  ;;  %v4940_v40 = vld [vmem:[%s7829_s28 + $0x370] sm:$0xf0]  ;;  %v4946_v41 = vld [vmem:[%s7829_s28 + $0x368] sm:$0xf] }
 0x1b3   : > { %v1948_v46 = vpack.c.bf16 %v1831_v43, %v1831_v43  ;;  %v5656_v43 = vld [vmem:[%s7829_s28 + $0x324] sm:$0xf] }
 0x1b5   : > { %2013 = vst.msk [vmem:[#allocation2 + $0x70] sm:$0xf] %vm1984_vm0, %v1948_v46  ;;  %2169 = vrot.lane.b32.xlu1 %v1948_v46, %s7731_s25  ;;  %v5659_v46 = vld [vmem:[%s7829_s28 + $0x334] sm:$0xf0] }
 0x1b6   : > { %v1663_v54 = vpop.f32.mrf.mxu2  ;;  %v1328_v62 = vpop.f32.mrf.mxu0 }
 0x1b7   : > { %v1832_v55 = vpop.f32.mrf.mxu3  ;;  %v1664_v58 = vadd.f32 %v1663_v54, %v1495_v53  ;;  %v2148_v59 = vpop.permute.xlu2 %2147  ;;  %v4911_v53 = vor.u32 %v5656_v43, %v4908_v44  ;;  %v5665_v43 = vld [vmem:[%s7829_s28 + $0x36c] sm:$0xf]  ;;  %v4948_v44 = vld [vmem:[%s7829_s28 + $0x378] sm:$0xf0] }
 0x1b8   : > { %2322 = vst.msk [vmem:[#allocation3 + $0x44] sm:$0xf] %vm1984_vm0, %v2148_v59  ;;  %v1497_v63 = vpop.f32.mrf.mxu1 }
 0x1b9   : > { %v1833_v0 = vadd.f32 %v1832_v55, %v1664_v58  ;;  %1367 = vmatmul.bf16.gmra.mxu0 %v4875_v56  ;;  %v1498_v2 = vadd.f32 %v1497_v63, %v1328_v62  ;;  %v4915_v56 = vor.u32 %v5659_v46, %v4914_v45 }
 0x1ba   : > { %1536 = vmatmul.bf16.gmra.mxu1 %v4879_v57  ;;  %v4919_v57 = vor.u32 %v5657_v47, %v4916_v48 }
 0x1bb   : > { %v1949_v1 = vpack.c.bf16 %v1833_v0, %v1833_v0  ;;  %1705 = vmatmul.bf16.gmra.mxu2 %v4883_v60 }
 0x1bc   : > { %1874 = vmatmul.bf16.gmra.mxu3 %v4887_v61 }
 0x1bd   : > { %2014 = vst.msk [vmem:[#allocation2 + $0x74] sm:$0xf] %vm1984_vm0, %v1949_v1  ;;  %2171 = vrot.lane.b32.xlu2 %v1949_v1, %s7731_s25 }
 0x1be   : > { %v1666_v3 = vpop.f32.mrf.mxu2  ;;  %v1330_v7 = vpop.f32.mrf.mxu0 }
 0x1bf   : > { %v1835_v4 = vpop.f32.mrf.mxu3  ;;  %v1667_v5 = vadd.f32 %v1666_v3, %v1498_v2  ;;  %v2144_v6 = vpop.permute.xlu0 %2143 }
 0x1c0   : > { %2320 = vst.msk [vmem:[#allocation3 + $0x3c] sm:$0xf] %vm1984_vm0, %v2144_v6  ;;  %v1499_v8 = vpop.f32.mrf.mxu1  ;;  %v4922_v6 = vld [vmem:[%s7829_s28 + $0x340] sm:$0xf] }
 0x1c1   : > { %v1836_v9 = vadd.f32 %v1835_v4, %v1667_v5  ;;  %v1500_v19 = vadd.f32 %v1499_v8, %v1330_v7  ;;  %v5662_v7 = vld [vmem:[%s7829_s28 + $0x34c] sm:$0xf0] }
 0x1c2   : > { %v4923_v18 = vor.u32 %v5662_v7, %v4922_v6  ;;  %v4956_v6 = vld [vmem:[%s7829_s28 + $0x390] sm:$0xf0]  ;;  %v4962_v7 = vld [vmem:[%s7829_s28 + $0x388] sm:$0xf] }
 0x1c3   : > { %v1950_v12 = vpack.c.bf16 %v1836_v9, %v1836_v9  ;;  %v5660_v9 = vld [vmem:[%s7829_s28 + $0x344] sm:$0xf] }
 0x1c5   : > { %2015 = vst.msk [vmem:[#allocation2 + $0x78] sm:$0xf] %vm1984_vm0, %v1950_v12  ;;  %2173 = vrot.lane.b32.xlu0 %v1950_v12, %s7731_s25  ;;  %v5663_v12 = vld [vmem:[%s7829_s28 + $0x354] sm:$0xf0] }
 0x1c6   : > { %v1668_v20 = vpop.f32.mrf.mxu2  ;;  %v1333_v28 = vpop.f32.mrf.mxu0 }
 0x1c7   : > { %v1837_v21 = vpop.f32.mrf.mxu3  ;;  %v1669_v24 = vadd.f32 %v1668_v20, %v1500_v19  ;;  %v2146_v25 = vpop.permute.xlu1 %2145  ;;  %v4927_v19 = vor.u32 %v5660_v9, %v4924_v10  ;;  %v5669_v9 = vld [vmem:[%s7829_s28 + $0x38c] sm:$0xf]  ;;  %v4964_v10 = vld [vmem:[%s7829_s28 + $0x398] sm:$0xf0] }
 0x1c8   : > { %2321 = vst.msk [vmem:[#allocation3 + $0x40] sm:$0xf] %vm1984_vm0, %v2146_v25  ;;  %v1502_v29 = vpop.f32.mrf.mxu1 }
 0x1c9   : > { %v1838_v30 = vadd.f32 %v1837_v21, %v1669_v24  ;;  %1372 = vmatmul.bf16.gmra.mxu0 %v4891_v22  ;;  %v1503_v32 = vadd.f32 %v1502_v29, %v1333_v28  ;;  %v4931_v22 = vor.u32 %v5663_v12, %v4930_v11 }
 0x1ca   : > { %1541 = vmatmul.bf16.gmra.mxu1 %v4895_v23  ;;  %v4935_v23 = vor.u32 %v5661_v13, %v4932_v14 }
 0x1cb   : > { %v1951_v31 = vpack.c.bf16 %v1838_v30, %v1838_v30  ;;  %1710 = vmatmul.bf16.gmra.mxu2 %v4899_v26 }
 0x1cc   : > { %1879 = vmatmul.bf16.gmra.mxu3 %v4903_v27 }
 0x1cd   : > { %2016 = vst.msk [vmem:[#allocation2 + $0x7c] sm:$0xf] %vm1984_vm0, %v1951_v31  ;;  %2175 = vrot.lane.b32.xlu1 %v1951_v31, %s7731_s25 }
 0x1ce   : > { %v1671_v33 = vpop.f32.mrf.mxu2  ;;  %v1335_v37 = vpop.f32.mrf.mxu0 }
 0x1cf   : > { %v1840_v34 = vpop.f32.mrf.mxu3  ;;  %v1672_v35 = vadd.f32 %v1671_v33, %v1503_v32  ;;  %v2154_v36 = vpop.permute.xlu2 %2153 }
 0x1d0   : > { %2325 = vst.msk [vmem:[#allocation3 + $0x50] sm:$0xf] %vm1984_vm0, %v2154_v36  ;;  %v1504_v38 = vpop.f32.mrf.mxu1  ;;  %v4938_v36 = vld [vmem:[%s7829_s28 + $0x360] sm:$0xf] }
 0x1d1   : > { %v1841_v39 = vadd.f32 %v1840_v34, %v1672_v35  ;;  %v1505_v49 = vadd.f32 %v1504_v38, %v1335_v37  ;;  %v5666_v37 = vld [vmem:[%s7829_s28 + $0x36c] sm:$0xf0] }
 0x1d2   : > { %v4939_v48 = vor.u32 %v5666_v37, %v4938_v36  ;;  %v4972_v36 = vld [vmem:[%s7829_s28 + $0x3b0] sm:$0xf0]  ;;  %v4978_v37 = vld [vmem:[%s7829_s28 + $0x3a8] sm:$0xf] }
 0x1d3   : > { %v1952_v42 = vpack.c.bf16 %v1841_v39, %v1841_v39  ;;  %v5664_v39 = vld [vmem:[%s7829_s28 + $0x364] sm:$0xf] }
 0x1d5   : > { %2017 = vst.msk [vmem:[#allocation2 + $0x80] sm:$0xf] %vm1984_vm0, %v1952_v42  ;;  %2177 = vrot.lane.b32.xlu2 %v1952_v42, %s7731_s25  ;;  %v5667_v42 = vld [vmem:[%s7829_s28 + $0x374] sm:$0xf0] }
 0x1d6   : > { %v1673_v50 = vpop.f32.mrf.mxu2  ;;  %v1338_v58 = vpop.f32.mrf.mxu0 }
 0x1d7   : > { %v1842_v51 = vpop.f32.mrf.mxu3  ;;  %v1674_v54 = vadd.f32 %v1673_v50, %v1505_v49  ;;  %v2150_v55 = vpop.permute.xlu0 %2149  ;;  %v4943_v49 = vor.u32 %v5664_v39, %v4940_v40  ;;  %v5673_v39 = vld [vmem:[%s7829_s28 + $0x3ac] sm:$0xf]  ;;  %v4980_v40 = vld [vmem:[%s7829_s28 + $0x3b8] sm:$0xf0] }
 0x1d8   : > { %2323 = vst.msk [vmem:[#allocation3 + $0x48] sm:$0xf] %vm1984_vm0, %v2150_v55  ;;  %v1507_v59 = vpop.f32.mrf.mxu1 }
 0x1d9   : > { %v1843_v60 = vadd.f32 %v1842_v51, %v1674_v54  ;;  %1377 = vmatmul.bf16.gmra.mxu0 %v4907_v52  ;;  %v1508_v62 = vadd.f32 %v1507_v59, %v1338_v58  ;;  %v4947_v52 = vor.u32 %v5667_v42, %v4946_v41 }
 0x1da   : > { %1546 = vmatmul.bf16.gmra.mxu1 %v4911_v53  ;;  %v4951_v53 = vor.u32 %v5665_v43, %v4948_v44 }
 0x1db   : > { %v1953_v61 = vpack.c.bf16 %v1843_v60, %v1843_v60  ;;  %1715 = vmatmul.bf16.gmra.mxu2 %v4915_v56 }
 0x1dc   : > { %1884 = vmatmul.bf16.gmra.mxu3 %v4919_v57 }
 0x1dd   : > { %2018 = vst.msk [vmem:[#allocation2 + $0x84] sm:$0xf] %vm1984_vm0, %v1953_v61  ;;  %2179 = vrot.lane.b32.xlu0 %v1953_v61, %s7731_s25 }
 0x1de   : > { %v1676_v63 = vpop.f32.mrf.mxu2  ;;  %v1340_v3 = vpop.f32.mrf.mxu0 }
 0x1df   : > { %v1845_v0 = vpop.f32.mrf.mxu3  ;;  %v1677_v1 = vadd.f32 %v1676_v63, %v1508_v62  ;;  %v2152_v2 = vpop.permute.xlu1 %2151 }
 0x1e0   : > { %2324 = vst.msk [vmem:[#allocation3 + $0x4c] sm:$0xf] %vm1984_vm0, %v2152_v2  ;;  %v1509_v4 = vpop.f32.mrf.mxu1  ;;  %v4954_v2 = vld [vmem:[%s7829_s28 + $0x380] sm:$0xf] }
 0x1e1   : > { %v1846_v5 = vadd.f32 %v1845_v0, %v1677_v1  ;;  %v1510_v15 = vadd.f32 %v1509_v4, %v1340_v3  ;;  %v5670_v3 = vld [vmem:[%s7829_s28 + $0x38c] sm:$0xf0] }
 0x1e2   : > { %v4955_v14 = vor.u32 %v5670_v3, %v4954_v2  ;;  %v4988_v2 = vld [vmem:[%s7829_s28 + $0x3d0] sm:$0xf0]  ;;  %v4994_v3 = vld [vmem:[%s7829_s28 + $0x3c8] sm:$0xf] }
 0x1e3   : > { %v1954_v8 = vpack.c.bf16 %v1846_v5, %v1846_v5  ;;  %v5668_v5 = vld [vmem:[%s7829_s28 + $0x384] sm:$0xf] }
 0x1e5   : > { %2019 = vst.msk [vmem:[#allocation2 + $0x88] sm:$0xf] %vm1984_vm0, %v1954_v8  ;;  %2181 = vrot.lane.b32.xlu1 %v1954_v8, %s7731_s25  ;;  %v5671_v8 = vld [vmem:[%s7829_s28 + $0x394] sm:$0xf0] }
 0x1e6   : > { %v1678_v16 = vpop.f32.mrf.mxu2  ;;  %v1343_v24 = vpop.f32.mrf.mxu0 }
 0x1e7   : > { %v1847_v17 = vpop.f32.mrf.mxu3  ;;  %v1679_v20 = vadd.f32 %v1678_v16, %v1510_v15  ;;  %v2160_v21 = vpop.permute.xlu2 %2159  ;;  %v4959_v15 = vor.u32 %v5668_v5, %v4956_v6  ;;  %v5677_v5 = vld [vmem:[%s7829_s28 + $0x3cc] sm:$0xf]  ;;  %v4996_v6 = vld [vmem:[%s7829_s28 + $0x3d8] sm:$0xf0] }
 0x1e8   : > { %2328 = vst.msk [vmem:[#allocation3 + $0x5c] sm:$0xf] %vm1984_vm0, %v2160_v21  ;;  %v1512_v25 = vpop.f32.mrf.mxu1 }
 0x1e9   : > { %v1848_v26 = vadd.f32 %v1847_v17, %v1679_v20  ;;  %1382 = vmatmul.bf16.gmra.mxu0 %v4923_v18  ;;  %v1513_v28 = vadd.f32 %v1512_v25, %v1343_v24  ;;  %v4963_v18 = vor.u32 %v5671_v8, %v4962_v7 }
 0x1ea   : > { %1551 = vmatmul.bf16.gmra.mxu1 %v4927_v19  ;;  %v4967_v19 = vor.u32 %v5669_v9, %v4964_v10 }
 0x1eb   : > { %v1955_v27 = vpack.c.bf16 %v1848_v26, %v1848_v26  ;;  %1720 = vmatmul.bf16.gmra.mxu2 %v4931_v22 }
 0x1ec   : > { %1889 = vmatmul.bf16.gmra.mxu3 %v4935_v23 }
 0x1ed   : > { %2020 = vst.msk [vmem:[#allocation2 + $0x8c] sm:$0xf] %vm1984_vm0, %v1955_v27  ;;  %2183 = vrot.lane.b32.xlu2 %v1955_v27, %s7731_s25 }
 0x1ee   : > { %v1681_v29 = vpop.f32.mrf.mxu2  ;;  %v1345_v33 = vpop.f32.mrf.mxu0 }
 0x1ef   : > { %v1850_v30 = vpop.f32.mrf.mxu3  ;;  %v1682_v31 = vadd.f32 %v1681_v29, %v1513_v28  ;;  %v2156_v32 = vpop.permute.xlu0 %2155 }
 0x1f0   : > { %2326 = vst.msk [vmem:[#allocation3 + $0x54] sm:$0xf] %vm1984_vm0, %v2156_v32  ;;  %v1514_v34 = vpop.f32.mrf.mxu1  ;;  %v4970_v32 = vld [vmem:[%s7829_s28 + $0x3a0] sm:$0xf] }
 0x1f1   : > { %v1851_v35 = vadd.f32 %v1850_v30, %v1682_v31  ;;  %v1515_v45 = vadd.f32 %v1514_v34, %v1345_v33  ;;  %v5674_v33 = vld [vmem:[%s7829_s28 + $0x3ac] sm:$0xf0] }
 0x1f2   : > { %v4971_v44 = vor.u32 %v5674_v33, %v4970_v32  ;;  %v5004_v32 = vld [vmem:[%s7829_s28 + $0x3f0] sm:$0xf0]  ;;  %v5010_v33 = vld [vmem:[%s7829_s28 + $0x3e8] sm:$0xf] }
 0x1f3   : > { %v1956_v38 = vpack.c.bf16 %v1851_v35, %v1851_v35  ;;  %v5672_v35 = vld [vmem:[%s7829_s28 + $0x3a4] sm:$0xf] }
 0x1f5   : > { %2021 = vst.msk [vmem:[#allocation2 + $0x90] sm:$0xf] %vm1984_vm0, %v1956_v38  ;;  %2185 = vrot.lane.b32.xlu0 %v1956_v38, %s7731_s25  ;;  %v5675_v38 = vld [vmem:[%s7829_s28 + $0x3b4] sm:$0xf0] }
 0x1f6   : > { %v1683_v46 = vpop.f32.mrf.mxu2  ;;  %v1348_v54 = vpop.f32.mrf.mxu0 }
 0x1f7   : > { %v1852_v47 = vpop.f32.mrf.mxu3  ;;  %v1684_v50 = vadd.f32 %v1683_v46, %v1515_v45  ;;  %v2158_v51 = vpop.permute.xlu1 %2157  ;;  %v4975_v45 = vor.u32 %v5672_v35, %v4972_v36  ;;  %v5681_v35 = vld [vmem:[%s7829_s28 + $0x3ec] sm:$0xf]  ;;  %v5012_v36 = vld [vmem:[%s7829_s28 + $0x3f8] sm:$0xf0] }
 0x1f8   : > { %2327 = vst.msk [vmem:[#allocation3 + $0x58] sm:$0xf] %vm1984_vm0, %v2158_v51  ;;  %v1517_v55 = vpop.f32.mrf.mxu1 }
 0x1f9   : > { %v1853_v56 = vadd.f32 %v1852_v47, %v1684_v50  ;;  %1387 = vmatmul.bf16.gmra.mxu0 %v4939_v48  ;;  %v1518_v58 = vadd.f32 %v1517_v55, %v1348_v54  ;;  %v4979_v48 = vor.u32 %v5675_v38, %v4978_v37 }
 0x1fa   : > { %1556 = vmatmul.bf16.gmra.mxu1 %v4943_v49  ;;  %v4983_v49 = vor.u32 %v5673_v39, %v4980_v40 }
 0x1fb   : > { %v1957_v57 = vpack.c.bf16 %v1853_v56, %v1853_v56  ;;  %1725 = vmatmul.bf16.gmra.mxu2 %v4947_v52 }
 0x1fc   : > { %1894 = vmatmul.bf16.gmra.mxu3 %v4951_v53 }
 0x1fd   : > { %2022 = vst.msk [vmem:[#allocation2 + $0x94] sm:$0xf] %vm1984_vm0, %v1957_v57  ;;  %2187 = vrot.lane.b32.xlu1 %v1957_v57, %s7731_s25 }
 0x1fe   : > { %v1686_v59 = vpop.f32.mrf.mxu2  ;;  %v1350_v63 = vpop.f32.mrf.mxu0 }
 0x1ff   : > { %v1855_v60 = vpop.f32.mrf.mxu3  ;;  %v1687_v61 = vadd.f32 %v1686_v59, %v1518_v58  ;;  %v2166_v62 = vpop.permute.xlu2 %2165 }
 0x200   : > { %2331 = vst.msk [vmem:[#allocation3 + $0x68] sm:$0xf] %vm1984_vm0, %v2166_v62  ;;  %v1519_v0 = vpop.f32.mrf.mxu1  ;;  %v4986_v62 = vld [vmem:[%s7829_s28 + $0x3c0] sm:$0xf] }
 0x201   : > { %v1856_v1 = vadd.f32 %v1855_v60, %v1687_v61  ;;  %v1520_v11 = vadd.f32 %v1519_v0, %v1350_v63  ;;  %v5678_v63 = vld [vmem:[%s7829_s28 + $0x3cc] sm:$0xf0] }
 0x202   : > { %v4987_v10 = vor.u32 %v5678_v63, %v4986_v62 }
 0x203   : > { %v1958_v4 = vpack.c.bf16 %v1856_v1, %v1856_v1  ;;  %v5676_v1 = vld [vmem:[%s7829_s28 + $0x3c4] sm:$0xf] }
 0x205   : > { %2023 = vst.msk [vmem:[#allocation2 + $0x98] sm:$0xf] %vm1984_vm0, %v1958_v4  ;;  %2189 = vrot.lane.b32.xlu2 %v1958_v4, %s7731_s25  ;;  %v5679_v4 = vld [vmem:[%s7829_s28 + $0x3d4] sm:$0xf0] }
 0x206   : > { %v1688_v12 = vpop.f32.mrf.mxu2  ;;  %v1353_v20 = vpop.f32.mrf.mxu0 }
 0x207   : > { %v1857_v13 = vpop.f32.mrf.mxu3  ;;  %v1689_v16 = vadd.f32 %v1688_v12, %v1520_v11  ;;  %v2162_v17 = vpop.permute.xlu0 %2161  ;;  %v4991_v11 = vor.u32 %v5676_v1, %v4988_v2 }
 0x208   : > { %2329 = vst.msk [vmem:[#allocation3 + $0x60] sm:$0xf] %vm1984_vm0, %v2162_v17  ;;  %v1522_v21 = vpop.f32.mrf.mxu1 }
 0x209   : > { %v1858_v22 = vadd.f32 %v1857_v13, %v1689_v16  ;;  %1392 = vmatmul.bf16.gmra.mxu0 %v4955_v14  ;;  %v1523_v24 = vadd.f32 %v1522_v21, %v1353_v20  ;;  %v4995_v14 = vor.u32 %v5679_v4, %v4994_v3 }
 0x20a   : > { %1561 = vmatmul.bf16.gmra.mxu1 %v4959_v15  ;;  %v4999_v15 = vor.u32 %v5677_v5, %v4996_v6 }
 0x20b   : > { %v1959_v23 = vpack.c.bf16 %v1858_v22, %v1858_v22  ;;  %1730 = vmatmul.bf16.gmra.mxu2 %v4963_v18 }
 0x20c   : > { %1899 = vmatmul.bf16.gmra.mxu3 %v4967_v19 }
 0x20d   : > { %2024 = vst.msk [vmem:[#allocation2 + $0x9c] sm:$0xf] %vm1984_vm0, %v1959_v23  ;;  %2191 = vrot.lane.b32.xlu0 %v1959_v23, %s7731_s25 }
 0x20e   : > { %v1691_v25 = vpop.f32.mrf.mxu2  ;;  %v1355_v29 = vpop.f32.mrf.mxu0 }
 0x20f   : > { %v1860_v26 = vpop.f32.mrf.mxu3  ;;  %v1692_v27 = vadd.f32 %v1691_v25, %v1523_v24  ;;  %v2164_v28 = vpop.permute.xlu1 %2163 }
 0x210   : > { %2330 = vst.msk [vmem:[#allocation3 + $0x64] sm:$0xf] %vm1984_vm0, %v2164_v28  ;;  %v1524_v30 = vpop.f32.mrf.mxu1  ;;  %v5002_v28 = vld [vmem:[%s7829_s28 + $0x3e0] sm:$0xf] }
 0x211   : > { %v1861_v31 = vadd.f32 %v1860_v26, %v1692_v27  ;;  %v1525_v41 = vadd.f32 %v1524_v30, %v1355_v29  ;;  %v5682_v29 = vld [vmem:[%s7829_s28 + $0x3ec] sm:$0xf0] }
 0x212   : > { %v5003_v40 = vor.u32 %v5682_v29, %v5002_v28 }
 0x213   : > { %v1960_v34 = vpack.c.bf16 %v1861_v31, %v1861_v31  ;;  %v5680_v31 = vld [vmem:[%s7829_s28 + $0x3e4] sm:$0xf] }
 0x215   : > { %2025 = vst.msk [vmem:[#allocation2 + $0xa0] sm:$0xf] %vm1984_vm0, %v1960_v34  ;;  %2193 = vrot.lane.b32.xlu1 %v1960_v34, %s7731_s25  ;;  %v5683_v34 = vld [vmem:[%s7829_s28 + $0x3f4] sm:$0xf0] }
 0x216   : > { %v1693_v42 = vpop.f32.mrf.mxu2  ;;  %v1358_v50 = vpop.f32.mrf.mxu0 }
 0x217   : > { %v1862_v43 = vpop.f32.mrf.mxu3  ;;  %v1694_v46 = vadd.f32 %v1693_v42, %v1525_v41  ;;  %v2172_v47 = vpop.permute.xlu2 %2171  ;;  %v5007_v41 = vor.u32 %v5680_v31, %v5004_v32 }
 0x218   : > { %2334 = vst.msk [vmem:[#allocation3 + $0x74] sm:$0xf] %vm1984_vm0, %v2172_v47  ;;  %v1527_v51 = vpop.f32.mrf.mxu1 }
 0x219   : > { %v1863_v52 = vadd.f32 %v1862_v43, %v1694_v46  ;;  %1397 = vmatmul.bf16.gmra.mxu0 %v4971_v44  ;;  %v1528_v54 = vadd.f32 %v1527_v51, %v1358_v50  ;;  %v5011_v44 = vor.u32 %v5683_v34, %v5010_v33 }
 0x21a   : > { %1566 = vmatmul.bf16.gmra.mxu1 %v4975_v45  ;;  %v5015_v45 = vor.u32 %v5681_v35, %v5012_v36 }
 0x21b   : > { %v1961_v53 = vpack.c.bf16 %v1863_v52, %v1863_v52  ;;  %1735 = vmatmul.bf16.gmra.mxu2 %v4979_v48 }
 0x21c   : > { %1904 = vmatmul.bf16.gmra.mxu3 %v4983_v49 }
 0x21d   : > { %2026 = vst.msk [vmem:[#allocation2 + $0xa4] sm:$0xf] %vm1984_vm0, %v1961_v53  ;;  %2195 = vrot.lane.b32.xlu2 %v1961_v53, %s7731_s25 }
 0x21e   : > { %v1696_v55 = vpop.f32.mrf.mxu2  ;;  %v1360_v59 = vpop.f32.mrf.mxu0 }
 0x21f   : > { %v1865_v56 = vpop.f32.mrf.mxu3  ;;  %v1697_v57 = vadd.f32 %v1696_v55, %v1528_v54  ;;  %v2168_v58 = vpop.permute.xlu0 %2167 }
 0x220   : > { %2332 = vst.msk [vmem:[#allocation3 + $0x6c] sm:$0xf] %vm1984_vm0, %v2168_v58  ;;  %v1529_v60 = vpop.f32.mrf.mxu1 }
 0x221   : > { %v1866_v61 = vadd.f32 %v1865_v56, %v1697_v57  ;;  %v1530_v7 = vadd.f32 %v1529_v60, %v1360_v59 }
 0x223   : > { %v1962_v0 = vpack.c.bf16 %v1866_v61, %v1866_v61 }
 0x225   : > { %2027 = vst.msk [vmem:[#allocation2 + $0xa8] sm:$0xf] %vm1984_vm0, %v1962_v0  ;;  %2197 = vrot.lane.b32.xlu0 %v1962_v0, %s7731_s25 }
 0x226   : > { %v1698_v8 = vpop.f32.mrf.mxu2  ;;  %v1363_v16 = vpop.f32.mrf.mxu0 }
 0x227   : > { %v1867_v9 = vpop.f32.mrf.mxu3  ;;  %v1699_v12 = vadd.f32 %v1698_v8, %v1530_v7  ;;  %v2170_v13 = vpop.permute.xlu1 %2169 }
 0x228   : > { %2333 = vst.msk [vmem:[#allocation3 + $0x70] sm:$0xf] %vm1984_vm0, %v2170_v13  ;;  %v1532_v17 = vpop.f32.mrf.mxu1 }
 0x229   : > { %v1868_v18 = vadd.f32 %v1867_v9, %v1699_v12  ;;  %1402 = vmatmul.bf16.gmra.mxu0 %v4987_v10  ;;  %v1533_v20 = vadd.f32 %v1532_v17, %v1363_v16 }
 0x22a   : > { %1571 = vmatmul.bf16.gmra.mxu1 %v4991_v11 }
 0x22b   : > { %v1963_v19 = vpack.c.bf16 %v1868_v18, %v1868_v18  ;;  %1740 = vmatmul.bf16.gmra.mxu2 %v4995_v14 }
 0x22c   : > { %1909 = vmatmul.bf16.gmra.mxu3 %v4999_v15 }
 0x22d   : > { %2028 = vst.msk [vmem:[#allocation2 + $0xac] sm:$0xf] %vm1984_vm0, %v1963_v19  ;;  %2199 = vrot.lane.b32.xlu1 %v1963_v19, %s7731_s25 }
 0x22e   : > { %v1701_v21 = vpop.f32.mrf.mxu2  ;;  %v1365_v25 = vpop.f32.mrf.mxu0 }
 0x22f   : > { %v1870_v22 = vpop.f32.mrf.mxu3  ;;  %v1702_v23 = vadd.f32 %v1701_v21, %v1533_v20  ;;  %v2178_v24 = vpop.permute.xlu2 %2177 }
 0x230   : > { %2337 = vst.msk [vmem:[#allocation3 + $0x80] sm:$0xf] %vm1984_vm0, %v2178_v24  ;;  %v1534_v26 = vpop.f32.mrf.mxu1 }
 0x231   : > { %v1871_v27 = vadd.f32 %v1870_v22, %v1702_v23  ;;  %v1535_v37 = vadd.f32 %v1534_v26, %v1365_v25 }
 0x233   : > { %v1964_v30 = vpack.c.bf16 %v1871_v27, %v1871_v27 }
 0x235   : > { %2029 = vst.msk [vmem:[#allocation2 + $0xb0] sm:$0xf] %vm1984_vm0, %v1964_v30  ;;  %2201 = vrot.lane.b32.xlu2 %v1964_v30, %s7731_s25 }
 0x236   : > { %v1703_v38 = vpop.f32.mrf.mxu2  ;;  %v1368_v46 = vpop.f32.mrf.mxu0 }
 0x237   : > { %v1872_v39 = vpop.f32.mrf.mxu3  ;;  %v1704_v42 = vadd.f32 %v1703_v38, %v1535_v37  ;;  %v2174_v43 = vpop.permute.xlu0 %2173 }
 0x238   : > { %2335 = vst.msk [vmem:[#allocation3 + $0x78] sm:$0xf] %vm1984_vm0, %v2174_v43  ;;  %v1537_v47 = vpop.f32.mrf.mxu1 }
 0x239   : > { %v1873_v48 = vadd.f32 %v1872_v39, %v1704_v42  ;;  %1407 = vmatmul.bf16.gmra.mxu0 %v5003_v40  ;;  %v1538_v50 = vadd.f32 %v1537_v47, %v1368_v46 }
 0x23a   : > { %1576 = vmatmul.bf16.gmra.mxu1 %v5007_v41 }
 0x23b   : > { %v1965_v49 = vpack.c.bf16 %v1873_v48, %v1873_v48  ;;  %1745 = vmatmul.bf16.gmra.mxu2 %v5011_v44 }
 0x23c   : > { %1914 = vmatmul.bf16.gmra.mxu3 %v5015_v45 }
 0x23d   : > { %2030 = vst.msk [vmem:[#allocation2 + $0xb4] sm:$0xf] %vm1984_vm0, %v1965_v49  ;;  %2203 = vrot.lane.b32.xlu0 %v1965_v49, %s7731_s25 }
 0x23e   : > { %v1706_v51 = vpop.f32.mrf.mxu2  ;;  %v1370_v55 = vpop.f32.mrf.mxu0 }
 0x23f   : > { %v1875_v52 = vpop.f32.mrf.mxu3  ;;  %v1707_v53 = vadd.f32 %v1706_v51, %v1538_v50  ;;  %v2176_v54 = vpop.permute.xlu1 %2175 }
 0x240   : > { %2336 = vst.msk [vmem:[#allocation3 + $0x7c] sm:$0xf] %vm1984_vm0, %v2176_v54  ;;  %v1539_v56 = vpop.f32.mrf.mxu1 }
 0x241   : > { %v1876_v57 = vadd.f32 %v1875_v52, %v1707_v53  ;;  %v1540_v59 = vadd.f32 %v1539_v56, %v1370_v55 }
 0x243   : > { %v1966_v58 = vpack.c.bf16 %v1876_v57, %v1876_v57 }
 0x245   : > { %2031 = vst.msk [vmem:[#allocation2 + $0xb8] sm:$0xf] %vm1984_vm0, %v1966_v58  ;;  %2205 = vrot.lane.b32.xlu1 %v1966_v58, %s7731_s25 }
 0x246   : > { %v1708_v60 = vpop.f32.mrf.mxu2  ;;  %v1373_v0 = vpop.f32.mrf.mxu0 }
 0x247   : > { %v1877_v61 = vpop.f32.mrf.mxu3  ;;  %v1709_v62 = vadd.f32 %v1708_v60, %v1540_v59  ;;  %v2184_v63 = vpop.permute.xlu2 %2183 }
 0x248   : > { %2340 = vst.msk [vmem:[#allocation3 + $0x8c] sm:$0xf] %vm1984_vm0, %v2184_v63  ;;  %v1542_v1 = vpop.f32.mrf.mxu1 }
 0x249   : > { %v1878_v2 = vadd.f32 %v1877_v61, %v1709_v62  ;;  %v1543_v4 = vadd.f32 %v1542_v1, %v1373_v0 }
 0x24b   : > { %v1967_v3 = vpack.c.bf16 %v1878_v2, %v1878_v2 }
 0x24d   : > { %2032 = vst.msk [vmem:[#allocation2 + $0xbc] sm:$0xf] %vm1984_vm0, %v1967_v3  ;;  %2207 = vrot.lane.b32.xlu2 %v1967_v3, %s7731_s25 }
 0x24e   : > { %v1711_v5 = vpop.f32.mrf.mxu2  ;;  %v1375_v9 = vpop.f32.mrf.mxu0 }
 0x24f   : > { %v1880_v6 = vpop.f32.mrf.mxu3  ;;  %v1712_v7 = vadd.f32 %v1711_v5, %v1543_v4  ;;  %v2180_v8 = vpop.permute.xlu0 %2179 }
 0x250   : > { %2338 = vst.msk [vmem:[#allocation3 + $0x84] sm:$0xf] %vm1984_vm0, %v2180_v8  ;;  %v1544_v10 = vpop.f32.mrf.mxu1 }
 0x251   : > { %v1881_v11 = vadd.f32 %v1880_v6, %v1712_v7  ;;  %v1545_v13 = vadd.f32 %v1544_v10, %v1375_v9 }
 0x253   : > { %v1968_v12 = vpack.c.bf16 %v1881_v11, %v1881_v11 }
 0x255   : > { %2033 = vst.msk [vmem:[#allocation2 + $0xc0] sm:$0xf] %vm1984_vm0, %v1968_v12  ;;  %2209 = vrot.lane.b32.xlu0 %v1968_v12, %s7731_s25 }
 0x256   : > { %v1713_v14 = vpop.f32.mrf.mxu2  ;;  %v1378_v18 = vpop.f32.mrf.mxu0 }
 0x257   : > { %v1882_v15 = vpop.f32.mrf.mxu3  ;;  %v1714_v16 = vadd.f32 %v1713_v14, %v1545_v13  ;;  %v2182_v17 = vpop.permute.xlu1 %2181 }
 0x258   : > { %2339 = vst.msk [vmem:[#allocation3 + $0x88] sm:$0xf] %vm1984_vm0, %v2182_v17  ;;  %v1547_v19 = vpop.f32.mrf.mxu1 }
 0x259   : > { %v1883_v20 = vadd.f32 %v1882_v15, %v1714_v16  ;;  %v1548_v22 = vadd.f32 %v1547_v19, %v1378_v18 }
 0x25b   : > { %v1969_v21 = vpack.c.bf16 %v1883_v20, %v1883_v20 }
 0x25d   : > { %2034 = vst.msk [vmem:[#allocation2 + $0xc4] sm:$0xf] %vm1984_vm0, %v1969_v21  ;;  %2211 = vrot.lane.b32.xlu1 %v1969_v21, %s7731_s25 }
 0x25e   : > { %v1716_v23 = vpop.f32.mrf.mxu2  ;;  %v1380_v27 = vpop.f32.mrf.mxu0 }
 0x25f   : > { %v1885_v24 = vpop.f32.mrf.mxu3  ;;  %v1717_v25 = vadd.f32 %v1716_v23, %v1548_v22  ;;  %v2190_v26 = vpop.permute.xlu2 %2189 }
 0x260   : > { %2343 = vst.msk [vmem:[#allocation3 + $0x98] sm:$0xf] %vm1984_vm0, %v2190_v26  ;;  %v1549_v28 = vpop.f32.mrf.mxu1 }
 0x261   : > { %v1886_v29 = vadd.f32 %v1885_v24, %v1717_v25  ;;  %v1550_v31 = vadd.f32 %v1549_v28, %v1380_v27 }
 0x263   : > { %v1970_v30 = vpack.c.bf16 %v1886_v29, %v1886_v29 }
 0x265   : > { %2035 = vst.msk [vmem:[#allocation2 + $0xc8] sm:$0xf] %vm1984_vm0, %v1970_v30  ;;  %2213 = vrot.lane.b32.xlu2 %v1970_v30, %s7731_s25 }
 0x266   : > { %v1718_v32 = vpop.f32.mrf.mxu2  ;;  %v1383_v36 = vpop.f32.mrf.mxu0 }
 0x267   : > { %v1887_v33 = vpop.f32.mrf.mxu3  ;;  %v1719_v34 = vadd.f32 %v1718_v32, %v1550_v31  ;;  %v2186_v35 = vpop.permute.xlu0 %2185 }
 0x268   : > { %2341 = vst.msk [vmem:[#allocation3 + $0x90] sm:$0xf] %vm1984_vm0, %v2186_v35  ;;  %v1552_v37 = vpop.f32.mrf.mxu1 }
 0x269   : > { %v1888_v38 = vadd.f32 %v1887_v33, %v1719_v34  ;;  %v1553_v40 = vadd.f32 %v1552_v37, %v1383_v36 }
 0x26b   : > { %v1971_v39 = vpack.c.bf16 %v1888_v38, %v1888_v38 }
 0x26d   : > { %2036 = vst.msk [vmem:[#allocation2 + $0xcc] sm:$0xf] %vm1984_vm0, %v1971_v39  ;;  %2215 = vrot.lane.b32.xlu0 %v1971_v39, %s7731_s25 }
 0x26e   : > { %v1721_v41 = vpop.f32.mrf.mxu2  ;;  %v1385_v45 = vpop.f32.mrf.mxu0 }
 0x26f   : > { %v1890_v42 = vpop.f32.mrf.mxu3  ;;  %v1722_v43 = vadd.f32 %v1721_v41, %v1553_v40  ;;  %v2188_v44 = vpop.permute.xlu1 %2187 }
 0x270   : > { %2342 = vst.msk [vmem:[#allocation3 + $0x94] sm:$0xf] %vm1984_vm0, %v2188_v44  ;;  %v1554_v46 = vpop.f32.mrf.mxu1 }
 0x271   : > { %v1891_v47 = vadd.f32 %v1890_v42, %v1722_v43  ;;  %v1555_v49 = vadd.f32 %v1554_v46, %v1385_v45 }
 0x273   : > { %v1972_v48 = vpack.c.bf16 %v1891_v47, %v1891_v47 }
 0x275   : > { %2037 = vst.msk [vmem:[#allocation2 + $0xd0] sm:$0xf] %vm1984_vm0, %v1972_v48  ;;  %2217 = vrot.lane.b32.xlu1 %v1972_v48, %s7731_s25 }
 0x276   : > { %v1723_v50 = vpop.f32.mrf.mxu2  ;;  %v1388_v54 = vpop.f32.mrf.mxu0 }
 0x277   : > { %v1892_v51 = vpop.f32.mrf.mxu3  ;;  %v1724_v52 = vadd.f32 %v1723_v50, %v1555_v49  ;;  %v2196_v53 = vpop.permute.xlu2 %2195 }
 0x278   : > { %2346 = vst.msk [vmem:[#allocation3 + $0xa4] sm:$0xf] %vm1984_vm0, %v2196_v53  ;;  %v1557_v55 = vpop.f32.mrf.mxu1 }
 0x279   : > { %v1893_v56 = vadd.f32 %v1892_v51, %v1724_v52  ;;  %v1558_v58 = vadd.f32 %v1557_v55, %v1388_v54 }
 0x27b   : > { %v1973_v57 = vpack.c.bf16 %v1893_v56, %v1893_v56 }
 0x27d   : > { %2038 = vst.msk [vmem:[#allocation2 + $0xd4] sm:$0xf] %vm1984_vm0, %v1973_v57  ;;  %2219 = vrot.lane.b32.xlu2 %v1973_v57, %s7731_s25 }
 0x27e   : > { %v1726_v59 = vpop.f32.mrf.mxu2  ;;  %v1390_v63 = vpop.f32.mrf.mxu0 }
 0x27f   : > { %v1895_v60 = vpop.f32.mrf.mxu3  ;;  %v1727_v61 = vadd.f32 %v1726_v59, %v1558_v58  ;;  %v2192_v62 = vpop.permute.xlu0 %2191 }
 0x280   : > { %2344 = vst.msk [vmem:[#allocation3 + $0x9c] sm:$0xf] %vm1984_vm0, %v2192_v62  ;;  %v1559_v0 = vpop.f32.mrf.mxu1 }
 0x281   : > { %v1896_v1 = vadd.f32 %v1895_v60, %v1727_v61  ;;  %v1560_v3 = vadd.f32 %v1559_v0, %v1390_v63 }
 0x283   : > { %v1974_v2 = vpack.c.bf16 %v1896_v1, %v1896_v1 }
 0x285   : > { %2039 = vst.msk [vmem:[#allocation2 + $0xd8] sm:$0xf] %vm1984_vm0, %v1974_v2  ;;  %2221 = vrot.lane.b32.xlu0 %v1974_v2, %s7731_s25 }
 0x286   : > { %v1728_v4 = vpop.f32.mrf.mxu2  ;;  %v1393_v8 = vpop.f32.mrf.mxu0 }
 0x287   : > { %v1897_v5 = vpop.f32.mrf.mxu3  ;;  %v1729_v6 = vadd.f32 %v1728_v4, %v1560_v3  ;;  %v2194_v7 = vpop.permute.xlu1 %2193 }
 0x288   : > { %2345 = vst.msk [vmem:[#allocation3 + $0xa0] sm:$0xf] %vm1984_vm0, %v2194_v7  ;;  %v1562_v9 = vpop.f32.mrf.mxu1 }
 0x289   : > { %v1898_v10 = vadd.f32 %v1897_v5, %v1729_v6  ;;  %v1563_v12 = vadd.f32 %v1562_v9, %v1393_v8 }
 0x28b   : > { %v1975_v11 = vpack.c.bf16 %v1898_v10, %v1898_v10 }
 0x28d   : > { %2040 = vst.msk [vmem:[#allocation2 + $0xdc] sm:$0xf] %vm1984_vm0, %v1975_v11  ;;  %2223 = vrot.lane.b32.xlu1 %v1975_v11, %s7731_s25 }
 0x28e   : > { %v1731_v13 = vpop.f32.mrf.mxu2  ;;  %v1395_v17 = vpop.f32.mrf.mxu0 }
 0x28f   : > { %v1900_v14 = vpop.f32.mrf.mxu3  ;;  %v1732_v15 = vadd.f32 %v1731_v13, %v1563_v12  ;;  %v2202_v16 = vpop.permute.xlu2 %2201 }
 0x290   : > { %2349 = vst.msk [vmem:[#allocation3 + $0xb0] sm:$0xf] %vm1984_vm0, %v2202_v16  ;;  %v1564_v18 = vpop.f32.mrf.mxu1 }
 0x291   : > { %v1901_v19 = vadd.f32 %v1900_v14, %v1732_v15  ;;  %v1565_v21 = vadd.f32 %v1564_v18, %v1395_v17 }
 0x293   : > { %v1976_v20 = vpack.c.bf16 %v1901_v19, %v1901_v19 }
 0x295   : > { %2041 = vst.msk [vmem:[#allocation2 + $0xe0] sm:$0xf] %vm1984_vm0, %v1976_v20  ;;  %2225 = vrot.lane.b32.xlu2 %v1976_v20, %s7731_s25 }
 0x296   : > { %v1733_v22 = vpop.f32.mrf.mxu2  ;;  %v1398_v26 = vpop.f32.mrf.mxu0 }
 0x297   : > { %v1902_v23 = vpop.f32.mrf.mxu3  ;;  %v1734_v24 = vadd.f32 %v1733_v22, %v1565_v21  ;;  %v2198_v25 = vpop.permute.xlu0 %2197 }
 0x298   : > { %2347 = vst.msk [vmem:[#allocation3 + $0xa8] sm:$0xf] %vm1984_vm0, %v2198_v25  ;;  %v1567_v27 = vpop.f32.mrf.mxu1 }
 0x299   : > { %v1903_v28 = vadd.f32 %v1902_v23, %v1734_v24  ;;  %v1568_v30 = vadd.f32 %v1567_v27, %v1398_v26 }
 0x29b   : > { %v1977_v29 = vpack.c.bf16 %v1903_v28, %v1903_v28 }
 0x29d   : > { %2042 = vst.msk [vmem:[#allocation2 + $0xe4] sm:$0xf] %vm1984_vm0, %v1977_v29  ;;  %2227 = vrot.lane.b32.xlu0 %v1977_v29, %s7731_s25 }
 0x29e   : > { %v1736_v31 = vpop.f32.mrf.mxu2  ;;  %v1400_v35 = vpop.f32.mrf.mxu0 }
 0x29f   : > { %v1905_v32 = vpop.f32.mrf.mxu3  ;;  %v1737_v33 = vadd.f32 %v1736_v31, %v1568_v30  ;;  %v2200_v34 = vpop.permute.xlu1 %2199 }
 0x2a0   : > { %2348 = vst.msk [vmem:[#allocation3 + $0xac] sm:$0xf] %vm1984_vm0, %v2200_v34  ;;  %v1569_v36 = vpop.f32.mrf.mxu1 }
 0x2a1   : > { %v1906_v37 = vadd.f32 %v1905_v32, %v1737_v33  ;;  %v1570_v39 = vadd.f32 %v1569_v36, %v1400_v35 }
 0x2a3   : > { %v1978_v38 = vpack.c.bf16 %v1906_v37, %v1906_v37 }
 0x2a5   : > { %2043 = vst.msk [vmem:[#allocation2 + $0xe8] sm:$0xf] %vm1984_vm0, %v1978_v38  ;;  %2229 = vrot.lane.b32.xlu1 %v1978_v38, %s7731_s25 }
 0x2a6   : > { %v1738_v40 = vpop.f32.mrf.mxu2  ;;  %v1403_v44 = vpop.f32.mrf.mxu0 }
 0x2a7   : > { %v1907_v41 = vpop.f32.mrf.mxu3  ;;  %v1739_v42 = vadd.f32 %v1738_v40, %v1570_v39  ;;  %v2208_v43 = vpop.permute.xlu2 %2207 }
 0x2a8   : > { %2352 = vst.msk [vmem:[#allocation3 + $0xbc] sm:$0xf] %vm1984_vm0, %v2208_v43  ;;  %v1572_v45 = vpop.f32.mrf.mxu1 }
 0x2a9   : > { %v1908_v46 = vadd.f32 %v1907_v41, %v1739_v42  ;;  %v1573_v48 = vadd.f32 %v1572_v45, %v1403_v44 }
 0x2ab   : > { %v1979_v47 = vpack.c.bf16 %v1908_v46, %v1908_v46 }
 0x2ad   : > { %2044 = vst.msk [vmem:[#allocation2 + $0xec] sm:$0xf] %vm1984_vm0, %v1979_v47  ;;  %2231 = vrot.lane.b32.xlu2 %v1979_v47, %s7731_s25 }
 0x2ae   : > { %v1741_v49 = vpop.f32.mrf.mxu2  ;;  %v1405_v53 = vpop.f32.mrf.mxu0 }
 0x2af   : > { %v1910_v50 = vpop.f32.mrf.mxu3  ;;  %v1742_v51 = vadd.f32 %v1741_v49, %v1573_v48  ;;  %v2204_v52 = vpop.permute.xlu0 %2203 }
 0x2b0   : > { %2350 = vst.msk [vmem:[#allocation3 + $0xb4] sm:$0xf] %vm1984_vm0, %v2204_v52  ;;  %v1574_v54 = vpop.f32.mrf.mxu1 }
 0x2b1   : > { %v1911_v55 = vadd.f32 %v1910_v50, %v1742_v51  ;;  %v1575_v57 = vadd.f32 %v1574_v54, %v1405_v53 }
 0x2b3   : > { %v1980_v56 = vpack.c.bf16 %v1911_v55, %v1911_v55 }
 0x2b5   : > { %2045 = vst.msk [vmem:[#allocation2 + $0xf0] sm:$0xf] %vm1984_vm0, %v1980_v56  ;;  %2233 = vrot.lane.b32.xlu0 %v1980_v56, %s7731_s25 }
 0x2b6   : > { %v1743_v58 = vpop.f32.mrf.mxu2  ;;  %v1408_v62 = vpop.f32.mrf.mxu0 }
 0x2b7   : > { %v1912_v59 = vpop.f32.mrf.mxu3  ;;  %v1744_v60 = vadd.f32 %v1743_v58, %v1575_v57  ;;  %v2206_v61 = vpop.permute.xlu1 %2205 }
 0x2b8   : > { %2351 = vst.msk [vmem:[#allocation3 + $0xb8] sm:$0xf] %vm1984_vm0, %v2206_v61  ;;  %v1577_v63 = vpop.f32.mrf.mxu1 }
 0x2b9   : > { %v1913_v0 = vadd.f32 %v1912_v59, %v1744_v60  ;;  %v1578_v2 = vadd.f32 %v1577_v63, %v1408_v62 }
 0x2bb   : > { %v1981_v1 = vpack.c.bf16 %v1913_v0, %v1913_v0 }
 0x2bd   : > { %2046 = vst.msk [vmem:[#allocation2 + $0xf4] sm:$0xf] %vm1984_vm0, %v1981_v1  ;;  %2235 = vrot.lane.b32.xlu1 %v1981_v1, %s7731_s25 }
 0x2be   : > { %v1746_v3 = vpop.f32.mrf.mxu2  ;;  %v1410_v8 = vpop.f32.mrf.mxu0 }
 0x2bf   : > { %v1915_v4 = vpop.f32.mrf.mxu3  ;;  %v1747_v5 = vadd.f32 %v1746_v3, %v1578_v2  ;;  %v2214_v6 = vpop.permute.xlu2 %2213 }
 0x2c0   : > { %2355 = vst.msk [vmem:[#allocation3 + $0xc8] sm:$0xf] %vm1984_vm0, %v2214_v6  ;;  %v1579_v9 = vpop.f32.mrf.mxu1 }
 0x2c1   : > { %v1916_v7 = vadd.f32 %v1915_v4, %v1747_v5  ;;  %v1580_v11 = vadd.f32 %v1579_v9, %v1410_v8 }
 0x2c3   : > { %v1982_v10 = vpack.c.bf16 %v1916_v7, %v1916_v7 }
 0x2c5   : > { %2047 = vst.msk [vmem:[#allocation2 + $0xf8] sm:$0xf] %vm1984_vm0, %v1982_v10  ;;  %2237 = vrot.lane.b32.xlu2 %v1982_v10, %s7731_s25 }
 0x2c6   : > { %v1748_v12 = vpop.f32.mrf.mxu2 }
 0x2c7   : > { %v1749_v13 = vadd.f32 %v1748_v12, %v1580_v11  ;;  %v2210_v14 = vpop.permute.xlu0 %2209  ;;  %v1917_v15 = vpop.f32.mrf.mxu3 }
 0x2c8   : > { %2353 = vst.msk [vmem:[#allocation3 + $0xc0] sm:$0xf] %vm1984_vm0, %v2210_v14 }
 0x2c9   : > { %v1918_v16 = vadd.f32 %v1917_v15, %v1749_v13 }
 0x2cb   : > { %v1983_v17 = vpack.c.bf16 %v1918_v16, %v1918_v16 }
 0x2cd   : > { %2048 = vst.msk [vmem:[#allocation2 + $0xfc] sm:$0xf] %vm1984_vm0, %v1983_v17  ;;  %2239 = vrot.lane.b32.xlu0 %v1983_v17, %s7731_s25 }
 0x2cf   : > { %v2212_v18 = vpop.permute.xlu1 %2211 }
 0x2d0   : > { %2354 = vst.msk [vmem:[#allocation3 + $0xc4] sm:$0xf] %vm1984_vm0, %v2212_v18 }
 0x2d7   : > { %v2220_v19 = vpop.permute.xlu2 %2219 }
 0x2d8   : > { %2358 = vst.msk [vmem:[#allocation3 + $0xd4] sm:$0xf] %vm1984_vm0, %v2220_v19 }
 0x2df   : > { %v2216_v20 = vpop.permute.xlu0 %2215 }
 0x2e0   : > { %2356 = vst.msk [vmem:[#allocation3 + $0xcc] sm:$0xf] %vm1984_vm0, %v2216_v20 }
 0x2e7   : > { %v2218_v21 = vpop.permute.xlu1 %2217 }
 0x2e8   : > { %2357 = vst.msk [vmem:[#allocation3 + $0xd0] sm:$0xf] %vm1984_vm0, %v2218_v21 }
 0x2ef   : > { %v2226_v22 = vpop.permute.xlu2 %2225 }
 0x2f0   : > { %2361 = vst.msk [vmem:[#allocation3 + $0xe0] sm:$0xf] %vm1984_vm0, %v2226_v22 }
 0x2f7   : > { %v2222_v23 = vpop.permute.xlu0 %2221 }
 0x2f8   : > { %2359 = vst.msk [vmem:[#allocation3 + $0xd8] sm:$0xf] %vm1984_vm0, %v2222_v23 }
 0x2ff   : > { %v2224_v24 = vpop.permute.xlu1 %2223 }
 0x300   : > { %2360 = vst.msk [vmem:[#allocation3 + $0xdc] sm:$0xf] %vm1984_vm0, %v2224_v24 }
 0x307   : > { %v2232_v25 = vpop.permute.xlu2 %2231 }
 0x308   : > { %2364 = vst.msk [vmem:[#allocation3 + $0xec] sm:$0xf] %vm1984_vm0, %v2232_v25 }
 0x30f   : > { %v2228_v26 = vpop.permute.xlu0 %2227 }
 0x310   : > { %2362 = vst.msk [vmem:[#allocation3 + $0xe4] sm:$0xf] %vm1984_vm0, %v2228_v26 }
 0x317   : > { %v2230_v27 = vpop.permute.xlu1 %2229 }
 0x318   : > { %2363 = vst.msk [vmem:[#allocation3 + $0xe8] sm:$0xf] %vm1984_vm0, %v2230_v27 }
 0x31f   : > { %v2238_v28 = vpop.permute.xlu2 %2237 }
 0x320   : > { %2367 = vst.msk [vmem:[#allocation3 + $0xf8] sm:$0xf] %vm1984_vm0, %v2238_v28 }
 0x327   : > { %v2234_v29 = vpop.permute.xlu0 %2233 }
 0x328   : > { %2365 = vst.msk [vmem:[#allocation3 + $0xf0] sm:$0xf] %vm1984_vm0, %v2234_v29 }
 0x32f   : > { %v2236_v30 = vpop.permute.xlu1 %2235 }
 0x330   : > { %2366 = vst.msk [vmem:[#allocation3 + $0xf4] sm:$0xf] %vm1984_vm0, %v2236_v30 }
 0x33f   : > { %v2240_v31 = vpop.permute.xlu0 %2239 }
 0x340   : > { %2368 = vst.msk [vmem:[#allocation3 + $0xfc] sm:$0xf] %vm1984_vm0, %v2240_v31 }
 0x341 PF: > { %v5756_v32 = vld [vmem:[%s10032_s1 + $0x38] sm:$0xff]  ;;  %v5755_v36 = vld [vmem:[%s10032_s1 + $0x30] sm:$0xff]  ;;  %v5754_v40 = vld [vmem:[%s10032_s1 + $0x28] sm:$0xff]  ;;  %s5144_s8 = sshll.u32 %s7323_s15, 7  ;;  %p5403_p3 = scmp.le.s32.totalorder %s7323_s15, 0 }
 0x342   : > { %v5764_v33 = vld [vmem:[%s10032_s1 + $0x78] sm:$0xff]  ;;  %2823 = vmatpush.bf16.msra.mxu0 %v5756_v32  ;;  %v5763_v37 = vld [vmem:[%s10032_s1 + $0x70] sm:$0xff]  ;;  %v5762_v41 = vld [vmem:[%s10032_s1 + $0x68] sm:$0xff]  ;;  %s8449_s24 = sshra.s32 %s5144_s8, 3 }
 0x343   : > { %v5772_v34 = vld [vmem:[%s10032_s1 + $0xb8] sm:$0xff]  ;;  %2872 = vmatpush.bf16.msra.mxu1 %v5764_v33  ;;  %v5771_v38 = vld [vmem:[%s10032_s1 + $0xb0] sm:$0xff]  ;;  %v5770_v42 = vld [vmem:[%s10032_s1 + $0xa8] sm:$0xff]  ;;  %s5716_s10 = sshll.u32 %s8449_s24, 4 }
 0x344   : > { %v5780_v35 = vld [vmem:[%s10032_s1 + $0xf8] sm:$0xff]  ;;  %2921 = vmatpush.bf16.msra.mxu2 %v5772_v34  ;;  %v5779_v39 = vld [vmem:[%s10032_s1 + $0xf0] sm:$0xff]  ;;  %v5778_v43 = vld [vmem:[%s10032_s1 + $0xe8] sm:$0xff]  ;;  %s8471_s23 = scalar_lea.vmem %s7829_s28, %s5716_s10 [#allocation4] }
 0x345   : > { %2970 = vmatpush.bf16.msra.mxu3 %v5780_v35  ;;  %v5753_v44 = vld [vmem:[%s10032_s1 + $0x20] sm:$0xff]  ;;  %v5752_v48 = vld [vmem:[%s10032_s1 + $0x18] sm:$0xff]  ;;  %v5751_v52 = vld [vmem:[%s10032_s1 + $0x10] sm:$0xff] }
 0x346   : > { %2824 = vmatpush.bf16.msra.mxu0 %v5755_v36  ;;  %v5761_v45 = vld [vmem:[%s10032_s1 + $0x60] sm:$0xff]  ;;  %v5760_v49 = vld [vmem:[%s10032_s1 + $0x58] sm:$0xff]  ;;  %v5759_v53 = vld [vmem:[%s10032_s1 + $0x50] sm:$0xff] }
 0x347   : > { %2873 = vmatpush.bf16.msra.mxu1 %v5763_v37  ;;  %v5769_v46 = vld [vmem:[%s10032_s1 + $0xa0] sm:$0xff]  ;;  %v5768_v50 = vld [vmem:[%s10032_s1 + $0x98] sm:$0xff]  ;;  %v5767_v54 = vld [vmem:[%s10032_s1 + $0x90] sm:$0xff] }
 0x348   : > { %2922 = vmatpush.bf16.msra.mxu2 %v5771_v38  ;;  %v5777_v47 = vld [vmem:[%s10032_s1 + $0xe0] sm:$0xff]  ;;  %v5776_v51 = vld [vmem:[%s10032_s1 + $0xd8] sm:$0xff]  ;;  %v5775_v55 = vld [vmem:[%s10032_s1 + $0xd0] sm:$0xff] }
 0x349   : > { %2971 = vmatpush.bf16.msra.mxu3 %v5779_v39  ;;  %v5750_v56 = vld [vmem:[%s10032_s1 + $0x8] sm:$0xff]  ;;  %v5749_v60 = vld [vmem:[%s10032_s1] sm:$0xff]  ;;  %v5719_v1 = vld [vmem:[%s8471_s23 + $0xc] sm:$0xf0] }
 0x34a   : > { %2825 = vmatpush.bf16.msra.mxu0 %v5754_v40  ;;  %v5758_v57 = vld [vmem:[%s10032_s1 + $0x48] sm:$0xff]  ;;  %v5757_v61 = vld [vmem:[%s10032_s1 + $0x40] sm:$0xff]  ;;  %v5151_v3 = vld [vmem:[%s8471_s23 + $0x10] sm:$0xf0] }
 0x34b   : > { %2874 = vmatpush.bf16.msra.mxu1 %v5762_v41  ;;  %v5766_v58 = vld [vmem:[%s10032_s1 + $0x88] sm:$0xff]  ;;  %v5765_v62 = vld [vmem:[%s10032_s1 + $0x80] sm:$0xff]  ;;  %v5720_v5 = vld [vmem:[%s8471_s23 + $0x14] sm:$0xf0] }
 0x34c   : > { %2923 = vmatpush.bf16.msra.mxu2 %v5770_v42  ;;  %v5774_v59 = vld [vmem:[%s10032_s1 + $0xc8] sm:$0xff]  ;;  %v5773_v63 = vld [vmem:[%s10032_s1 + $0xc0] sm:$0xff]  ;;  %v5159_v7 = vld [vmem:[%s8471_s23 + $0x18] sm:$0xf0] }
 0x34d   : > { %2972 = vmatpush.bf16.msra.mxu3 %v5778_v43  ;;  %v5149_v0 = vld [vmem:[%s8471_s23] sm:$0xf]  ;;  %v5717_v2 = vld [vmem:[%s8471_s23 + $0x4] sm:$0xf]  ;;  %v5157_v4 = vld [vmem:[%s8471_s23 + $0x8] sm:$0xf] }
 0x34e   : > { %2826 = vmatpush.bf16.msra.mxu0 %v5753_v44  ;;  %v5718_v6 = vld [vmem:[%s8471_s23 + $0xc] sm:$0xf]  ;;  %v5150_v8 = vor.u32 %v5719_v1, %v5149_v0  ;;  %v5154_v9 = vor.u32 %v5717_v2, %v5151_v3  ;;  %v5158_v10 = vor.u32 %v5720_v5, %v5157_v4  ;;  %v5165_v12 = vld [vmem:[%s8471_s23 + $0x20] sm:$0xf]  ;;  %v5723_v13 = vld [vmem:[%s8471_s23 + $0x2c] sm:$0xf0] }
 0x34f   : > { %2875 = vmatpush.bf16.msra.mxu1 %v5761_v45  ;;  %v5162_v11 = vor.u32 %v5718_v6, %v5159_v7  ;;  %v5721_v14 = vld [vmem:[%s8471_s23 + $0x24] sm:$0xf]  ;;  %v5167_v15 = vld [vmem:[%s8471_s23 + $0x30] sm:$0xf0]  ;;  %v5173_v16 = vld [vmem:[%s8471_s23 + $0x28] sm:$0xf]  ;;  %v5166_v20 = vor.u32 %v5723_v13, %v5165_v12 }
 0x350   : > { %2924 = vmatpush.bf16.msra.mxu2 %v5769_v46  ;;  %v5724_v17 = vld [vmem:[%s8471_s23 + $0x34] sm:$0xf0]  ;;  %v5722_v18 = vld [vmem:[%s8471_s23 + $0x2c] sm:$0xf]  ;;  %v5175_v19 = vld [vmem:[%s8471_s23 + $0x38] sm:$0xf0]  ;;  %v5170_v21 = vor.u32 %v5721_v14, %v5167_v15 }
 0x351   : > { %2973 = vmatpush.bf16.msra.mxu3 %v5777_v47  ;;  %v5174_v22 = vor.u32 %v5724_v17, %v5173_v16  ;;  %v5178_v23 = vor.u32 %v5722_v18, %v5175_v19  ;;  %v5181_v24 = vld [vmem:[%s8471_s23 + $0x40] sm:$0xf]  ;;  %v5727_v25 = vld [vmem:[%s8471_s23 + $0x4c] sm:$0xf0]  ;;  %v5725_v26 = vld [vmem:[%s8471_s23 + $0x44] sm:$0xf] }
 0x352   : > { %2827 = vmatpush.bf16.msra.mxu0 %v5752_v48  ;;  %v5183_v27 = vld [vmem:[%s8471_s23 + $0x50] sm:$0xf0]  ;;  %v5189_v28 = vld [vmem:[%s8471_s23 + $0x48] sm:$0xf]  ;;  %v5728_v29 = vld [vmem:[%s8471_s23 + $0x54] sm:$0xf0]  ;;  %v5182_v32 = vor.u32 %v5727_v25, %v5181_v24 }
 0x353   : > { %2876 = vmatpush.bf16.msra.mxu1 %v5760_v49  ;;  %v5726_v30 = vld [vmem:[%s8471_s23 + $0x4c] sm:$0xf]  ;;  %v5191_v31 = vld [vmem:[%s8471_s23 + $0x58] sm:$0xf0]  ;;  %v5186_v33 = vor.u32 %v5725_v26, %v5183_v27  ;;  %v5190_v34 = vor.u32 %v5728_v29, %v5189_v28  ;;  %v5197_v36 = vld [vmem:[%s8471_s23 + $0x60] sm:$0xf] }
 0x354   : > { %2925 = vmatpush.bf16.msra.mxu2 %v5768_v50  ;;  %v5194_v35 = vor.u32 %v5726_v30, %v5191_v31  ;;  %v5731_v37 = vld [vmem:[%s8471_s23 + $0x6c] sm:$0xf0]  ;;  %v5729_v38 = vld [vmem:[%s8471_s23 + $0x64] sm:$0xf]  ;;  %v5199_v39 = vld [vmem:[%s8471_s23 + $0x70] sm:$0xf0] }
 0x355   : > { %2974 = vmatpush.bf16.msra.mxu3 %v5776_v51  ;;  %v5205_v40 = vld [vmem:[%s8471_s23 + $0x68] sm:$0xf]  ;;  %v5732_v41 = vld [vmem:[%s8471_s23 + $0x74] sm:$0xf0]  ;;  %v5730_v42 = vld [vmem:[%s8471_s23 + $0x6c] sm:$0xf]  ;;  %v5198_v44 = vor.u32 %v5731_v37, %v5197_v36  ;;  %v5202_v45 = vor.u32 %v5729_v38, %v5199_v39 }
 0x356   : > { %2828 = vmatpush.bf16.msra.mxu0 %v5751_v52  ;;  %v5207_v43 = vld [vmem:[%s8471_s23 + $0x78] sm:$0xf0]  ;;  %v5206_v46 = vor.u32 %v5732_v41, %v5205_v40  ;;  %v5213_v48 = vld [vmem:[%s8471_s23 + $0x80] sm:$0xf]  ;;  %v5735_v49 = vld [vmem:[%s8471_s23 + $0x8c] sm:$0xf0] }
 0x357   : > { %2877 = vmatpush.bf16.msra.mxu1 %v5759_v53  ;;  %v5210_v47 = vor.u32 %v5730_v42, %v5207_v43  ;;  %v5733_v50 = vld [vmem:[%s8471_s23 + $0x84] sm:$0xf]  ;;  %v5215_v51 = vld [vmem:[%s8471_s23 + $0x90] sm:$0xf0]  ;;  %v5221_v52 = vld [vmem:[%s8471_s23 + $0x88] sm:$0xf] }
 0x358   : > { %2926 = vmatpush.bf16.msra.mxu2 %v5767_v54  ;;  %v5736_v53 = vld [vmem:[%s8471_s23 + $0x94] sm:$0xf0]  ;;  %v5734_v54 = vld [vmem:[%s8471_s23 + $0x8c] sm:$0xf]  ;;  %v5237_v0 = vld [vmem:[%s8471_s23 + $0xa8] sm:$0xf] }
 0x359   : > { %2975 = vmatpush.bf16.msra.mxu3 %v5775_v55  ;;  %v5223_v55 = vld [vmem:[%s8471_s23 + $0x98] sm:$0xf0]  ;;  %v5740_v1 = vld [vmem:[%s8471_s23 + $0xb4] sm:$0xf0]  ;;  %v5738_v2 = vld [vmem:[%s8471_s23 + $0xac] sm:$0xf] }
 0x35a   : > { %2829 = vmatpush.bf16.msra.mxu0 %v5750_v56  ;;  %v5214_v56 = vor.u32 %v5735_v49, %v5213_v48  ;;  %v5239_v3 = vld [vmem:[%s8471_s23 + $0xb8] sm:$0xf0]  ;;  %v5238_v6 = vor.u32 %v5740_v1, %v5237_v0  ;;  %v5253_v12 = vld [vmem:[%s8471_s23 + $0xc8] sm:$0xf]  ;;  %v5744_v13 = vld [vmem:[%s8471_s23 + $0xd4] sm:$0xf0] }
 0x35b   : > { %2878 = vmatpush.bf16.msra.mxu1 %v5758_v57  ;;  %v5218_v57 = vor.u32 %v5733_v50, %v5215_v51  ;;  %v5242_v7 = vor.u32 %v5738_v2, %v5239_v3  ;;  %v5742_v14 = vld [vmem:[%s8471_s23 + $0xcc] sm:$0xf]  ;;  %v5255_v15 = vld [vmem:[%s8471_s23 + $0xd8] sm:$0xf0]  ;;  %v5254_v18 = vor.u32 %v5744_v13, %v5253_v12  ;;  %v5269_v24 = vld [vmem:[%s8471_s23 + $0xe8] sm:$0xf] }
 0x35c   : > { %2927 = vmatpush.bf16.msra.mxu2 %v5766_v58  ;;  %v5222_v58 = vor.u32 %v5736_v53, %v5221_v52  ;;  %v5258_v19 = vor.u32 %v5742_v14, %v5255_v15  ;;  %v5748_v25 = vld [vmem:[%s8471_s23 + $0xf4] sm:$0xf0]  ;;  %v5746_v26 = vld [vmem:[%s8471_s23 + $0xec] sm:$0xf]  ;;  %v5271_v27 = vld [vmem:[%s8471_s23 + $0xf8] sm:$0xf0] }
 0x35d   : > { %2976 = vmatpush.bf16.msra.mxu3 %v5774_v59  ;;  %v5226_v59 = vor.u32 %v5734_v54, %v5223_v55  ;;  %v5270_v30 = vor.u32 %v5748_v25, %v5269_v24  ;;  %v5274_v31 = vor.u32 %v5746_v26, %v5271_v27 }
 0x35e   : > { %2830 = vmatpush.bf16.msra.mxu0 %v5749_v60  ;;  %v5229_v60 = vld [vmem:[%s8471_s23 + $0xa0] sm:$0xf] }
 0x35f   : > { %2879 = vmatpush.bf16.msra.mxu1 %v5757_v61  ;;  %v5739_v61 = vld [vmem:[%s8471_s23 + $0xac] sm:$0xf0] }
 0x360   : > { %2928 = vmatpush.bf16.msra.mxu2 %v5765_v62  ;;  %v5737_v62 = vld [vmem:[%s8471_s23 + $0xa4] sm:$0xf]  ;;  %v5230_v4 = vor.u32 %v5739_v61, %v5229_v60 }
 0x361   : > { %2977 = vmatpush.bf16.msra.mxu3 %v5773_v63  ;;  %2831 = vmatmul.bf16.vlgmr.msra.gmra.mxu0 %v5150_v8  ;;  %v5231_v63 = vld [vmem:[%s8471_s23 + $0xb0] sm:$0xf0]  ;;  %v5245_v8 = vld [vmem:[%s8471_s23 + $0xc0] sm:$0xf] }
 0x362   : > { %2880 = vmatmul.bf16.vlgmr.msra.gmra.mxu1 %v5154_v9  ;;  %v5234_v5 = vor.u32 %v5737_v62, %v5231_v63  ;;  %v5743_v9 = vld [vmem:[%s8471_s23 + $0xcc] sm:$0xf0] }
 0x363   : > { %2929 = vmatmul.bf16.vlgmr.msra.gmra.mxu2 %v5158_v10  ;;  %v5741_v10 = vld [vmem:[%s8471_s23 + $0xc4] sm:$0xf]  ;;  %v5246_v16 = vor.u32 %v5743_v9, %v5245_v8 }
 0x364   : > { %2978 = vmatmul.bf16.vlgmr.msra.gmra.mxu3 %v5162_v11  ;;  %v5247_v11 = vld [vmem:[%s8471_s23 + $0xd0] sm:$0xf0] }
 0x365   : > { %v5250_v17 = vor.u32 %v5741_v10, %v5247_v11 }
 0x371   : > { %2836 = vmatmul.bf16.gmra.mxu0 %v5166_v20  ;;  %v5261_v20 = vld [vmem:[%s8471_s23 + $0xe0] sm:$0xf] }
 0x372   : > { %2885 = vmatmul.bf16.gmra.mxu1 %v5170_v21  ;;  %v5747_v21 = vld [vmem:[%s8471_s23 + $0xec] sm:$0xf0] }
 0x373   : > { %2934 = vmatmul.bf16.gmra.mxu2 %v5174_v22  ;;  %v5745_v22 = vld [vmem:[%s8471_s23 + $0xe4] sm:$0xf]  ;;  %v5262_v28 = vor.u32 %v5747_v21, %v5261_v20 }
 0x374   : > { %2983 = vmatmul.bf16.gmra.mxu3 %v5178_v23  ;;  %v5263_v23 = vld [vmem:[%s8471_s23 + $0xf0] sm:$0xf0] }
 0x375   : > { %v5266_v29 = vor.u32 %v5745_v22, %v5263_v23 }
 0x381   : > { %2841 = vmatmul.bf16.gmra.mxu0 %v5182_v32 }
 0x382   : > { %2890 = vmatmul.bf16.gmra.mxu1 %v5186_v33 }
 0x383   : > { %2939 = vmatmul.bf16.gmra.mxu2 %v5190_v34 }
 0x384   : > { %2988 = vmatmul.bf16.gmra.mxu3 %v5194_v35 }
 0x391   : > { %2846 = vmatmul.bf16.gmra.mxu0 %v5198_v44 }
 0x392   : > { %2895 = vmatmul.bf16.gmra.mxu1 %v5202_v45 }
 0x393   : > { %2944 = vmatmul.bf16.gmra.mxu2 %v5206_v46 }
 0x394   : > { %2993 = vmatmul.bf16.gmra.mxu3 %v5210_v47 }
 0x3a1   : > { %2851 = vmatmul.bf16.gmra.mxu0 %v5214_v56 }
 0x3a2   : > { %2900 = vmatmul.bf16.gmra.mxu1 %v5218_v57 }
 0x3a3   : > { %2949 = vmatmul.bf16.gmra.mxu2 %v5222_v58 }
 0x3a4   : > { %2998 = vmatmul.bf16.gmra.mxu3 %v5226_v59 }
 0x3b1   : > { %2856 = vmatmul.bf16.gmra.mxu0 %v5230_v4 }
 0x3b2   : > { %2905 = vmatmul.bf16.gmra.mxu1 %v5234_v5 }
 0x3b3   : > { %2954 = vmatmul.bf16.gmra.mxu2 %v5238_v6 }
 0x3b4   : > { %3003 = vmatmul.bf16.gmra.mxu3 %v5242_v7 }
 0x3c1   : > { %2861 = vmatmul.bf16.gmra.mxu0 %v5246_v16 }
 0x3c2   : > { %2910 = vmatmul.bf16.gmra.mxu1 %v5250_v17 }
 0x3c3   : > { %2959 = vmatmul.bf16.gmra.mxu2 %v5254_v18 }
 0x3c4   : > { %3008 = vmatmul.bf16.gmra.mxu3 %v5258_v19 }
 0x3d1   : > { %2866 = vmatmul.bf16.gmra.mxu0 %v5262_v28 }
 0x3d2   : > { %2915 = vmatmul.bf16.gmra.mxu1 %v5266_v29 }
 0x3d3   : > { %2964 = vmatmul.bf16.gmra.mxu2 %v5270_v30 }
 0x3d4   : > { %3013 = vmatmul.bf16.gmra.mxu3 %v5274_v31 }
 0x3de   : > { %v2832_v32 = vpop.f32.mrf.mxu0 }
 0x3df   : > { %v2881_v33 = vpop.f32.mrf.mxu1 }
 0x3e0   : > { %v2882_v34 = vadd.f32 %v2881_v33, %v2832_v32 }
 0x3e6   : > { %v2930_v35 = vpop.f32.mrf.mxu2  ;;  %v2834_v38 = vpop.f32.mrf.mxu0 }
 0x3e7   : > { %v2979_v36 = vpop.f32.mrf.mxu3  ;;  %v2931_v37 = vadd.f32 %v2930_v35, %v2882_v34  ;;  %v2883_v39 = vpop.f32.mrf.mxu1 }
 0x3e8   : > { %v2884_v40 = vadd.f32 %v2883_v39, %v2834_v38 }
 0x3e9   : > { %v2980_v41 = vadd.f32 %v2979_v36, %v2931_v37 }
 0x3eb   : > { %v3019_v49 = vmul.f32 0.044194173, %v2980_v41 }
 0x3ee   : > { %v2932_v42 = vpop.f32.mrf.mxu2  ;;  %v2837_v45 = vpop.f32.mrf.mxu0 }
 0x3ef   : > { %v2981_v43 = vpop.f32.mrf.mxu3  ;;  %v2933_v44 = vadd.f32 %v2932_v42, %v2884_v40  ;;  %v2886_v46 = vpop.f32.mrf.mxu1 }
 0x3f0   : > { %v2887_v47 = vadd.f32 %v2886_v46, %v2837_v45 }
 0x3f1   : > { %v2982_v48 = vadd.f32 %v2981_v43, %v2933_v44 }
 0x3f3   : > { %v3020_v50 = vmul.f32 0.044194173, %v2982_v48 }
 0x3f5   : > { %v8555_v51 = vpack.c.bf16 %v3020_v50, %v3019_v49 }
 0x3f6   : > { %v2935_v52 = vpop.f32.mrf.mxu2  ;;  %v2839_v55 = vpop.f32.mrf.mxu0 }
 0x3f7   : > { %10057 = vst [vmem:[#allocation7_spill] sm:$0xff] %v8555_v51  ;;  %v2984_v53 = vpop.f32.mrf.mxu3  ;;  %v2936_v54 = vadd.f32 %v2935_v52, %v2887_v47  ;;  %v2888_v56 = vpop.f32.mrf.mxu1 }
 0x3f8   : > { %v2889_v57 = vadd.f32 %v2888_v56, %v2839_v55 }
 0x3f9   : > { %v2985_v58 = vadd.f32 %v2984_v53, %v2936_v54 }
 0x3fb   : > { %v3021_v2 = vmul.f32 0.044194173, %v2985_v58 }
 0x3fe   : > { %v2937_v59 = vpop.f32.mrf.mxu2  ;;  %v2842_v62 = vpop.f32.mrf.mxu0 }
 0x3ff   : > { %v2986_v60 = vpop.f32.mrf.mxu3  ;;  %v2938_v61 = vadd.f32 %v2937_v59, %v2889_v57  ;;  %v2891_v63 = vpop.f32.mrf.mxu1 }
 0x400   : > { %v2892_v0 = vadd.f32 %v2891_v63, %v2842_v62 }
 0x401   : > { %v2987_v1 = vadd.f32 %v2986_v60, %v2938_v61 }
 0x403   : > { %v3022_v3 = vmul.f32 0.044194173, %v2987_v1 }
 0x405   : > { %v8557_v4 = vpack.c.bf16 %v3022_v3, %v3021_v2 }
 0x406   : > { %v2940_v5 = vpop.f32.mrf.mxu2  ;;  %v2844_v8 = vpop.f32.mrf.mxu0 }
 0x407   : > { %10058 = vst [vmem:[#allocation8_spill] sm:$0xff] %v8557_v4  ;;  %v2989_v6 = vpop.f32.mrf.mxu3  ;;  %v2941_v7 = vadd.f32 %v2940_v5, %v2892_v0  ;;  %v2893_v9 = vpop.f32.mrf.mxu1 }
 0x408   : > { %v2894_v10 = vadd.f32 %v2893_v9, %v2844_v8 }
 0x409   : > { %v2990_v11 = vadd.f32 %v2989_v6, %v2941_v7 }
 0x40b   : > { %v3023_v19 = vmul.f32 0.044194173, %v2990_v11 }
 0x40e   : > { %v2942_v12 = vpop.f32.mrf.mxu2  ;;  %v2847_v15 = vpop.f32.mrf.mxu0 }
 0x40f   : > { %v2991_v13 = vpop.f32.mrf.mxu3  ;;  %v2943_v14 = vadd.f32 %v2942_v12, %v2894_v10  ;;  %v2896_v16 = vpop.f32.mrf.mxu1 }
 0x410   : > { %v2897_v17 = vadd.f32 %v2896_v16, %v2847_v15 }
 0x411   : > { %v2992_v18 = vadd.f32 %v2991_v13, %v2943_v14 }
 0x413   : > { %v3024_v20 = vmul.f32 0.044194173, %v2992_v18 }
 0x415   : > { %v8559_v21 = vpack.c.bf16 %v3024_v20, %v3023_v19 }
 0x416   : > { %v2945_v22 = vpop.f32.mrf.mxu2  ;;  %v2849_v25 = vpop.f32.mrf.mxu0 }
 0x417   : > { %10059 = vst [vmem:[#allocation9_spill] sm:$0xff] %v8559_v21  ;;  %v2994_v23 = vpop.f32.mrf.mxu3  ;;  %v2946_v24 = vadd.f32 %v2945_v22, %v2897_v17  ;;  %v2898_v26 = vpop.f32.mrf.mxu1 }
 0x418   : > { %v2899_v27 = vadd.f32 %v2898_v26, %v2849_v25 }
 0x419   : > { %v2995_v28 = vadd.f32 %v2994_v23, %v2946_v24 }
 0x41b   : > { %v3025_v35 = vmul.f32 0.044194173, %v2995_v28 }
 0x41e   : > { %v2947_v29 = vpop.f32.mrf.mxu2  ;;  %v2852_v32 = vpop.f32.mrf.mxu0 }
 0x41f   : > { %v2996_v30 = vpop.f32.mrf.mxu3  ;;  %v2948_v31 = vadd.f32 %v2947_v29, %v2899_v27  ;;  %v2901_v33 = vpop.f32.mrf.mxu1 }
 0x420   : > { %v2902_v40 = vadd.f32 %v2901_v33, %v2852_v32 }
 0x421   : > { %v2997_v34 = vadd.f32 %v2996_v30, %v2948_v31 }
 0x423   : > { %v3026_v36 = vmul.f32 0.044194173, %v2997_v34 }
 0x425   : > { %v8561_v37 = vpack.c.bf16 %v3026_v36, %v3025_v35 }
 0x426   : > { %v2950_v38 = vpop.f32.mrf.mxu2  ;;  %v2854_v41 = vpop.f32.mrf.mxu0 }
 0x427   : > { %10060 = vst [vmem:[#allocation10_spill] sm:$0xff] %v8561_v37  ;;  %v2999_v39 = vpop.f32.mrf.mxu3  ;;  %v2903_v42 = vpop.f32.mrf.mxu1  ;;  %v2951_v43 = vadd.f32 %v2950_v38, %v2902_v40 }
 0x428   : > { %v2904_v44 = vadd.f32 %v2903_v42, %v2854_v41 }
 0x429   : > { %v3000_v47 = vadd.f32 %v2999_v39, %v2951_v43 }
 0x42b   : > { %v3027_v53 = vmul.f32 0.044194173, %v3000_v47  ;;  %v8578_v47 = vmov 0.0  }
 0x42e   : > { %v2952_v45 = vpop.f32.mrf.mxu2  ;;  %v2857_v49 = vpop.f32.mrf.mxu0 }
 0x42f   : > { %v3001_v46 = vpop.f32.mrf.mxu3  ;;  %v2953_v48 = vadd.f32 %v2952_v45, %v2904_v44  ;;  %v2906_v50 = vpop.f32.mrf.mxu1  ;;  %v8572_v44 = vmov 0.0   ;;  %v8574_v45 = vmov 0.0  }
 0x430   : > { %v2907_v58 = vadd.f32 %v2906_v50, %v2857_v49  ;;  %v8582_v49 = vmov 0.0   ;;  %v8584_v50 = vmov 0.0  }
 0x431   : > { %v3002_v52 = vadd.f32 %v3001_v46, %v2953_v48  ;;  %v8576_v46 = vmov 0.0   ;;  %v8580_v48 = vmov 0.0  }
 0x433   : > { %v3028_v54 = vmul.f32 0.044194173, %v3002_v52  ;;  %v8586_v52 = vmov 0.0  }
 0x434   : > { %10065 = vst [vmem:[#allocation15_spill] sm:$0xff] %v8586_v52 }
 0x435   : > { %v8563_v55 = vpack.c.bf16 %v3028_v54, %v3027_v53  ;;  %v8588_v53 = vmov 0.0   ;;  %v8590_v54 = vmov 0.0  }
 0x436   : > { %v2955_v56 = vpop.f32.mrf.mxu2  ;;  %v2859_v59 = vpop.f32.mrf.mxu0  ;;  %10066 = vst [vmem:[#allocation16_spill] sm:$0xff] %v8590_v54 }
 0x437   : > { %10061 = vst [vmem:[#allocation11_spill] sm:$0xff] %v8563_v55  ;;  %v3004_v57 = vpop.f32.mrf.mxu3  ;;  %v2908_v60 = vpop.f32.mrf.mxu1  ;;  %v2956_v61 = vadd.f32 %v2955_v56, %v2907_v58  ;;  %v8592_v56 = vmov 0.0   ;;  %v8596_v58 = vmov 0.0  }
 0x438   : > { %v2909_v62 = vadd.f32 %v2908_v60, %v2859_v59  ;;  %10067 = vst [vmem:[#allocation17_spill] sm:$0xff] %v8592_v56  ;;  %v8598_v59 = vmov 0.0   ;;  %v8600_v60 = vmov 0.0  }
 0x439   : > { %v3005_v1 = vadd.f32 %v3004_v57, %v2956_v61  ;;  %v8594_v57 = vmov 0.0   ;;  %v8602_v61 = vmov 0.0  }
 0x43b   : > { %v3029_v7 = vmul.f32 0.044194173, %v3005_v1  ;;  %v8610_v1 = vmov 0.0  }
 0x43e   : > { %v2957_v63 = vpop.f32.mrf.mxu2  ;;  %v2862_v3 = vpop.f32.mrf.mxu0 }
 0x43f   : > { %v3006_v0 = vpop.f32.mrf.mxu3  ;;  %v2958_v2 = vadd.f32 %v2957_v63, %v2909_v62  ;;  %v2911_v5 = vpop.f32.mrf.mxu1  ;;  %v8604_v62 = vmov 0.0   ;;  %v8606_v63 = vmov 0.0  }
 0x440   : > { %v2912_v12 = vadd.f32 %v2911_v5, %v2862_v3  ;;  %v8614_v3 = vmov 0.0   ;;  %v8616_v5 = vmov 0.0  }
 0x441   : > { %v3007_v6 = vadd.f32 %v3006_v0, %v2958_v2  ;;  %v8608_v0 = vmov 0.0   ;;  %v8612_v2 = vmov 0.0  }
 0x443   : > { %v3030_v8 = vmul.f32 0.044194173, %v3007_v6  ;;  %v8618_v6 = vmov 0.0  }
 0x445   : > { %v8565_v9 = vpack.c.bf16 %v3030_v8, %v3029_v7  ;;  %v8620_v7 = vmov 0.0   ;;  %v8622_v8 = vmov 0.0  }
 0x446   : > { %v2960_v10 = vpop.f32.mrf.mxu2  ;;  %v2864_v13 = vpop.f32.mrf.mxu0 }
 0x447   : > { %10062 = vst [vmem:[#allocation12_spill] sm:$0xff] %v8565_v9  ;;  %v3009_v11 = vpop.f32.mrf.mxu3  ;;  %v2913_v14 = vpop.f32.mrf.mxu1  ;;  %v2961_v15 = vadd.f32 %v2960_v10, %v2912_v12  ;;  %v8624_v10 = vmov 0.0   ;;  %v8628_v12 = vmov 0.0  }
 0x448   : > { %v2914_v16 = vadd.f32 %v2913_v14, %v2864_v13  ;;  %v8630_v13 = vmov 0.0   ;;  %v8632_v14 = vmov 0.0  }
 0x449   : > { %v3010_v19 = vadd.f32 %v3009_v11, %v2961_v15  ;;  %v8626_v11 = vmov 0.0   ;;  %v8634_v15 = vmov 0.0  }
 0x44b   : > { %v3031_v25 = vmul.f32 0.044194173, %v3010_v19  ;;  %v8642_v19 = vmov -inf  }
 0x44e   : > { %v2962_v17 = vpop.f32.mrf.mxu2  ;;  %v2867_v22 = vpop.f32.mrf.mxu0 }
 0x44f   : > { %v3011_v18 = vpop.f32.mrf.mxu3  ;;  %v2963_v20 = vadd.f32 %v2962_v17, %v2914_v16  ;;  %v2916_v23 = vpop.f32.mrf.mxu1  ;;  %v8636_v16 = vmov -inf   ;;  %v8638_v17 = vmov -inf  }
 0x450   : > { %v2917_v30 = vadd.f32 %v2916_v23, %v2867_v22  ;;  %v8646_v22 = vmov -inf   ;;  %v8648_v23 = vmov -inf  }
 0x451   : > { %v3012_v24 = vadd.f32 %v3011_v18, %v2963_v20  ;;  %v8640_v18 = vmov -inf   ;;  %v8644_v20 = vmov -inf  }
 0x453   : > { %v3032_v26 = vmul.f32 0.044194173, %v3012_v24  ;;  %v8650_v24 = vmov -inf  }
 0x455   : > { %v8567_v27 = vpack.c.bf16 %v3032_v26, %v3031_v25  ;;  %v8652_v25 = vmov -inf   ;;  %v8654_v26 = vmov -inf  }
 0x456   : > { %v2965_v28 = vpop.f32.mrf.mxu2  ;;  %v2869_v31 = vpop.f32.mrf.mxu0 }
 0x457   : > { %10063 = vst [vmem:[#allocation13_spill] sm:$0xff] %v8567_v27  ;;  %v3014_v29 = vpop.f32.mrf.mxu3  ;;  %v2918_v32 = vpop.f32.mrf.mxu1  ;;  %v2966_v33 = vadd.f32 %v2965_v28, %v2917_v30  ;;  %v8656_v28 = vmov -inf   ;;  %v8660_v30 = vmov -inf  }
 0x458   : > { %v2919_v34 = vadd.f32 %v2918_v32, %v2869_v31  ;;  %v8662_v31 = vmov -inf   ;;  %v8664_v32 = vmov -inf  }
 0x459   : > { %v3015_v36 = vadd.f32 %v3014_v29, %v2966_v33  ;;  %v8658_v29 = vmov -inf   ;;  %v8666_v33 = vmov -inf  }
 0x45b   : > { %v3033_v41 = vmul.f32 0.044194173, %v3015_v36 }
 0x45e   : > { %v2967_v35 = vpop.f32.mrf.mxu2 }
 0x45f   : > { %v2968_v38 = vadd.f32 %v2967_v35, %v2919_v34  ;;  %v3016_v39 = vpop.f32.mrf.mxu3 }
 0x461   : > { %v3017_v40 = vadd.f32 %v3016_v39, %v2968_v38 }
 0x463   : > { %v3034_v42 = vmul.f32 0.044194173, %v3017_v40  ;;  %4357 = sbr.rel (%p5403_p3) target bundleno = 1690 (0x69a), region = 82 }
 0x465   : > { %v8569_v43 = vpack.c.bf16 %v3034_v42, %v3033_v41 }
 0x467   : > { %10064 = vst [vmem:[#allocation14_spill] sm:$0xff] %v8569_v43 }
 0x468   : > { %v8670_v34 = vmov 0.0   ;;  %v8672_v35 = vmov 0.0   ;;  %v8674_v36 = vmov 0.0   ;;  %v8676_v38 = vmov 0.0   ;;  %s8766_s16 = smov 0  }
 0x469   : > { %v8678_v39 = vmov 0.0   ;;  %v8680_v40 = vmov 0.0   ;;  %v8682_v41 = vmov 0.0   ;;  %v8684_v42 = vmov 0.0  }
 0x46a   : > { %v8686_v43 = vmov 0.0   ;;  %v8688_v27 = vmov 0.0   ;;  %v8690_v44 = vmov 0.0   ;;  %v8692_v45 = vmov 0.0  }
 0x46b   : > { %v8694_v46 = vmov 0.0   ;;  %v8696_v47 = vmov 0.0   ;;  %v8698_v48 = vmov 0.0   ;;  %v8700_v49 = vmov 0.0  }
 0x46c   : > { %v8702_v50 = vmov 0.0   ;;  %v8704_v52 = vmov 0.0   ;;  %v8706_v53 = vmov 0.0   ;;  %v8708_v54 = vmov 0.0  }
 0x46d   : > { %10068 = vst [vmem:[#allocation15_spill] sm:$0xff] %v8704_v52  ;;  %v8710_v56 = vmov 0.0   ;;  %v8712_v57 = vmov 0.0   ;;  %v8714_v58 = vmov 0.0   ;;  %v8716_v59 = vmov 0.0  }
 0x46e   : > { %10069 = vst [vmem:[#allocation16_spill] sm:$0xff] %v8708_v54  ;;  %v8718_v60 = vmov 0.0   ;;  %v8720_v61 = vmov 0.0   ;;  %v8722_v62 = vmov 0.0   ;;  %v8724_v63 = vmov 0.0  }
 0x46f   : > { %10070 = vst [vmem:[#allocation17_spill] sm:$0xff] %v8710_v56  ;;  %v8726_v0 = vmov 0.0   ;;  %v8728_v1 = vmov 0.0   ;;  %v8730_v2 = vmov 0.0   ;;  %v8732_v3 = vmov 0.0  }
 0x470   : > { %v8734_v5 = vmov -inf   ;;  %v8736_v6 = vmov -inf   ;;  %v8738_v7 = vmov -inf   ;;  %v8740_v8 = vmov -inf  }
 0x471   : > { %v8742_v10 = vmov -inf   ;;  %v8744_v11 = vmov -inf   ;;  %v8746_v12 = vmov -inf   ;;  %v8748_v13 = vmov -inf  }
 0x472   : > { %v8750_v14 = vmov -inf   ;;  %v8752_v15 = vmov -inf   ;;  %v8754_v16 = vmov -inf   ;;  %v8756_v17 = vmov -inf  }
 0x473   : > { %v8758_v18 = vmov -inf   ;;  %v8760_v19 = vmov -inf   ;;  %v8762_v20 = vmov -inf   ;;  %v8764_v22 = vmov -inf  }
 0x474 LB: >> { %10074 = vst [vmem:[#allocation18_spill] sm:$0xff] %v7343_v34  ;;  %v10084_v52 = vld [vmem:[#allocation15_spill] sm:$0xff]  ;;  %s5404_s12 = sshll.u32 %s7535_s16, 7  ;;  %vm3176_vm1 = vcmask 523264   ;;  %v10095_v37 = vld [vmem:[#allocation10_spill] sm:$0xff]  ;;  %v10096_v4 = vld [vmem:[#allocation8_spill] sm:$0xff]  ;;  %s7535_s16 = sphi %s8766_s16, %s10247_s16   ;;  %v7531_v22 = vphi %v8764_v22, %v10246_v22   ;;  %v7527_v20 = vphi %v8762_v20, %v10245_v20   ;;  %v7523_v19 = vphi %v8760_v19, %v10244_v19   ;;  %v7519_v18 = vphi %v8758_v18, %v10243_v18   ;;  %v7515_v17 = vphi %v8756_v17, %v10242_v17   ;;  %v7511_v16 = vphi %v8754_v16, %v10241_v16   ;;  %v7507_v15 = vphi %v8752_v15, %v10240_v15   ;;  %v7503_v14 = vphi %v8750_v14, %v10239_v14   ;;  %v7499_v13 = vphi %v8748_v13, %v10238_v13   ;;  %v7495_v12 = vphi %v8746_v12, %v10237_v12   ;;  %v7491_v11 = vphi %v8744_v11, %v10236_v11   ;;  %v7487_v10 = vphi %v8742_v10, %v10235_v10   ;;  %v7483_v8 = vphi %v8740_v8, %v10234_v8   ;;  %v7479_v7 = vphi %v8738_v7, %v10233_v7   ;;  %v7475_v6 = vphi %v8736_v6, %v10232_v6   ;;  %v7471_v5 = vphi %v8734_v5, %v10231_v5   ;;  %v7467_v3 = vphi %v8732_v3, %v10230_v3   ;;  %v7463_v2 = vphi %v8730_v2, %v10229_v2   ;;  %v7459_v1 = vphi %v8728_v1, %v10228_v1   ;;  %v7455_v0 = vphi %v8726_v0, %v10227_v0   ;;  %v7451_v63 = vphi %v8724_v63, %v10226_v63   ;;  %v7447_v62 = vphi %v8722_v62, %v10225_v62   ;;  %v7443_v61 = vphi %v8720_v61, %v10224_v61   ;;  %v7439_v60 = vphi %v8718_v60, %v10223_v60   ;;  %v7435_v59 = vphi %v8716_v59, %v10222_v59   ;;  %v7431_v58 = vphi %v8714_v58, %v10221_v58   ;;  %v7427_v57 = vphi %v8712_v57, %v10220_v57   ;;  %v7415_v53 = vphi %v8706_v53, %v10215_v53   ;;  %v7407_v50 = vphi %v8702_v50, %v10213_v50   ;;  %v7403_v49 = vphi %v8700_v49, %v10212_v49   ;;  %v7399_v48 = vphi %v8698_v48, %v10211_v48   ;;  %v7395_v47 = vphi %v8696_v47, %v10210_v47   ;;  %v7391_v46 = vphi %v8694_v46, %v10209_v46   ;;  %v7387_v45 = vphi %v8692_v45, %v10208_v45   ;;  %v7383_v44 = vphi %v8690_v44, %v10207_v44   ;;  %v7379_v27 = vphi %v8688_v27, %v10206_v27   ;;  %v7375_v43 = vphi %v8686_v43, %v10205_v43   ;;  %v7371_v42 = vphi %v8684_v42, %v10204_v42   ;;  %v7367_v41 = vphi %v8682_v41, %v10203_v41   ;;  %v7363_v40 = vphi %v8680_v40, %v10202_v40   ;;  %v7359_v39 = vphi %v8678_v39, %v10201_v39   ;;  %v7355_v38 = vphi %v8676_v38, %v10200_v38   ;;  %v7351_v36 = vphi %v8674_v36, %v10199_v36   ;;  %v7347_v35 = vphi %v8672_v35, %v10198_v35   ;;  %v7343_v34 = vphi %v8670_v34, %v10197_v34  }
 0x475   : >> { %10075 = vst [vmem:[#allocation19_spill] sm:$0xff] %v7347_v35  ;;  %v10087_v54 = vld [vmem:[#allocation16_spill] sm:$0xff]  ;;  %s8916_s20 = sshra.s32 %s5404_s12, 3  ;;  %v10094_v51 = vld [vmem:[#allocation7_spill] sm:$0xff]  ;;  %v10098_v21 = vld [vmem:[#allocation9_spill] sm:$0xff]  ;;  %s3046_s29 = sadd.s32 1, %s7535_s16  }
 0x476   : >> { %10076 = vst [vmem:[#allocation20_spill] sm:$0xff] %v7351_v36  ;;  %v10089_v56 = vld [vmem:[#allocation17_spill] sm:$0xff]  ;;  %s5405_s23 = sshll.u32 %s8916_s20, 2  ;;  %v10097_v55 = vld [vmem:[#allocation11_spill] sm:$0xff]  ;;  %v10099_v9 = vld [vmem:[#allocation12_spill] sm:$0xff]  ;;  %p9263_p4 = scmp.ge.s32.totalorder %s3046_s29, %s7323_s15 }
 0x477   : >> { %10077 = vst [vmem:[#allocation21_spill] sm:$0xff] %v7355_v38  ;;  %s3101_s26 = scalar_lea.vmem [#allocation2], %s5405_s23  ;;  %s8976_s27 = scalar_lea.vmem [#allocation3], %s5405_s23 }
 0x478   : >> { %10078 = vst [vmem:[#allocation22_spill] sm:$0xff] %v7359_v39  ;;  %v5788_v23 = vld [vmem:[%s3101_s26 + $0x38] sm:$0xff]  ;;  %v5787_v25 = vld [vmem:[%s3101_s26 + $0x30] sm:$0xff]  ;;  %v5786_v28 = vld [vmem:[%s3101_s26 + $0x28] sm:$0xff]  ;;  %s10247_s16 = smov %s3046_s29 }
 0x479   : >> { %10079 = vst [vmem:[#allocation23_spill] sm:$0xff] %v7367_v41  ;;  %v3223_v24 = vsel %vm3176_vm1, %v5788_v23, 0  ;;  %v3220_v26 = vsel %vm3176_vm1, %v5787_v25, 0  ;;  %v3217_v29 = vsel %vm3176_vm1, %v5786_v28, 0  ;;  %v5785_v30 = vld [vmem:[%s3101_s26 + $0x20] sm:$0xff]  ;;  %v5784_v32 = vld [vmem:[%s3101_s26 + $0x18] sm:$0xff] }
 0x47a   : >> { %10080 = vst [vmem:[#allocation24_spill] sm:$0xff] %v7371_v42  ;;  %3225 = vmatpush.bf16.xpose.msra.mxu0 %v3223_v24  ;;  %5813 = vmatpush.bf16.xpose.msra.mxu2 %v3223_v24  ;;  %v3214_v31 = vsel %vm3176_vm1, %v5785_v30, 0  ;;  %v3211_v33 = vsel %vm3176_vm1, %v5784_v32, 0  ;;  %v5783_v23 = vld [vmem:[%s3101_s26 + $0x10] sm:$0xff]  ;;  %v5782_v25 = vld [vmem:[%s3101_s26 + $0x8] sm:$0xff]  ;;  %v5781_v28 = vld [vmem:[%s3101_s26] sm:$0xff] }
 0x47b   : >> { %10081 = vst [vmem:[#allocation25_spill] sm:$0xff] %v7375_v43  ;;  %v3208_v24 = vsel %vm3176_vm1, %v5783_v23, 0  ;;  %v10100_v30 = vld [vmem:[#allocation13_spill] sm:$0xff]  ;;  %v5793_v41 = vld [vmem:[%s8976_s27 + $0x20] sm:$0xff]  ;;  %v5792_v35 = vld [vmem:[%s8976_s27 + $0x18] sm:$0xff] }
 0x47c   : >> { %10082 = vst [vmem:[#allocation26_spill] sm:$0xff] %v7379_v27  ;;  %v5789_v42 = vld [vmem:[%s8976_s27] sm:$0xff] }
 0x47d   : >> { %10083 = vst [vmem:[#allocation27_spill] sm:$0xff] %v7407_v50  ;;  %v5791_v50 = vld [vmem:[%s8976_s27 + $0x10] sm:$0xff] }
 0x47e   : >> { %10085 = vst [vmem:[#allocation15_spill] sm:$0xff] %v10084_v52  ;;  %v5790_v52 = vld [vmem:[%s8976_s27 + $0x8] sm:$0xff] }
 0x47f   : >> { %10086 = vst [vmem:[#allocation28_spill] sm:$0xff] %v7415_v53 }
 0x480   : >> { %10088 = vst [vmem:[#allocation16_spill] sm:$0xff] %v10087_v54 }
 0x481   : >> { %10090 = vst [vmem:[#allocation17_spill] sm:$0xff] %v10089_v56 }
 0x482   : >> { %10091 = vst [vmem:[#allocation29_spill] sm:$0xff] %v7427_v57  ;;  %3226 = vmatpush.bf16.xpose.msra.mxu0 %v3220_v26  ;;  %5814 = vmatpush.bf16.xpose.msra.mxu2 %v3220_v26  ;;  %v3205_v26 = vsel %vm3176_vm1, %v5782_v25, 0 }
 0x483   : >> { %10092 = vst [vmem:[#allocation30_spill] sm:$0xff] %v7431_v58 }
 0x484   : >> { %10093 = vst [vmem:[#allocation31_spill] sm:$0xff] %v7447_v62 }
 0x48a   : >> { %3227 = vmatpush.bf16.xpose.msra.mxu0 %v3217_v29  ;;  %5815 = vmatpush.bf16.xpose.msra.mxu2 %v3217_v29  ;;  %v3202_v29 = vsel %vm3176_vm1, %v5781_v28, 0 }
 0x492   : >> { %3228 = vmatpush.bf16.xpose.msra.mxu0 %v3214_v31  ;;  %5816 = vmatpush.bf16.xpose.msra.mxu2 %v3214_v31  ;;  %v10101_v31 = vld [vmem:[#allocation14_spill] sm:$0xff] }
 0x49a   : >> { %3229 = vmatpush.bf16.xpose.msra.mxu0 %v3211_v33  ;;  %5817 = vmatpush.bf16.xpose.msra.mxu2 %v3211_v33 }
 0x4a2   : >> { %3230 = vmatpush.bf16.xpose.msra.mxu0 %v3208_v24  ;;  %5818 = vmatpush.bf16.xpose.msra.mxu2 %v3208_v24 }
 0x4aa   : >> { %3231 = vmatpush.bf16.xpose.msra.mxu0 %v3205_v26  ;;  %5819 = vmatpush.bf16.xpose.msra.mxu2 %v3205_v26 }
 0x4b2   : >> { %3232 = vmatpush.bf16.xpose.msra.mxu0 %v3202_v29  ;;  %5820 = vmatpush.bf16.xpose.msra.mxu2 %v3202_v29 }
 0x4b9   : >> { %5439 = vmatmul.msk.bf16.vlgmr.msra.gmra.mxu0 %vm3176_vm1, %v10094_v51  ;;  %5442 = vmatmul.msk.bf16.vlgmr.msra.gmra.mxu2 %vm3176_vm1, %v10095_v37 }
 0x4c9   : >> { %5440 = vmatmul.msk.bf16.gmra.mxu0 %vm3176_vm1, %v10096_v4  ;;  %5443 = vmatmul.msk.bf16.gmra.mxu2 %vm3176_vm1, %v10097_v55  ;;  %v5796_v55 = vld [vmem:[%s8976_s27 + $0x38] sm:$0xff]  ;;  %v5795_v4 = vld [vmem:[%s8976_s27 + $0x30] sm:$0xff] }
 0x4ca   : >> { %3554 = vmatpush.bf16.msra.mxu1 %v5796_v55  ;;  %5821 = vmatpush.bf16.msra.mxu3 %v5796_v55 }
 0x4ce   : >> { %3555 = vmatpush.bf16.msra.mxu1 %v5795_v4  ;;  %5822 = vmatpush.bf16.msra.mxu3 %v5795_v4  ;;  %v5794_v4 = vld [vmem:[%s8976_s27 + $0x28] sm:$0xff] }
 0x4d2   : >> { %3556 = vmatpush.bf16.msra.mxu1 %v5794_v4  ;;  %5823 = vmatpush.bf16.msra.mxu3 %v5794_v4 }
 0x4d6   : >> { %3557 = vmatpush.bf16.msra.mxu1 %v5793_v41  ;;  %5824 = vmatpush.bf16.msra.mxu3 %v5793_v41 }
 0x4d9   : >> { %5441 = vmatmul.msk.bf16.gmra.mxu0 %vm3176_vm1, %v10098_v21  ;;  %5444 = vmatmul.msk.bf16.gmra.mxu2 %vm3176_vm1, %v10099_v9 }
 0x4da   : >> { %3558 = vmatpush.bf16.msra.mxu1 %v5792_v35  ;;  %5825 = vmatpush.bf16.msra.mxu3 %v5792_v35 }
 0x4de   : >> { %3559 = vmatpush.bf16.msra.mxu1 %v5791_v50  ;;  %5826 = vmatpush.bf16.msra.mxu3 %v5791_v50 }
 0x4e2   : >> { %3560 = vmatpush.bf16.msra.mxu1 %v5790_v52  ;;  %5827 = vmatpush.bf16.msra.mxu3 %v5790_v52 }
 0x4e6   : >> { %3561 = vmatpush.bf16.msra.mxu1 %v5789_v42  ;;  %5828 = vmatpush.bf16.msra.mxu3 %v5789_v42 }
 0x4e9   : >> { %5445 = vmatmul.msk.bf16.gmra.mxu2 %vm3176_vm1, %v10100_v30 }
 0x4f9   : >> { %5446 = vmatmul.msk.bf16.gmra.mxu2 %vm3176_vm1, %v10101_v31 }
 0x536   : >> { %v3234_v32 = vpop.f32.mrf.mxu0 }
 0x537   : >> { %3274 = vmax.xlane.f32.xlu0 %v3234_v32 }
 0x53c   : >> { %v8945_v33 = vpop.f32.mrf.mxu2 }
 0x53e   : >> { %v8947_v23 = vpop.f32.mrf.mxu0 }
 0x53f   : >> { %3276 = vmax.xlane.f32.xlu0 %v8947_v23 }
 0x544   : >> { %v8950_v24 = vpop.f32.mrf.mxu2 }
 0x546   : >> { %v8952_v25 = vpop.f32.mrf.mxu0 }
 0x547   : >> { %3278 = vmax.xlane.f32.xlu1 %v8952_v25 }
 0x54c   : >> { %v8955_v26 = vpop.f32.mrf.mxu2 }
 0x54e   : >> { %v8957_v28 = vpop.f32.mrf.mxu0 }
 0x54f   : >> { %3280 = vmax.xlane.f32.xlu1 %v8957_v28 }
 0x554   : >> { %v8960_v29 = vpop.f32.mrf.mxu2 }
 0x556   : >> { %v8962_v30 = vpop.f32.mrf.mxu0 }
 0x557   : >> { %3282 = vmax.xlane.f32.xlu0 %v8962_v30 }
 0x55c   : >> { %v8965_v31 = vpop.f32.mrf.mxu2 }
 0x55d   : >> { %3294 = vmax.xlane.f32.xlu2 %v8965_v31 }
 0x55e   : >> { %v8968_v9 = vpop.f32.mrf.mxu0 }
 0x55f   : >> { %3284 = vmax.xlane.f32.xlu1 %v8968_v9 }
 0x564   : >> { %v8971_v21 = vpop.f32.mrf.mxu2 }
 0x565   : >> { %3296 = vmax.xlane.f32.xlu2 %v8971_v21 }
 0x567   : >> { %3286 = vmax.xlane.f32.xlu1 %v8945_v33 }
 0x56c   : >> { %v8981_v37 = vpop.f32.mrf.mxu2 }
 0x56d   : >> { %3298 = vmax.xlane.f32.xlu2 %v8981_v37 }
 0x574   : >> { %v8984_v51 = vpop.f32.mrf.mxu2 }
 0x575   : >> { %10102 = vst [vmem:[#allocation32_spill] sm:$0xff] %v8984_v51  ;;  %3288 = vmax.xlane.f32.xlu2 %v8950_v24  ;;  %3300 = vmax.xlane.f32.xlu0 %v8984_v51 }
 0x57c   : >> { %v8988_v34 = vpop.f32.mrf.mxu2  ;;  %v10123_v62 = vld [vmem:[#allocation32_spill] sm:$0xff] }
 0x57d   : >> { %3290 = vmax.xlane.f32.xlu2 %v8955_v26  ;;  %3302 = vmax.xlane.f32.xlu0 %v8988_v34 }
 0x584   : >> { %v8992_v55 = vpop.f32.mrf.mxu2 }
 0x585   : >> { %10103 = vst [vmem:[#allocation33_spill] sm:$0xff] %v8992_v55  ;;  %3292 = vmax.xlane.f32.xlu0 %v8960_v29  ;;  %3304 = vmax.xlane.f32.xlu1 %v8992_v55 }
 0x5aa   : >> { %v3275_v36 = vpop.xlane.xlu0 %3274 }
 0x5ab   : >> { %v9003_v53 = vmax.f32 %v7531_v22, %v3275_v36  }
 0x5ad   : >> { %10104 = vst [vmem:[#allocation34_spill] sm:$0xff] %v9003_v53  ;;  %v10105_v55 = vmov %v9003_v53 }
 0x5ae   : >> { %v3370_v41 = vsub.f32 %v3234_v32, %v10105_v55 }
 0x5b0   : >> { %v3386_v54 = vmul.f32 1.442695, %v3370_v41 }
 0x5b2   : >> { %6695 = vpow2.f32 %v3386_v54  ;;  %v3277_v35 = vpop.xlane.xlu0 %3276 }
 0x5b3   : >> { %v9009_v50 = vmax.f32 %v7527_v20, %v3277_v35  }
 0x5b5   : >> { %10106 = vst [vmem:[#allocation35_spill] sm:$0xff] %v9009_v50  ;;  %v10107_v51 = vmov %v9009_v50 }
 0x5b6   : >> { %v3371_v42 = vsub.f32 %v8947_v23, %v10107_v51 }
 0x5b8   : >> { %v3388_v56 = vmul.f32 1.442695, %v3371_v42  ;;  %v6696_v36 = vpop.eup %6695 }
 0x5b9   : >> { %3434 = vadd.xlane.f32.xlu1 %v6696_v36 }
 0x5ba   : >> { %6697 = vpow2.f32 %v3388_v56  ;;  %v3279_v53 = vpop.xlane.xlu1 %3278 }
 0x5bb   : >> { %v9016_v4 = vmax.f32 %v7523_v19, %v3279_v53  }
 0x5bd   : >> { %10108 = vst [vmem:[#allocation36_spill] sm:$0xff] %v9016_v4  ;;  %v3372_v32 = vsub.f32 %v8952_v25, %v9016_v4 }
 0x5bf   : >> { %v3390_v41 = vmul.f32 1.442695, %v3372_v32 }
 0x5c0   : >> { %v6698_v35 = vpop.eup %6697 }
 0x5c1   : >> { %3436 = vadd.xlane.f32.xlu2 %v6698_v35  ;;  %v3498_v50 = vpack.c.bf16 %v6698_v35, %v6696_v36  ;;  %6699 = vpow2.f32 %v3390_v41 }
 0x5c2   : >> { %v3281_v23 = vpop.xlane.xlu1 %3280 }
 0x5c3   : >> { %v9023_v42 = vmax.f32 %v7519_v18, %v3281_v23   ;;  %3562 = vmatmul.bf16.vlgmr.msra.gmra.mxu1 %v3498_v50 }
 0x5c5   : >> { %10109 = vst [vmem:[#allocation37_spill] sm:$0xff] %v9023_v42  ;;  %v10110_v52 = vmov %v9023_v42 }
 0x5c6   : >> { %v3373_v53 = vsub.f32 %v8957_v28, %v10110_v52 }
 0x5c7   : >> { %v6700_v43 = vpop.eup %6699 }
 0x5c8   : >> { %v3392_v54 = vmul.f32 1.442695, %v3373_v53  ;;  %3438 = vadd.xlane.f32.xlu0 %v6700_v43 }
 0x5ca   : >> { %6701 = vpow2.f32 %v3392_v54  ;;  %v3283_v25 = vpop.xlane.xlu0 %3282 }
 0x5cb   : >> { %v9030_v32 = vmax.f32 %v7515_v17, %v3283_v25  }
 0x5cd   : >> { %10111 = vst [vmem:[#allocation38_spill] sm:$0xff] %v9030_v32  ;;  %v3374_v50 = vsub.f32 %v8962_v30, %v9030_v32 }
 0x5cf   : >> { %v3394_v25 = vmul.f32 1.442695, %v3374_v50 }
 0x5d0   : >> { %v6702_v41 = vpop.eup %6701  ;;  %v3295_v35 = vpop.xlane.xlu2 %3294 }
 0x5d1   : >> { %v9037_v23 = vmax.f32 %v7491_v11, %v3295_v35   ;;  %v3499_v28 = vpack.c.bf16 %v6702_v41, %v6700_v43  ;;  %6703 = vpow2.f32 %v3394_v25 }
 0x5d2   : >> { %v3285_v42 = vpop.xlane.xlu1 %3284 }
 0x5d3   : >> { %10112 = vst [vmem:[#allocation39_spill] sm:$0xff] %v9037_v23  ;;  %v9042_v53 = vmax.f32 %v7511_v16, %v3285_v42   ;;  %3567 = vmatmul.bf16.gmra.mxu1 %v3499_v28  ;;  %v3380_v30 = vsub.f32 %v8965_v31, %v9037_v23 }
 0x5d5   : >> { %10113 = vst [vmem:[#allocation40_spill] sm:$0xff] %v9042_v53  ;;  %v10114_v56 = vmov %v9042_v53  ;;  %v3406_v53 = vmul.f32 1.442695, %v3380_v30 }
 0x5d6   : >> { %v3375_v38 = vsub.f32 %v8968_v9, %v10114_v56 }
 0x5d8   : >> { %v3396_v35 = vmul.f32 1.442695, %v3375_v38  ;;  %v3297_v43 = vpop.xlane.xlu2 %3296 }
 0x5d9   : >> { %v9051_v57 = vmax.f32 %v7487_v10, %v3297_v43  }
 0x5da   : >> { %6705 = vpow2.f32 %v3396_v35  ;;  %v3287_v42 = vpop.xlane.xlu1 %3286 }
 0x5db   : >> { %10115 = vst [vmem:[#allocation41_spill] sm:$0xff] %v9051_v57  ;;  %v10116_v54 = vmov %v9051_v57  ;;  %v9058_v9 = vmax.f32 %v7507_v15, %v3287_v42   ;;  %v6704_v57 = vpop.eup %6703  ;;  %6707 = vpow2.f32 %v3406_v53 }
 0x5dc   : >> { %v3381_v28 = vsub.f32 %v8971_v21, %v10116_v54 }
 0x5dd   : >> { %10117 = vst [vmem:[#allocation42_spill] sm:$0xff] %v9058_v9  ;;  %v3376_v31 = vsub.f32 %v8945_v33, %v9058_v9 }
 0x5de   : >> { %v3408_v36 = vmul.f32 1.442695, %v3381_v28 }
 0x5df   : >> { %v3398_v25 = vmul.f32 1.442695, %v3376_v31 }
 0x5e0   : >> { %v9064_v30 = vpop.eup %6705  ;;  %6709 = vpow2.f32 %v3408_v36  ;;  %v3299_v35 = vpop.xlane.xlu2 %3298 }
 0x5e1   : >> { %v9067_v43 = vmax.f32 %v7483_v8, %v3299_v35   ;;  %v3500_v42 = vpack.c.bf16 %v9064_v30, %v6704_v57  ;;  %6711 = vpow2.f32 %v3398_v25  ;;  %v6708_v50 = vpop.eup %6707 }
 0x5e3   : >> { %10118 = vst [vmem:[#allocation43_spill] sm:$0xff] %v9067_v43  ;;  %v10119_v21 = vmov %v9067_v43  ;;  %3572 = vmatmul.bf16.gmra.mxu1 %v3500_v42 }
 0x5e4   : >> { %v3382_v36 = vsub.f32 %v8981_v37, %v10119_v21 }
 0x5e6   : >> { %v9072_v38 = vpop.eup %6709  ;;  %v3410_v27 = vmul.f32 1.442695, %v3382_v36 }
 0x5e7   : >> { %v3503_v33 = vpack.c.bf16 %v9072_v38, %v6708_v50  ;;  %v6712_v53 = vpop.eup %6711 }
 0x5e8   : >> { %v3289_v31 = vpop.xlane.xlu2 %3288  ;;  %v3301_v58 = vpop.xlane.xlu0 %3300  ;;  %3446 = vadd.xlane.f32.xlu1 %v6712_v53 }
 0x5e9   : >> { %v9078_v35 = vmax.f32 %v7503_v14, %v3289_v31   ;;  %v9081_v25 = vmax.f32 %v7479_v7, %v3301_v58   ;;  %3587 = vmatmul.bf16.vlgmr.msra.gmra.mxu3 %v3503_v33 }
 0x5eb   : >> { %10120 = vst [vmem:[#allocation44_spill] sm:$0xff] %v9078_v35  ;;  %v10121_v54 = vmov %v9078_v35  ;;  %v3383_v37 = vsub.f32 %v10123_v62, %v9081_v25 }
 0x5ec   : >> { %10122 = vst [vmem:[#allocation45_spill] sm:$0xff] %v9081_v25  ;;  %v3377_v42 = vsub.f32 %v8950_v24, %v10121_v54 }
 0x5ed   : >> { %v3412_v35 = vmul.f32 1.442695, %v3383_v37 }
 0x5ee   : >> { %v3400_v31 = vmul.f32 1.442695, %v3377_v42 }
 0x5f0   : >> { %6713 = vpow2.f32 %v3400_v31  ;;  %v3291_v58 = vpop.xlane.xlu2 %3290  ;;  %v3303_v39 = vpop.xlane.xlu0 %3302  ;;  %3440 = vadd.xlane.f32.xlu1 %v6702_v41 }
 0x5f1   : >> { %6715 = vpow2.f32 %v3410_v27  ;;  %v9092_v33 = vmax.f32 %v7499_v13, %v3291_v58   ;;  %v9095_v43 = vmax.f32 %v7475_v6, %v3303_v39  }
 0x5f2   : >> { %6717 = vpow2.f32 %v3412_v35 }
 0x5f3   : >> { %10124 = vst [vmem:[#allocation46_spill] sm:$0xff] %v9092_v33  ;;  %v10126_v21 = vmov %v9095_v43  ;;  %v3378_v62 = vsub.f32 %v8955_v26, %v9092_v33 }
 0x5f4   : >> { %10125 = vst [vmem:[#allocation47_spill] sm:$0xff] %v9095_v43  ;;  %v3384_v41 = vsub.f32 %v8988_v34, %v10126_v21 }
 0x5f5   : >> { %v3402_v42 = vmul.f32 1.442695, %v3378_v62 }
 0x5f6   : >> { %v6714_v37 = vpop.eup %6713 }
 0x5f7   : >> { %v6716_v27 = vpop.eup %6715  ;;  %3448 = vadd.xlane.f32.xlu2 %v6714_v37  ;;  %v3501_v31 = vpack.c.bf16 %v6714_v37, %v6712_v53  ;;  %6719 = vpow2.f32 %v3402_v42  ;;  %v10130_v37 = vld [vmem:[#allocation33_spill] sm:$0xff] }
 0x5f8   : >> { %v6718_v58 = vpop.eup %6717  ;;  %v3293_v39 = vpop.xlane.xlu0 %3292 }
 0x5f9   : >> { %v3305_v43 = vpop.xlane.xlu1 %3304  ;;  %v9106_v35 = vmax.f32 %v7495_v12, %v3293_v39   ;;  %3577 = vmatmul.bf16.gmra.mxu1 %v3501_v31  ;;  %v3504_v36 = vpack.c.bf16 %v6718_v58, %v6716_v27  ;;  %v3414_v39 = vmul.f32 1.442695, %v3384_v41 }
 0x5fa   : >> { %v9109_v26 = vmax.f32 %v7471_v5, %v3305_v43  }
 0x5fb   : >> { %10127 = vst [vmem:[#allocation48_spill] sm:$0xff] %v9106_v35  ;;  %v10128_v28 = vmov %v9106_v35  ;;  %3592 = vmatmul.bf16.gmra.mxu3 %v3504_v36 }
 0x5fc   : >> { %10129 = vst [vmem:[#allocation49_spill] sm:$0xff] %v9109_v26  ;;  %v3379_v53 = vsub.f32 %v8960_v29, %v10128_v28  ;;  %v3385_v34 = vsub.f32 %v10130_v37, %v9109_v26 }
 0x5fd   : >> { %v6720_v24 = vpop.eup %6719 }
 0x5fe   : >> { %v3404_v35 = vmul.f32 1.442695, %v3379_v53  ;;  %v3416_v43 = vmul.f32 1.442695, %v3385_v34  ;;  %3450 = vadd.xlane.f32.xlu0 %v6720_v24 }
 0x5ff   : >> { %3442 = vadd.xlane.f32.xlu2 %v6704_v57  ;;  %v10131_v57 = vsub.f32 %v7531_v22, %v10105_v55 }
 0x600   : >> { %6721 = vpow2.f32 %v3404_v35 }
 0x601   : >> { %6723 = vpow2.f32 %v3414_v39  ;;  %v3338_v36 = vmul.f32 1.442695, %v10131_v57  ;;  %v10140_v57 = vsub.f32 %v7507_v15, %v9058_v9  ;;  %v10144_v15 = vsub.f32 %v7511_v16, %v10114_v56 }
 0x602   : >> { %6725 = vpow2.f32 %v3416_v43  ;;  %v10139_v43 = vsub.f32 %v7519_v18, %v10110_v52 }
 0x603   : >> { %6727 = vpow2.f32 %v3338_v36  ;;  %v3350_v36 = vmul.f32 1.442695, %v10140_v57 }
 0x606   : >> { %v6722_v31 = vpop.eup %6721  ;;  %3444 = vadd.xlane.f32.xlu0 %v9064_v30  ;;  %v10132_v30 = vsub.f32 %v7527_v20, %v10107_v51 }
 0x607   : >> { %v6724_v62 = vpop.eup %6723  ;;  %3452 = vadd.xlane.f32.xlu1 %v6722_v31  ;;  %v3502_v29 = vpack.c.bf16 %v6722_v31, %v6720_v24  ;;  %3454 = vadd.xlane.f32.xlu2 %v6708_v50 }
 0x608   : >> { %v6726_v42 = vpop.eup %6725  ;;  %v3340_v24 = vmul.f32 1.442695, %v10132_v30 }
 0x609   : >> { %3582 = vmatmul.bf16.gmra.mxu1 %v3502_v29  ;;  %v3505_v37 = vpack.c.bf16 %v6726_v42, %v6724_v62  ;;  %v6728_v41 = vpop.eup %6727 }
 0x60a   : >> { %6729 = vpow2.f32 %v3340_v24  ;;  %v3418_v50 = vmul.f32 %v7467_v3, %v6728_v41  ;;  %v3482_v39 = vmul.f32 %v7403_v49, %v6728_v41 }
 0x60b   : >> { %3597 = vmatmul.bf16.gmra.mxu3 %v3505_v37 }
 0x60e   : >> { %3456 = vadd.xlane.f32.xlu0 %v9072_v38  ;;  %v10134_v38 = vsub.f32 %v7523_v19, %v9016_v4 }
 0x60f   : >> { %3458 = vadd.xlane.f32.xlu1 %v6716_v27  ;;  %3460 = vadd.xlane.f32.xlu2 %v6718_v58 }
 0x610   : >> { %v3342_v27 = vmul.f32 1.442695, %v10134_v38  ;;  %v6730_v58 = vpop.eup %6729 }
 0x611   : >> { %v3419_v22 = vmul.f32 %v7463_v2, %v6730_v58  ;;  %v3483_v19 = vmul.f32 %v7399_v48, %v6730_v58 }
 0x612   : >> { %6731 = vpow2.f32 %v3342_v27  ;;  %v3348_v27 = vmul.f32 1.442695, %v10144_v15 }
 0x616   : >> { %3462 = vadd.xlane.f32.xlu0 %v6724_v62 }
 0x617   : >> { %3464 = vadd.xlane.f32.xlu1 %v6726_v42 }
 0x618   : >> { %v6732_v20 = vpop.eup %6731 }
 0x619   : >> { %v3420_v42 = vmul.f32 %v7459_v1, %v6732_v20 }
 0x62c   : >> { %v3435_v53 = vpop.xlane.xlu1 %3434 }
 0x62d   : >> { %v9128_v3 = vadd.f32 %v3435_v53, %v3418_v50  }
 0x62f   : >> { %10133 = vst [vmem:[#allocation50_spill] sm:$0xff] %v9128_v3 }
 0x634   : >> { %v3437_v62 = vpop.xlane.xlu2 %3436 }
 0x635   : >> { %v9134_v2 = vadd.f32 %v3437_v62, %v3419_v22  }
 0x637   : >> { %10135 = vst [vmem:[#allocation51_spill] sm:$0xff] %v9134_v2  ;;  %v3344_v2 = vmul.f32 1.442695, %v10139_v43 }
 0x639   : >> { %6733 = vpow2.f32 %v3344_v2 }
 0x63a   : >> { %6735 = vpow2.f32 %v3350_v36 }
 0x63b   : >> { %v3439_v34 = vpop.xlane.xlu0 %3438 }
 0x63c   : >> { %v9137_v1 = vadd.f32 %v3439_v34, %v3420_v42  }
 0x63e   : >> { %10136 = vst [vmem:[#allocation52_spill] sm:$0xff] %v9137_v1  ;;  %v3484_v1 = vmul.f32 %v7395_v47, %v6732_v20  ;;  %v10147_v20 = vsub.f32 %v7491_v11, %v9037_v23 }
 0x640   : >> { %v3563_v3 = vpop.f32.mrf.mxu1  ;;  %v3358_v42 = vmul.f32 1.442695, %v10147_v20  ;;  %v10165_v20 = vld [vmem:[#allocation26_spill] sm:$0xff] }
 0x641   : >> { %v9140_v49 = vadd.f32 %v3563_v3, %v3482_v39  }
 0x643   : >> { %v10137_v30 = vmov %v9140_v49  ;;  %v10142_v49 = vsub.f32 %v7515_v17, %v9030_v32  ;;  %v10145_v17 = vsub.f32 %v7503_v14, %v10121_v54  ;;  %v10149_v14 = vsub.f32 %v7499_v13, %v9092_v33 }
 0x645   : >> { %v3346_v50 = vmul.f32 1.442695, %v10142_v49  ;;  %v3352_v22 = vmul.f32 1.442695, %v10145_v17  ;;  %v3354_v3 = vmul.f32 1.442695, %v10149_v14 }
 0x647   : >> { %6737 = vpow2.f32 %v3346_v50 }
 0x648   : >> { %v3565_v35 = vpop.f32.mrf.mxu1  ;;  %6739 = vpow2.f32 %v3348_v27 }
 0x649   : >> { %v9143_v48 = vadd.f32 %v3565_v35, %v3483_v19   ;;  %6741 = vpow2.f32 %v3352_v22  ;;  %v10151_v19 = vld [vmem:[#allocation41_spill] sm:$0xff]  ;;  %v10163_v22 = vsub.f32 %v7479_v7, %v9081_v25  ;;  %v10170_v7 = vsub.f32 %v7475_v6, %v10126_v21  ;;  %v10179_v6 = vld [vmem:[#allocation17_spill] sm:$0xff] }
 0x64a   : >> { %6743 = vpow2.f32 %v3358_v42  ;;  %v10152_v35 = vsub.f32 %v7487_v10, %v10151_v19 }
 0x64b   : >> { %v10138_v24 = vmov %v9143_v48  ;;  %v6734_v48 = vpop.eup %6733  ;;  %6745 = vpow2.f32 %v3354_v3 }
 0x64c   : >> { %v3485_v18 = vmul.f32 %v7391_v46, %v6734_v48  ;;  %v6736_v53 = vpop.eup %6735  ;;  %v3421_v34 = vmul.f32 %v7455_v0, %v6734_v48  ;;  %v3360_v43 = vmul.f32 1.442695, %v10152_v35  ;;  %v10157_v48 = vld [vmem:[#allocation43_spill] sm:$0xff]  ;;  %v10169_v35 = vld [vmem:[#allocation29_spill] sm:$0xff] }
 0x64d   : >> { %v3424_v58 = vmul.f32 %v7443_v61, %v6736_v53 }
 0x64e   : >> { %6747 = vpow2.f32 %v3360_v43 }
 0x650   : >> { %v3568_v41 = vpop.f32.mrf.mxu1 }
 0x651   : >> { %v9152_v47 = vadd.f32 %v3568_v41, %v3484_v1   ;;  %v10155_v1 = vsub.f32 %v7495_v12, %v10128_v28  ;;  %v10162_v12 = vld [vmem:[#allocation22_spill] sm:$0xff] }
 0x653   : >> { %v10141_v55 = vmov %v9152_v47  ;;  %v6738_v47 = vpop.eup %6737  ;;  %v3356_v10 = vmul.f32 1.442695, %v10155_v1 }
 0x654   : >> { %v6740_v39 = vpop.eup %6739  ;;  %v3422_v15 = vmul.f32 %v7451_v63, %v6738_v47 }
 0x655   : >> { %v6742_v11 = vpop.eup %6741  ;;  %v3487_v2 = vmul.f32 %v7383_v44, %v6740_v39  ;;  %6749 = vpow2.f32 %v3356_v10 }
 0x656   : >> { %v6744_v57 = vpop.eup %6743  ;;  %v3425_v36 = vmul.f32 %v7439_v60, %v6742_v11 }
 0x657   : >> { %v6746_v49 = vpop.eup %6745  ;;  %v3428_v43 = vmul.f32 %v10169_v35, %v6744_v57 }
 0x658   : >> { %v3570_v38 = vpop.f32.mrf.mxu1  ;;  %v6748_v50 = vpop.eup %6747 }
 0x659   : >> { %v9158_v46 = vadd.f32 %v3570_v38, %v3485_v18   ;;  %v10158_v18 = vmov %v10157_v48  ;;  %v3493_v17 = vmul.f32 %v10162_v12, %v6748_v50 }
 0x65b   : >> { %v10143_v51 = vmov %v9158_v46  ;;  %v3447_v62 = vpop.xlane.xlu1 %3446  ;;  %v3486_v46 = vmul.f32 %v7387_v45, %v6738_v47  ;;  %v3488_v47 = vmul.f32 %v10165_v20, %v6736_v53  ;;  %v6750_v42 = vpop.eup %6749 }
 0x65c   : >> { %v9167_v61 = vadd.f32 %v3447_v62, %v3424_v58  }
 0x65e   : >> { %10146 = vst [vmem:[#allocation53_spill] sm:$0xff] %v9167_v61 }
 0x660   : >> { %v3573_v16 = vpop.f32.mrf.mxu1 }
 0x661   : >> { %v9173_v45 = vadd.f32 %v3573_v16, %v3486_v46  }
 0x663   : >> { %v10148_v52 = vmov %v9173_v45  ;;  %v3441_v61 = vpop.xlane.xlu1 %3440 }
 0x664   : >> { %v9179_v0 = vadd.f32 %v3441_v61, %v3421_v34  }
 0x666   : >> { %10150 = vst [vmem:[#allocation54_spill] sm:$0xff] %v9179_v0  ;;  %v3492_v0 = vmul.f32 %v7363_v40, %v6744_v57 }
 0x668   : >> { %v3575_v45 = vpop.f32.mrf.mxu1 }
 0x669   : >> { %v9185_v44 = vadd.f32 %v3575_v45, %v3487_v2   ;;  %v3366_v2 = vmul.f32 1.442695, %v10170_v7  ;;  %v10173_v45 = vsub.f32 %v7471_v5, %v9109_v26  ;;  %v10195_v7 = vld [vmem:[#allocation18_spill] sm:$0xff] }
 0x66a   : >> { %v3449_v13 = vpop.xlane.xlu2 %3448 }
 0x66b   : >> { %v10153_v56 = vmov %v9185_v44  ;;  %v9188_v60 = vadd.f32 %v3449_v13, %v3425_v36   ;;  %v10159_v44 = vsub.f32 %v7483_v8, %v10157_v48  ;;  %v3364_v8 = vmul.f32 1.442695, %v10163_v22  ;;  %v10175_v36 = vld [vmem:[#allocation21_spill] sm:$0xff] }
 0x66c   : >> { %v3588_v41 = vpop.f32.mrf.mxu3 }
 0x66d   : >> { %10154 = vst [vmem:[#allocation55_spill] sm:$0xff] %v9188_v60  ;;  %v9194_v40 = vadd.f32 %v3588_v41, %v3492_v0   ;;  %v3362_v38 = vmul.f32 1.442695, %v10159_v44  ;;  %v3426_v60 = vmul.f32 %v7435_v59, %v6746_v49  ;;  %v10176_v0 = vld [vmem:[#allocation25_spill] sm:$0xff]  ;;  %v3429_v44 = vmul.f32 %v10179_v6, %v6748_v50  ;;  %v10232_v6 = vld [vmem:[#allocation47_spill] sm:$0xff] }
 0x66e   : >> { %v3489_v1 = vmul.f32 %v10176_v0, %v6742_v11 }
 0x66f   : >> { %v10156_v54 = vmov %v9194_v40  ;;  %6751 = vpow2.f32 %v3362_v38 }
 0x670   : >> { %6753 = vpow2.f32 %v3364_v8 }
 0x671   : >> { %v3451_v58 = vpop.xlane.xlu0 %3450  ;;  %6755 = vpow2.f32 %v3366_v2 }
 0x672   : >> { %v3443_v27 = vpop.xlane.xlu2 %3442  ;;  %v9203_v59 = vadd.f32 %v3451_v58, %v3426_v60  }
 0x673   : >> { %v9201_v63 = vadd.f32 %v3443_v27, %v3422_v15   ;;  %v10180_v15 = vld [vmem:[#allocation16_spill] sm:$0xff] }
 0x674   : >> { %10161 = vst [vmem:[#allocation57_spill] sm:$0xff] %v9203_v59  ;;  %v3590_v40 = vpop.f32.mrf.mxu3  ;;  %v10168_v59 = vld [vmem:[#allocation30_spill] sm:$0xff] }
 0x675   : >> { %10160 = vst [vmem:[#allocation56_spill] sm:$0xff] %v9201_v63  ;;  %v9209_v62 = vadd.f32 %v3590_v40, %v3493_v17   ;;  %v10167_v63 = vld [vmem:[#allocation31_spill] sm:$0xff]  ;;  %v3427_v34 = vmul.f32 %v10168_v59, %v6750_v42  ;;  %v6752_v14 = vpop.eup %6751  ;;  %v10186_v40 = vld [vmem:[#allocation24_spill] sm:$0xff] }
 0x676   : >> { %v3578_v46 = vpop.f32.mrf.mxu1  ;;  %v3423_v16 = vmul.f32 %v10167_v63, %v6740_v39  ;;  %v3368_v39 = vmul.f32 1.442695, %v10173_v45  ;;  %v3494_v13 = vmul.f32 %v10175_v36, %v6752_v14  ;;  %v6754_v48 = vpop.eup %6753  ;;  %v3430_v5 = vmul.f32 %v10180_v15, %v6752_v14  ;;  %v10190_v63 = vld [vmem:[#allocation27_spill] sm:$0xff]  ;;  %v10240_v15 = vld [vmem:[#allocation42_spill] sm:$0xff] }
 0x677   : >> { %v10164_v23 = vmov %v9209_v62  ;;  %v9212_v27 = vadd.f32 %v3578_v46, %v3488_v47   ;;  %v6756_v12 = vpop.eup %6755  ;;  %v3490_v22 = vmul.f32 %v10186_v40, %v6746_v49  ;;  %v10189_v47 = vld [vmem:[#allocation15_spill] sm:$0xff]  ;;  %v10193_v14 = vld [vmem:[#allocation19_spill] sm:$0xff]  ;;  %v10202_v40 = vmov %v10156_v54 }
 0x678   : >> { %6757 = vpow2.f32 %v3368_v39  ;;  %v3432_v46 = vmul.f32 %v10189_v47, %v6756_v12  ;;  %v10194_v49 = vld [vmem:[#allocation23_spill] sm:$0xff]  ;;  %v10201_v39 = vmov %v10164_v23  ;;  %v10208_v45 = vmov %v10148_v52  ;;  %v10279_v15 = vld [vmem:[#allocation50_spill] sm:$0xff] (%p9263_p4) }
 0x679   : >> { %v10166_v31 = vmov %v9212_v27  ;;  %v3445_v3 = vpop.xlane.xlu0 %3444  ;;  %v10210_v47 = vmov %v10141_v55 }
 0x67a   : >> { %v3453_v61 = vpop.xlane.xlu1 %3452  ;;  %v9220_v62 = vadd.f32 %v3445_v3, %v3423_v16   ;;  %v3455_v53 = vpop.xlane.xlu2 %3454  ;;  %v3496_v3 = vmul.f32 %v10193_v14, %v6756_v12  ;;  %v10237_v12 = vld [vmem:[#allocation48_spill] sm:$0xff] }
 0x67b   : >> { %v9222_v58 = vadd.f32 %v3453_v61, %v3427_v34   ;;  %v9227_v57 = vadd.f32 %v3455_v53, %v3428_v43   ;;  %v3491_v61 = vmul.f32 %v10194_v49, %v6750_v42  ;;  %v10212_v49 = vmov %v10137_v30  ;;  %v10239_v14 = vld [vmem:[#allocation44_spill] sm:$0xff]  ;;  %v10271_v6 = vld [vmem:[#allocation57_spill] sm:$0xff] (%p9263_p4)  ;;  %v10276_v12 = vld [vmem:[#allocation54_spill] sm:$0xff] (%p9263_p4) }
 0x67c   : >> { %10171 = vst [vmem:[#allocation58_spill] sm:$0xff] %v9220_v62  ;;  %v10253_v49 = vmov (%p9263_p4), %v10156_v54  ;;  %v10278_v14 = vld [vmem:[#allocation51_spill] sm:$0xff] (%p9263_p4) }
 0x67d   : >> { %10172 = vst [vmem:[#allocation59_spill] sm:$0xff] %v9222_v58 }
 0x67e   : >> { %10174 = vst [vmem:[#allocation60_spill] sm:$0xff] %v9227_v57  ;;  %v3593_v10 = vpop.f32.mrf.mxu3  ;;  %v3580_v41 = vpop.f32.mrf.mxu1  ;;  %v10181_v57 = vld [vmem:[#allocation28_spill] sm:$0xff] }
 0x67f   : >> { %v9231_v38 = vadd.f32 %v3593_v10, %v3494_v13   ;;  %v9233_v43 = vadd.f32 %v3580_v41, %v3489_v1   ;;  %v3431_v58 = vmul.f32 %v10181_v57, %v6754_v48  ;;  %v6758_v8 = vpop.eup %6757  ;;  %v10235_v10 = vmov %v10151_v19  ;;  %v10244_v19 = vld [vmem:[#allocation36_spill] sm:$0xff] }
 0x680   : >> { %v3433_v16 = vmul.f32 %v10190_v63, %v6758_v8  ;;  %v10283_v19 = vld [vmem:[#allocation43_spill] sm:$0xff] (%p9263_p4) }
 0x681   : >> { %v10177_v21 = vmov %v9231_v38  ;;  %v10178_v32 = vmov %v9233_v43  ;;  %v3457_v60 = vpop.xlane.xlu0 %3456  ;;  %v10185_v38 = vld [vmem:[#allocation20_spill] sm:$0xff] }
 0x682   : >> { %v3459_v27 = vpop.xlane.xlu1 %3458  ;;  %v9238_v2 = vadd.f32 %v3457_v60, %v3429_v44   ;;  %v3461_v11 = vpop.xlane.xlu2 %3460  ;;  %v3495_v17 = vmul.f32 %v10185_v38, %v6754_v48  ;;  %v10200_v38 = vmov %v10177_v21  ;;  %v10207_v44 = vmov %v10153_v56  ;;  %v10223_v60 = vld [vmem:[#allocation55_spill] sm:$0xff] }
 0x683   : >> { %v9240_v1 = vadd.f32 %v3459_v27, %v3430_v5   ;;  %v9242_v53 = vadd.f32 %v3461_v11, %v3431_v58   ;;  %v10206_v27 = vmov %v10166_v31  ;;  %v10211_v48 = vmov %v10138_v24  ;;  %v10231_v5 = vld [vmem:[#allocation49_spill] sm:$0xff]  ;;  %v10236_v11 = vld [vmem:[#allocation39_spill] sm:$0xff]  ;;  %v10274_v10 = vld [vmem:[#allocation58_spill] sm:$0xff] (%p9263_p4) }
 0x684   : >> { %10182 = vst [vmem:[#allocation61_spill] sm:$0xff] %v9238_v2  ;;  %v3497_v2 = vmul.f32 %v10195_v7, %v6758_v8  ;;  %v10221_v58 = vld [vmem:[#allocation59_spill] sm:$0xff]  ;;  %v10233_v7 = vld [vmem:[#allocation45_spill] sm:$0xff]  ;;  %v10234_v8 = vmov %v10158_v18  ;;  %v10251_v47 = vmov (%p9263_p4), %v10177_v21  ;;  %v10252_v48 = vmov (%p9263_p4), %v10164_v23  ;;  %v10275_v11 = vld [vmem:[#allocation56_spill] sm:$0xff] (%p9263_p4) }
 0x685   : >> { %10183 = vst [vmem:[#allocation62_spill] sm:$0xff] %v9240_v1  ;;  %v10184_v25 = vmov %v9242_v53  ;;  %v10216_v13 = vmov %v9240_v1  ;;  %v10220_v57 = vld [vmem:[#allocation60_spill] sm:$0xff]  ;;  %v10243_v18 = vld [vmem:[#allocation37_spill] sm:$0xff]  ;;  %v10260_v58 = vmov (%p9263_p4), %v10143_v51  ;;  %v10262_v60 = vmov (%p9263_p4), %v10138_v24  ;;  %v10270_v5 = vld [vmem:[#allocation59_spill] sm:$0xff] (%p9263_p4) }
 0x686   : >> { %v3595_v50 = vpop.f32.mrf.mxu3  ;;  %v3583_v62 = vpop.f32.mrf.mxu1  ;;  %10217 = vst [vmem:[#allocation16_spill] sm:$0xff] %v10216_v13  ;;  %v10228_v1 = vld [vmem:[#allocation52_spill] sm:$0xff]  ;;  %v10238_v13 = vld [vmem:[#allocation46_spill] sm:$0xff]  ;;  %v10259_v57 = vmov (%p9263_p4), %v10148_v52  ;;  %v10272_v7 = vld [vmem:[#allocation55_spill] sm:$0xff] (%p9263_p4) }
 0x687   : >> { %v9246_v36 = vadd.f32 %v3595_v50, %v3495_v17   ;;  %v9248_v20 = vadd.f32 %v3583_v62, %v3490_v22   ;;  %v10225_v62 = vld [vmem:[#allocation58_spill] sm:$0xff]  ;;  %10257 = vst [vmem:[#allocation16_spill] sm:$0xff] (%p9263_p4), %v10166_v31  ;;  %v10273_v8 = vld [vmem:[#allocation53_spill] sm:$0xff] (%p9263_p4)  ;;  %v10277_v13 = vld [vmem:[#allocation52_spill] sm:$0xff] (%p9263_p4) }
 0x688   : >> { %v10242_v17 = vld [vmem:[#allocation38_spill] sm:$0xff]  ;;  %v10282_v18 = vld [vmem:[#allocation45_spill] sm:$0xff] (%p9263_p4)  ;;  %v10286_v23 = vld [vmem:[#allocation48_spill] sm:$0xff] (%p9263_p4) }
 0x689   : >> { %v10187_v4 = vmov %v9246_v36  ;;  %v10188_v9 = vmov %v9248_v20  ;;  %v3463_v59 = vpop.xlane.xlu0 %3462  ;;  %v10245_v20 = vld [vmem:[#allocation35_spill] sm:$0xff]  ;;  %v10246_v22 = vld [vmem:[#allocation34_spill] sm:$0xff]  ;;  %v10293_v31 = vld [vmem:[#allocation36_spill] sm:$0xff] (%p9263_p4) }
 0x68a   : >> { %v3465_v34 = vpop.xlane.xlu1 %3464  ;;  %v9252_v63 = vadd.f32 %v3463_v59, %v3432_v46   ;;  %v10199_v36 = vmov %v10187_v4  ;;  %v10204_v42 = vmov %v10188_v9  ;;  %v10209_v46 = vmov %v10143_v51  ;;  %v10222_v59 = vld [vmem:[#allocation57_spill] sm:$0xff]  ;;  %v10281_v17 = vld [vmem:[#allocation47_spill] sm:$0xff] (%p9263_p4)  ;;  %v10287_v24 = vld [vmem:[#allocation46_spill] sm:$0xff] (%p9263_p4) }
 0x68b   : >> { %v9254_v50 = vadd.f32 %v3465_v34, %v3433_v16   ;;  %v10218_v0 = vld [vmem:[#allocation61_spill] sm:$0xff]  ;;  %v10241_v16 = vld [vmem:[#allocation40_spill] sm:$0xff]  ;;  %v10250_v46 = vmov (%p9263_p4), %v10187_v4  ;;  %v10261_v59 = vmov (%p9263_p4), %v10141_v55  ;;  %v10285_v22 = vld [vmem:[#allocation39_spill] sm:$0xff] (%p9263_p4) }
 0x68c   : >> { %v10191_v28 = vmov %v9252_v63  ;;  %10219 = vst [vmem:[#allocation17_spill] sm:$0xff] %v10218_v0  ;;  %v10226_v63 = vld [vmem:[#allocation56_spill] sm:$0xff]  ;;  %v10227_v0 = vld [vmem:[#allocation54_spill] sm:$0xff]  ;;  %v10280_v16 = vld [vmem:[#allocation49_spill] sm:$0xff] (%p9263_p4) }
 0x68d   : >> { %v10192_v29 = vmov %v9254_v50  ;;  %10214 = vst [vmem:[#allocation15_spill] sm:$0xff] %v10191_v28  ;;  %v10265_v63 = vmov (%p9263_p4), %v10191_v28  ;;  %v10266_v0 = vmov (%p9263_p4), %v10184_v25  ;;  %v10267_v1 = vld [vmem:[#allocation62_spill] sm:$0xff] (%p9263_p4)  ;;  %v10284_v20 = vld [vmem:[#allocation41_spill] sm:$0xff] (%p9263_p4)  ;;  %v10290_v28 = vld [vmem:[#allocation40_spill] sm:$0xff] (%p9263_p4) }
 0x68e   : >> { %v3598_v35 = vpop.f32.mrf.mxu3  ;;  %v3585_v43 = vpop.f32.mrf.mxu1  ;;  %v10213_v50 = vmov %v10192_v29  ;;  %10255 = vst [vmem:[#allocation15_spill] sm:$0xff] (%p9263_p4), %v10188_v9  ;;  %v10264_v62 = vmov (%p9263_p4), %v10192_v29  ;;  %v10291_v29 = vld [vmem:[#allocation38_spill] sm:$0xff] (%p9263_p4) }
 0x68f   : >> { %v3617_v37 = vadd.f32 %v3598_v35, %v3496_v3   ;;  %v3612_v26 = vadd.f32 %v3585_v43, %v3491_v61   ;;  %v10205_v43 = vmov %v10178_v32  ;;  %v10224_v61 = vld [vmem:[#allocation53_spill] sm:$0xff]  ;;  %v10230_v3 = vld [vmem:[#allocation50_spill] sm:$0xff]  ;;  %10258 = vst [vmem:[#allocation17_spill] sm:$0xff] (%p9263_p4), %v10153_v56 }
 0x690   : > { %v10263_v61 = vmov (%p9263_p4), %v10137_v30  ;;  %v10269_v3 = vld [vmem:[#allocation60_spill] sm:$0xff] (%p9263_p4)  ;;  %v10292_v30 = vld [vmem:[#allocation37_spill] sm:$0xff] (%p9263_p4) }
 0x691   : >> { %v10198_v35 = vmov %v3617_v37  ;;  %v10203_v41 = vmov %v3612_v26  ;;  %v10249_v45 = vmov (%p9263_p4), %v3617_v37  ;;  %v10254_v50 = vmov (%p9263_p4), %v3612_v26  ;;  %v10289_v26 = vld [vmem:[#allocation42_spill] sm:$0xff] (%p9263_p4) }
 0x695   : > { %3048 = sbr.rel (!%p9263_p4) target bundleno = 1140 (0x474), region = 88 }
 0x696   : >> { %v3600_v53 = vpop.f32.mrf.mxu3 }
 0x697   : >> { %v3618_v33 = vadd.f32 %v3600_v53, %v3497_v2   ;;  %v10215_v53 = vmov %v10184_v25  ;;  %v10229_v2 = vld [vmem:[#allocation51_spill] sm:$0xff]  ;;  %v10288_v25 = vld [vmem:[#allocation44_spill] sm:$0xff] (%p9263_p4) }
 0x698   : > { %v10256_v53 = vmov (%p9263_p4), %v10178_v32  ;;  %v10268_v2 = vld [vmem:[#allocation61_spill] sm:$0xff] (%p9263_p4)  ;;  %v10294_v32 = vld [vmem:[#allocation35_spill] sm:$0xff] (%p9263_p4) }
 0x699   : >> { %v10197_v34 = vmov %v3618_v33  ;;  %v10248_v44 = vmov (%p9263_p4), %v3618_v33  ;;  %v10295_v33 = vld [vmem:[#allocation34_spill] sm:$0xff] (%p9263_p4) }
 0x69a PF: > { %10299 = vst [vmem:[#allocation63_spill] sm:$0xff] %v7539_v44  ;;  %v10306_v51 = vld [vmem:[#allocation15_spill] sm:$0xff]  ;;  %v10309_v55 = vld [vmem:[#allocation16_spill] sm:$0xff]  ;;  %v10310_v4 = vld [vmem:[#allocation17_spill] sm:$0xff]  ;;  %s5479_s15 = sshll.u32 %s8449_s24, 2  ;;  %vm3695_vm2 = vcmask 523264   ;;  %v7727_v33 = vphi %v8666_v33, %v10295_v33   ;;  %v7723_v32 = vphi %v8664_v32, %v10294_v32   ;;  %v7719_v31 = vphi %v8662_v31, %v10293_v31   ;;  %v7715_v30 = vphi %v8660_v30, %v10292_v30   ;;  %v7711_v29 = vphi %v8658_v29, %v10291_v29   ;;  %v7707_v28 = vphi %v8656_v28, %v10290_v28   ;;  %v7703_v26 = vphi %v8654_v26, %v10289_v26   ;;  %v7699_v25 = vphi %v8652_v25, %v10288_v25   ;;  %v7695_v24 = vphi %v8650_v24, %v10287_v24   ;;  %v7691_v23 = vphi %v8648_v23, %v10286_v23   ;;  %v7687_v22 = vphi %v8646_v22, %v10285_v22   ;;  %v7683_v20 = vphi %v8644_v20, %v10284_v20   ;;  %v7679_v19 = vphi %v8642_v19, %v10283_v19   ;;  %v7675_v18 = vphi %v8640_v18, %v10282_v18   ;;  %v7671_v17 = vphi %v8638_v17, %v10281_v17   ;;  %v7667_v16 = vphi %v8636_v16, %v10280_v16   ;;  %v7663_v15 = vphi %v8634_v15, %v10279_v15   ;;  %v7659_v14 = vphi %v8632_v14, %v10278_v14   ;;  %v7655_v13 = vphi %v8630_v13, %v10277_v13   ;;  %v7651_v12 = vphi %v8628_v12, %v10276_v12   ;;  %v7647_v11 = vphi %v8626_v11, %v10275_v11   ;;  %v7643_v10 = vphi %v8624_v10, %v10274_v10   ;;  %v7639_v8 = vphi %v8622_v8, %v10273_v8   ;;  %v7635_v7 = vphi %v8620_v7, %v10272_v7   ;;  %v7631_v6 = vphi %v8618_v6, %v10271_v6   ;;  %v7627_v5 = vphi %v8616_v5, %v10270_v5   ;;  %v7623_v3 = vphi %v8614_v3, %v10269_v3   ;;  %v7619_v2 = vphi %v8612_v2, %v10268_v2   ;;  %v7615_v1 = vphi %v8610_v1, %v10267_v1   ;;  %v7611_v0 = vphi %v8608_v0, %v10266_v0   ;;  %v7607_v63 = vphi %v8606_v63, %v10265_v63   ;;  %v7603_v62 = vphi %v8604_v62, %v10264_v62   ;;  %v7599_v61 = vphi %v8602_v61, %v10263_v61   ;;  %v7595_v60 = vphi %v8600_v60, %v10262_v60   ;;  %v7591_v59 = vphi %v8598_v59, %v10261_v59   ;;  %v7587_v58 = vphi %v8596_v58, %v10260_v58   ;;  %v7583_v57 = vphi %v8594_v57, %v10259_v57   ;;  %v7571_v53 = vphi %v8588_v53, %v10256_v53   ;;  %v7563_v50 = vphi %v8584_v50, %v10254_v50   ;;  %v7559_v49 = vphi %v8582_v49, %v10253_v49   ;;  %v7555_v48 = vphi %v8580_v48, %v10252_v48   ;;  %v7551_v47 = vphi %v8578_v47, %v10251_v47   ;;  %v7547_v46 = vphi %v8576_v46, %v10250_v46   ;;  %v7543_v45 = vphi %v8574_v45, %v10249_v45   ;;  %v7539_v44 = vphi %v8572_v44, %v10248_v44  }
 0x69b   : > { %10300 = vst [vmem:[#allocation64_spill] sm:$0xff] %v7543_v45  ;;  %s3620_s5 = scalar_lea.vmem [#allocation2], %s5479_s15  ;;  %s9775_s28 = scalar_lea.vmem [#allocation3], %s5479_s15 }
 0x69c   : > { %10301 = vst [vmem:[#allocation65_spill] sm:$0xff] %v7547_v46  ;;  %v5804_v52 = vld [vmem:[%s3620_s5 + $0x38] sm:$0xff]  ;;  %v5803_v54 = vld [vmem:[%s3620_s5 + $0x30] sm:$0xff]  ;;  %v5802_v21 = vld [vmem:[%s3620_s5 + $0x28] sm:$0xff] }
 0x69d   : > { %10302 = vst [vmem:[#allocation66_spill] sm:$0xff] %v7551_v47  ;;  %v3742_v56 = vsel %vm3695_vm2, %v5804_v52, 0  ;;  %v3739_v9 = vsel %vm3695_vm2, %v5803_v54, 0  ;;  %v3736_v37 = vsel %vm3695_vm2, %v5802_v21, 0  ;;  %v5801_v42 = vld [vmem:[%s3620_s5 + $0x20] sm:$0xff]  ;;  %v5800_v36 = vld [vmem:[%s3620_s5 + $0x18] sm:$0xff] }
 0x69e   : > { %10303 = vst [vmem:[#allocation67_spill] sm:$0xff] %v7555_v48  ;;  %3744 = vmatpush.bf16.xpose.msra.mxu0 %v3742_v56  ;;  %5829 = vmatpush.bf16.xpose.msra.mxu2 %v3742_v56  ;;  %v3733_v39 = vsel %vm3695_vm2, %v5801_v42, 0  ;;  %v3730_v41 = vsel %vm3695_vm2, %v5800_v36, 0  ;;  %v5799_v27 = vld [vmem:[%s3620_s5 + $0x10] sm:$0xff]  ;;  %v5798_v40 = vld [vmem:[%s3620_s5 + $0x8] sm:$0xff]  ;;  %v5797_v35 = vld [vmem:[%s3620_s5] sm:$0xff]  ;;  %v3793_v36 = vlaneseq }
 0x69f   : > { %10304 = vst [vmem:[#allocation68_spill] sm:$0xff] %v7559_v49  ;;  %v3727_v38 = vsel %vm3695_vm2, %v5799_v27, 0  ;;  %v3724_v34 = vsel %vm3695_vm2, %v5798_v40, 0  ;;  %v3721_v43 = vsel %vm3695_vm2, %v5797_v35, 0  ;;  %v10322_v52 = vld [vmem:[#allocation7_spill] sm:$0xff]  ;;  %v10323_v56 = vld [vmem:[#allocation10_spill] sm:$0xff] }
 0x6a0   : > { %10305 = vst [vmem:[#allocation69_spill] sm:$0xff] %v7563_v50  ;;  %v10324_v54 = vld [vmem:[#allocation8_spill] sm:$0xff]  ;;  %v10326_v21 = vld [vmem:[#allocation9_spill] sm:$0xff]  ;;  %v9728_v27 = vand.u32 127, %v3793_v36 }
 0x6a1   : > { %10307 = vst [vmem:[#allocation15_spill] sm:$0xff] %v10306_v51  ;;  %v10328_v42 = vld [vmem:[#allocation13_spill] sm:$0xff] }
 0x6a2   : > { %10308 = vst [vmem:[#allocation70_spill] sm:$0xff] %v7571_v53 }
 0x6a3   : > { %10311 = vst [vmem:[#allocation16_spill] sm:$0xff] %v10310_v4 }
 0x6a4   : > { %10312 = vst [vmem:[#allocation17_spill] sm:$0xff] %v7583_v57 }
 0x6a5   : > { %10313 = vst [vmem:[#allocation71_spill] sm:$0xff] %v7603_v62 }
 0x6a6   : > { %10314 = vst [vmem:[#allocation72_spill] sm:$0xff] %v7607_v63  ;;  %3745 = vmatpush.bf16.xpose.msra.mxu0 %v3739_v9  ;;  %5830 = vmatpush.bf16.xpose.msra.mxu2 %v3739_v9  ;;  %v10325_v9 = vld [vmem:[#allocation11_spill] sm:$0xff] }
 0x6a7   : > { %10315 = vst [vmem:[#allocation73_spill] sm:$0xff] %v7611_v0 }
 0x6a8   : > { %10316 = vst [vmem:[#allocation74_spill] sm:$0xff] %v7615_v1 }
 0x6a9   : > { %10317 = vst [vmem:[#allocation75_spill] sm:$0xff] %v7619_v2 }
 0x6aa   : > { %10318 = vst [vmem:[#allocation76_spill] sm:$0xff] %v7623_v3 }
 0x6ab   : > { %10319 = vst [vmem:[#allocation77_spill] sm:$0xff] %v7627_v5 }
 0x6ac   : > { %10320 = vst [vmem:[#allocation78_spill] sm:$0xff] %v7631_v6 }
 0x6ad   : > { %10321 = vst [vmem:[#allocation79_spill] sm:$0xff] %v7643_v10 }
 0x6ae   : > { %3746 = vmatpush.bf16.xpose.msra.mxu0 %v3736_v37  ;;  %5831 = vmatpush.bf16.xpose.msra.mxu2 %v3736_v37  ;;  %v10327_v37 = vld [vmem:[#allocation12_spill] sm:$0xff] }
 0x6b6   : > { %3747 = vmatpush.bf16.xpose.msra.mxu0 %v3733_v39  ;;  %5832 = vmatpush.bf16.xpose.msra.mxu2 %v3733_v39  ;;  %v10329_v39 = vld [vmem:[#allocation14_spill] sm:$0xff] }
 0x6be   : > { %3748 = vmatpush.bf16.xpose.msra.mxu0 %v3730_v41  ;;  %5833 = vmatpush.bf16.xpose.msra.mxu2 %v3730_v41  ;;  %v9726_v41 = vshrl.u32 %v3793_v36, 7 }
 0x6c0   : > { %vm3812_vm3 = vcmp.le.s32.totalorder %v9728_v27, %v9726_v41  ;;  %v3799_v44 = vadd.s32 40, %v9726_v41  ;;  %v3805_v45 = vadd.s32 88, %v9726_v41  ;;  %v3801_v47 = vadd.s32 56, %v9726_v41 }
 0x6c1   : > { %v3807_v63 = vadd.s32 104, %v9726_v41 }
 0x6c2   : > { %vm3817_vm9 = vcmp.le.s32.totalorder %v9728_v27, %v3799_v44  ;;  %vm3823_vm10 = vcmp.le.s32.totalorder %v9728_v27, %v3805_v45  ;;  %v3806_v44 = vadd.s32 96, %v9726_v41  ;;  %v5811_v45 = vld [vmem:[%s9775_s28 + $0x30] sm:$0xff]  ;;  %vm3819_vm13 = vcmp.le.s32.totalorder %v9728_v27, %v3801_v47 }
 0x6c3   : > { %vm3825_vm14 = vcmp.le.s32.totalorder %v9728_v27, %v3807_v63 }
 0x6c4   : > { %vm3824_vm12 = vcmp.le.s32.totalorder %v9728_v27, %v3806_v44  ;;  %v3802_v44 = vadd.s32 64, %v9726_v41 }
 0x6c6   : > { %3749 = vmatpush.bf16.xpose.msra.mxu0 %v3727_v38  ;;  %5834 = vmatpush.bf16.xpose.msra.mxu2 %v3727_v38  ;;  %vm3820_vm15 = vcmp.le.s32.totalorder %v9728_v27, %v3802_v44 }
 0x6ce   : > { %3750 = vmatpush.bf16.xpose.msra.mxu0 %v3724_v34  ;;  %5835 = vmatpush.bf16.xpose.msra.mxu2 %v3724_v34  ;;  %v3795_v34 = vadd.s32 8, %v9726_v41 }
 0x6d0   : > { %vm3813_vm4 = vcmp.le.s32.totalorder %v9728_v27, %v3795_v34 }
 0x6d6   : > { %3751 = vmatpush.bf16.xpose.msra.mxu0 %v3721_v43  ;;  %5836 = vmatpush.bf16.xpose.msra.mxu2 %v3721_v43 }
 0x6dd   : > { %5513 = vmatmul.msk.bf16.vlgmr.msra.gmra.mxu0 %vm3695_vm2, %v10322_v52  ;;  %5516 = vmatmul.msk.bf16.vlgmr.msra.gmra.mxu2 %vm3695_vm2, %v10323_v56  ;;  %v3796_v56 = vadd.s32 16, %v9726_v41 }
 0x6df   : > { %vm3814_vm5 = vcmp.le.s32.totalorder %v9728_v27, %v3796_v56  ;;  %v3804_v56 = vadd.s32 80, %v9726_v41 }
 0x6e1   : > { %vm3822_vm8 = vcmp.le.s32.totalorder %v9728_v27, %v3804_v56 }
 0x6ed   : > { %5514 = vmatmul.msk.bf16.gmra.mxu0 %vm3695_vm2, %v10324_v54  ;;  %5517 = vmatmul.msk.bf16.gmra.mxu2 %vm3695_vm2, %v10325_v9 }
 0x6fd   : > { %5515 = vmatmul.msk.bf16.gmra.mxu0 %vm3695_vm2, %v10326_v21  ;;  %5518 = vmatmul.msk.bf16.gmra.mxu2 %vm3695_vm2, %v10327_v37  ;;  %v3797_v37 = vadd.s32 24, %v9726_v41 }
 0x6ff   : > { %vm3815_vm6 = vcmp.le.s32.totalorder %v9728_v27, %v3797_v37 }
 0x70d   : > { %5519 = vmatmul.msk.bf16.gmra.mxu2 %vm3695_vm2, %v10328_v42 }
 0x71d   : > { %5520 = vmatmul.msk.bf16.gmra.mxu2 %vm3695_vm2, %v10329_v39 }
 0x75a   : > { %v3753_v38 = vpop.f32.mrf.mxu0 }
 0x75b   : > { %v9732_v40 = vsel %vm3812_vm3, %v3753_v38, -inf  ;;  %v3798_v38 = vadd.s32 32, %v9726_v41 }
 0x75c   : > { %3844 = vmax.xlane.f32.xlu0 %v9732_v40 }
 0x75d   : > { %vm3816_vm7 = vcmp.le.s32.totalorder %v9728_v27, %v3798_v38 }
 0x760   : > { %v3768_v35 = vpop.f32.mrf.mxu2 }
 0x762   : > { %v3755_v43 = vpop.f32.mrf.mxu0 }
 0x763   : > { %v9737_v52 = vsel %vm3813_vm4, %v3755_v43, -inf }
 0x764   : > { %3846 = vmax.xlane.f32.xlu0 %v9737_v52 }
 0x768   : > { %v3770_v54 = vpop.f32.mrf.mxu2 }
 0x769   : > { %v9790_v48 = vsel %vm3819_vm13, %v3770_v54, -inf }
 0x76a   : > { %v3758_v9 = vpop.f32.mrf.mxu0 }
 0x76b   : > { %v9742_v21 = vsel %vm3814_vm5, %v3758_v9, -inf }
 0x76c   : > { %3848 = vmax.xlane.f32.xlu1 %v9742_v21 }
 0x770   : > { %v3773_v42 = vpop.f32.mrf.mxu2 }
 0x771   : > { %v9800_v63 = vsel %vm3820_vm15, %v3773_v42, -inf }
 0x772   : > { %v3760_v39 = vpop.f32.mrf.mxu0 }
 0x773   : > { %v9747_v36 = vsel %vm3815_vm6, %v3760_v39, -inf }
 0x774   : > { %3850 = vmax.xlane.f32.xlu1 %v9747_v36 }
 0x778   : > { %v3775_v34 = vpop.f32.mrf.mxu2 }
 0x77a   : > { %v3763_v43 = vpop.f32.mrf.mxu0 }
 0x77b   : > { %v9753_v9 = vsel %vm3816_vm7, %v3763_v43, -inf  ;;  %v3800_v43 = vadd.s32 48, %v9726_v41 }
 0x77c   : > { %3852 = vmax.xlane.f32.xlu0 %v9753_v9 }
 0x77d   : > { %vm3818_vm11 = vcmp.le.s32.totalorder %v9728_v27, %v3800_v43 }
 0x780   : > { %v3778_v37 = vpop.f32.mrf.mxu2 }
 0x781   : > { %v9759_v39 = vsel %vm3822_vm8, %v3778_v37, -inf  ;;  %v5812_v37 = vld [vmem:[%s9775_s28 + $0x38] sm:$0xff] }
 0x782   : > { %3864 = vmax.xlane.f32.xlu2 %v9759_v39  ;;  %v3765_v38 = vpop.f32.mrf.mxu0  ;;  %4124 = vmatpush.bf16.msra.mxu1 %v5812_v37 }
 0x783   : > { %v9763_v50 = vsel %vm3817_vm9, %v3765_v38, -inf  ;;  %v9778_v38 = vsel %vm3818_vm11, %v3768_v35, -inf  ;;  %5837 = vmatpush.bf16.msra.mxu3 %v5812_v37 }
 0x784   : > { %3854 = vmax.xlane.f32.xlu1 %v9763_v50 }
 0x786   : > { %4125 = vmatpush.bf16.msra.mxu1 %v5811_v45 }
 0x787   : > { %5838 = vmatpush.bf16.msra.mxu3 %v5811_v45  ;;  %v3808_v45 = vadd.s32 112, %v9726_v41 }
 0x788   : > { %v3780_v56 = vpop.f32.mrf.mxu2 }
 0x789   : > { %v9769_v62 = vsel %vm3823_vm10, %v3780_v56, -inf  ;;  %vm3826_vm0 = vcmp.le.s32.totalorder %v9728_v27, %v3808_v45 }
 0x78a   : > { %3866 = vmax.xlane.f32.xlu2 %v9769_v62 }
 0x78c   : > { %3856 = vmax.xlane.f32.xlu1 %v9778_v38 }
 0x790   : > { %v3783_v43 = vpop.f32.mrf.mxu2 }
 0x791   : > { %v9783_v56 = vsel %vm3824_vm12, %v3783_v43, -inf  ;;  %v3803_v43 = vadd.s32 72, %v9726_v41 }
 0x792   : > { %3868 = vmax.xlane.f32.xlu2 %v9783_v56 }
 0x793   : > { %vm3821_vm1 = vcmp.le.s32.totalorder %v9728_v27, %v3803_v43  ;;  %v5808_v43 = vld [vmem:[%s9775_s28 + $0x18] sm:$0xff] }
 0x794   : > { %v9810_v42 = vsel %vm3821_vm1, %v3775_v34, -inf  ;;  %v5806_v34 = vld [vmem:[%s9775_s28 + $0x8] sm:$0xff] }
 0x798   : > { %v3785_v35 = vpop.f32.mrf.mxu2 }
 0x799   : > { %v9792_v37 = vsel %vm3825_vm14, %v3785_v35, -inf  ;;  %v3809_v35 = vadd.s32 120, %v9726_v41  ;;  %v5809_v41 = vld [vmem:[%s9775_s28 + $0x20] sm:$0xff] }
 0x79a   : > { %3858 = vmax.xlane.f32.xlu2 %v9790_v48  ;;  %3870 = vmax.xlane.f32.xlu0 %v9792_v37 }
 0x79b   : > { %vm3827_vm3 = vcmp.le.s32.totalorder %v9728_v27, %v3809_v35  ;;  %v5807_v27 = vld [vmem:[%s9775_s28 + $0x10] sm:$0xff]  ;;  %v5805_v35 = vld [vmem:[%s9775_s28] sm:$0xff] }
 0x7a0   : > { %v3788_v47 = vpop.f32.mrf.mxu2 }
 0x7a1   : > { %v9802_v54 = vsel %vm3826_vm0, %v3788_v47, -inf  ;;  %v5810_v47 = vld [vmem:[%s9775_s28 + $0x28] sm:$0xff] }
 0x7a2   : > { %3860 = vmax.xlane.f32.xlu2 %v9800_v63  ;;  %3872 = vmax.xlane.f32.xlu0 %v9802_v54 }
 0x7a3   : > { %4126 = vmatpush.bf16.msra.mxu1 %v5810_v47  ;;  %5839 = vmatpush.bf16.msra.mxu3 %v5810_v47 }
 0x7a7   : > { %4127 = vmatpush.bf16.msra.mxu1 %v5809_v41  ;;  %5840 = vmatpush.bf16.msra.mxu3 %v5809_v41 }
 0x7a8   : > { %v3790_v44 = vpop.f32.mrf.mxu2 }
 0x7a9   : > { %v9812_v45 = vsel %vm3827_vm3, %v3790_v44, -inf }
 0x7aa   : > { %3862 = vmax.xlane.f32.xlu0 %v9810_v42  ;;  %3874 = vmax.xlane.f32.xlu1 %v9812_v45 }
 0x7ab   : > { %4128 = vmatpush.bf16.msra.mxu1 %v5808_v43  ;;  %5841 = vmatpush.bf16.msra.mxu3 %v5808_v43 }
 0x7af   : > { %4129 = vmatpush.bf16.msra.mxu1 %v5807_v27  ;;  %5842 = vmatpush.bf16.msra.mxu3 %v5807_v27 }
 0x7b3   : > { %4130 = vmatpush.bf16.msra.mxu1 %v5806_v34  ;;  %5843 = vmatpush.bf16.msra.mxu3 %v5806_v34 }
 0x7b7   : > { %4131 = vmatpush.bf16.msra.mxu1 %v5805_v35  ;;  %5844 = vmatpush.bf16.msra.mxu3 %v5805_v35 }
 0x7cf   : > { %v3845_v44 = vpop.xlane.xlu0 %3844 }
 0x7d0   : > { %v9823_v46 = vmax.f32 %v7727_v33, %v3845_v44 }
 0x7d2   : > { %v3940_v47 = vsub.f32 %v9732_v40, %v9823_v46 }
 0x7d4   : > { %v3956_v41 = vmul.f32 1.442695, %v3940_v47 }
 0x7d6   : > { %6759 = vpow2.f32 %v3956_v41 }
 0x7d7   : > { %v3847_v51 = vpop.xlane.xlu0 %3846 }
 0x7d8   : > { %v9828_v43 = vmax.f32 %v7723_v32, %v3847_v51 }
 0x7da   : > { %v3941_v27 = vsub.f32 %v9737_v52, %v9828_v43 }
 0x7dc   : > { %v3958_v34 = vmul.f32 1.442695, %v3941_v27  ;;  %v6760_v5 = vpop.eup %6759 }
 0x7dd   : > { %4004 = vadd.xlane.f32.xlu1 %v6760_v5 }
 0x7de   : > { %6761 = vpow2.f32 %v3958_v34 }
 0x7df   : > { %v3849_v35 = vpop.xlane.xlu1 %3848 }
 0x7e0   : > { %v9833_v44 = vmax.f32 %v7719_v31, %v3849_v35 }
 0x7e2   : > { %v3942_v40 = vsub.f32 %v9742_v21, %v9833_v44 }
 0x7e4   : > { %v3960_v47 = vmul.f32 1.442695, %v3942_v40  ;;  %v6762_v41 = vpop.eup %6761 }
 0x7e5   : > { %4006 = vadd.xlane.f32.xlu2 %v6762_v41  ;;  %v4068_v1 = vpack.c.bf16 %v6762_v41, %v6760_v5 }
 0x7e6   : > { %6763 = vpow2.f32 %v3960_v47 }
 0x7e7   : > { %v3851_v51 = vpop.xlane.xlu1 %3850  ;;  %4132 = vmatmul.bf16.vlgmr.msra.gmra.mxu1 %v4068_v1 }
 0x7e8   : > { %v9838_v52 = vmax.f32 %v7715_v30, %v3851_v51 }
 0x7ea   : > { %v3943_v27 = vsub.f32 %v9747_v36, %v9838_v52 }
 0x7ec   : > { %v3962_v34 = vmul.f32 1.442695, %v3943_v27  ;;  %v6764_v2 = vpop.eup %6763 }
 0x7ed   : > { %4008 = vadd.xlane.f32.xlu0 %v6764_v2 }
 0x7ee   : > { %6765 = vpow2.f32 %v3962_v34 }
 0x7ef   : > { %v3853_v35 = vpop.xlane.xlu0 %3852 }
 0x7f0   : > { %v9843_v21 = vmax.f32 %v7711_v29, %v3853_v35 }
 0x7f2   : > { %v3944_v5 = vsub.f32 %v9753_v9, %v9843_v21 }
 0x7f4   : > { %v6766_v40 = vpop.eup %6765  ;;  %v3964_v51 = vmul.f32 1.442695, %v3944_v5 }
 0x7f5   : > { %v3865_v0 = vpop.xlane.xlu2 %3864  ;;  %v4069_v1 = vpack.c.bf16 %v6766_v40, %v6764_v2 }
 0x7f6   : > { %v9848_v41 = vmax.f32 %v7687_v22, %v3865_v0  ;;  %6767 = vpow2.f32 %v3964_v51 }
 0x7f7   : > { %v3855_v47 = vpop.xlane.xlu1 %3854  ;;  %4137 = vmatmul.bf16.gmra.mxu1 %v4069_v1 }
 0x7f8   : > { %v9851_v36 = vmax.f32 %v7707_v28, %v3855_v47  ;;  %v3950_v34 = vsub.f32 %v9759_v39, %v9848_v41 }
 0x7fa   : > { %v3945_v27 = vsub.f32 %v9763_v50, %v9851_v36  ;;  %v3976_v9 = vmul.f32 1.442695, %v3950_v34 }
 0x7fc   : > { %v3966_v35 = vmul.f32 1.442695, %v3945_v27  ;;  %v6768_v39 = vpop.eup %6767 }
 0x7fd   : > { %v3867_v4 = vpop.xlane.xlu2 %3866 }
 0x7fe   : > { %v9858_v2 = vmax.f32 %v7683_v20, %v3867_v4  ;;  %6769 = vpow2.f32 %v3966_v35 }
 0x7ff   : > { %v3857_v0 = vpop.xlane.xlu1 %3856  ;;  %6771 = vpow2.f32 %v3976_v9 }
 0x800   : > { %v3951_v1 = vsub.f32 %v9769_v62, %v9858_v2  ;;  %v9863_v5 = vmax.f32 %v7703_v26, %v3857_v0 }
 0x802   : > { %v3978_v47 = vmul.f32 1.442695, %v3951_v1  ;;  %v3946_v50 = vsub.f32 %v9778_v38, %v9863_v5 }
 0x804   : > { %v3968_v27 = vmul.f32 1.442695, %v3946_v50  ;;  %v6770_v51 = vpop.eup %6769  ;;  %6773 = vpow2.f32 %v3978_v47 }
 0x805   : > { %v3869_v4 = vpop.xlane.xlu2 %3868  ;;  %v4070_v49 = vpack.c.bf16 %v6770_v51, %v6768_v39  ;;  %v6772_v34 = vpop.eup %6771 }
 0x806   : > { %6775 = vpow2.f32 %v3968_v27  ;;  %v9868_v35 = vmax.f32 %v7679_v19, %v3869_v4 }
 0x807   : > { %4142 = vmatmul.bf16.gmra.mxu1 %v4070_v49 }
 0x808   : > { %v3952_v38 = vsub.f32 %v9783_v56, %v9868_v35 }
 0x80a   : > { %v6774_v62 = vpop.eup %6773  ;;  %v3980_v27 = vmul.f32 1.442695, %v3952_v38 }
 0x80b   : > { %v4073_v0 = vpack.c.bf16 %v6774_v62, %v6772_v34 }
 0x80c   : > { %v6776_v53 = vpop.eup %6775 }
 0x80d   : > { %v3859_v1 = vpop.xlane.xlu2 %3858  ;;  %v3871_v6 = vpop.xlane.xlu0 %3870  ;;  %4157 = vmatmul.bf16.vlgmr.msra.gmra.mxu3 %v4073_v0  ;;  %4016 = vadd.xlane.f32.xlu1 %v6776_v53 }
 0x80e   : > { %v9873_v9 = vmax.f32 %v7699_v25, %v3859_v1  ;;  %v9876_v47 = vmax.f32 %v7675_v18, %v3871_v6 }
 0x810   : > { %v3947_v49 = vsub.f32 %v9790_v48, %v9873_v9  ;;  %v3953_v50 = vsub.f32 %v9792_v37, %v9876_v47 }
 0x812   : > { %v3970_v4 = vmul.f32 1.442695, %v3947_v49  ;;  %v3982_v10 = vmul.f32 1.442695, %v3953_v50 }
 0x814   : > { %6777 = vpow2.f32 %v3970_v4 }
 0x815   : > { %v3861_v3 = vpop.xlane.xlu2 %3860  ;;  %v3873_v56 = vpop.xlane.xlu0 %3872  ;;  %6779 = vpow2.f32 %v3980_v27  ;;  %4010 = vadd.xlane.f32.xlu1 %v6766_v40 }
 0x816   : > { %v9883_v0 = vmax.f32 %v7695_v24, %v3861_v3  ;;  %6781 = vpow2.f32 %v3982_v10  ;;  %v9888_v48 = vmax.f32 %v7671_v17, %v3873_v56 }
 0x818   : > { %v3948_v6 = vsub.f32 %v9800_v63, %v9883_v0  ;;  %v3954_v3 = vsub.f32 %v9802_v54, %v9888_v48 }
 0x81a   : > { %v3972_v1 = vmul.f32 1.442695, %v3948_v6  ;;  %v6778_v37 = vpop.eup %6777  ;;  %v3984_v6 = vmul.f32 1.442695, %v3954_v3  ;;  %v3894_v3 = vsub.f32 %v7719_v31, %v9833_v44 }
 0x81b   : > { %v6780_v38 = vpop.eup %6779  ;;  %4018 = vadd.xlane.f32.xlu2 %v6778_v37  ;;  %v4071_v49 = vpack.c.bf16 %v6778_v37, %v6776_v53 }
 0x81c   : > { %v6782_v50 = vpop.eup %6781  ;;  %6783 = vpow2.f32 %v3972_v1 }
 0x81d   : > { %v3863_v4 = vpop.xlane.xlu0 %3862  ;;  %v3875_v27 = vpop.xlane.xlu1 %3874  ;;  %v4074_v40 = vpack.c.bf16 %v6782_v50, %v6780_v38  ;;  %4147 = vmatmul.bf16.gmra.mxu1 %v4071_v49 }
 0x81e   : > { %v9893_v10 = vmax.f32 %v7691_v23, %v3863_v4  ;;  %v9896_v63 = vmax.f32 %v7667_v16, %v3875_v27 }
 0x81f   : > { %4162 = vmatmul.bf16.gmra.mxu3 %v4074_v40 }
 0x820   : > { %v3949_v56 = vsub.f32 %v9810_v42, %v9893_v10  ;;  %v3955_v53 = vsub.f32 %v9812_v45, %v9896_v63  ;;  %v3892_v45 = vsub.f32 %v7727_v33, %v9823_v46 }
 0x822   : > { %v3974_v1 = vmul.f32 1.442695, %v3949_v56  ;;  %v6784_v37 = vpop.eup %6783  ;;  %v3986_v57 = vmul.f32 1.442695, %v3955_v53 }
 0x823   : > { %4020 = vadd.xlane.f32.xlu0 %v6784_v37  ;;  %4012 = vadd.xlane.f32.xlu2 %v6768_v39  ;;  %v3908_v39 = vmul.f32 1.442695, %v3892_v45 }
 0x824   : > { %6785 = vpow2.f32 %v3974_v1 }
 0x825   : > { %6787 = vpow2.f32 %v3984_v6 }
 0x826   : > { %6789 = vpow2.f32 %v3986_v57  ;;  %v3893_v57 = vsub.f32 %v7723_v32, %v9828_v43 }
 0x827   : > { %6791 = vpow2.f32 %v3908_v39 }
 0x82a   : > { %v6786_v54 = vpop.eup %6785 }
 0x82b   : > { %v6788_v49 = vpop.eup %6787  ;;  %4024 = vadd.xlane.f32.xlu2 %v6772_v34  ;;  %4014 = vadd.xlane.f32.xlu0 %v6770_v51  ;;  %v4072_v4 = vpack.c.bf16 %v6786_v54, %v6784_v37  ;;  %v3910_v51 = vmul.f32 1.442695, %v3893_v57 }
 0x82c   : > { %v6790_v27 = vpop.eup %6789  ;;  %4022 = vadd.xlane.f32.xlu1 %v6786_v54 }
 0x82d   : > { %4152 = vmatmul.bf16.gmra.mxu1 %v4072_v4  ;;  %v4075_v42 = vpack.c.bf16 %v6790_v27, %v6788_v49  ;;  %v6792_v34 = vpop.eup %6791  ;;  %6793 = vpow2.f32 %v3910_v51  ;;  %v3895_v51 = vsub.f32 %v7715_v30, %v9838_v52 }
 0x82e   : > { %v4052_v32 = vmul.f32 %v7599_v61, %v6792_v34 }
 0x82f   : > { %4167 = vmatmul.bf16.gmra.mxu3 %v4075_v42 }
 0x833   : > { %4030 = vadd.xlane.f32.xlu2 %v6782_v50  ;;  %4026 = vadd.xlane.f32.xlu0 %v6774_v62  ;;  %v3988_v62 = vmul.f32 %v7663_v15, %v6792_v34  ;;  %v3912_v50 = vmul.f32 1.442695, %v3894_v3  ;;  %v6794_v56 = vpop.eup %6793  ;;  %v3898_v3 = vsub.f32 %v7703_v26, %v9863_v5  ;;  %v3897_v5 = vsub.f32 %v7707_v28, %v9851_v36 }
 0x834   : > { %4028 = vadd.xlane.f32.xlu1 %v6780_v38  ;;  %v3989_v46 = vmul.f32 %v7659_v14, %v6794_v56  ;;  %v4053_v54 = vmul.f32 %v7595_v60, %v6794_v56  ;;  %v3914_v60 = vmul.f32 1.442695, %v3895_v51 }
 0x83b   : > { %4032 = vadd.xlane.f32.xlu0 %v6788_v49 }
 0x83c   : > { %4034 = vadd.xlane.f32.xlu1 %v6790_v27 }
 0x850   : > { %v4005_v40 = vpop.xlane.xlu1 %4004 }
 0x851   : > { %v4036_v38 = vadd.f32 %v4005_v40, %v3988_v62  ;;  %v3920_v62 = vmul.f32 1.442695, %v3898_v3 }
 0x853   : > { %6795 = vrcp.f32 %v4036_v38 }
 0x854   : > { %6797 = vpow2.f32 %v3912_v50  ;;  %v3899_v50 = vsub.f32 %v7699_v25, %v9873_v9  ;;  %v3918_v9 = vmul.f32 1.442695, %v3897_v5 }
 0x856   : > { %v3922_v26 = vmul.f32 1.442695, %v3899_v50 }
 0x858   : > { %v4007_v33 = vpop.xlane.xlu2 %4006 }
 0x859   : > { %v4037_v43 = vadd.f32 %v4007_v33, %v3989_v46  ;;  %v6796_v1 = vpop.eup %6795 }
 0x85a   : > { %v6798_v31 = vpop.eup %6797 }
 0x85b   : > { %6799 = vrcp.f32 %v4037_v43  ;;  %v3990_v37 = vmul.f32 %v7655_v13, %v6798_v31  ;;  %v4054_v42 = vmul.f32 %v7591_v59, %v6798_v31  ;;  %v3896_v59 = vsub.f32 %v7711_v29, %v9843_v21 }
 0x85d   : > { %v3916_v52 = vmul.f32 1.442695, %v3896_v59  ;;  %v3907_v59 = vsub.f32 %v7667_v16, %v9896_v63 }
 0x860   : > { %v4009_v15 = vpop.xlane.xlu0 %4008 }
 0x861   : > { %v4038_v49 = vadd.f32 %v4009_v15, %v3990_v37  ;;  %v6800_v61 = vpop.eup %6799 }
 0x863   : > { %6801 = vrcp.f32 %v4038_v49 }
 0x864   : > { %v4133_v53 = vpop.f32.mrf.mxu1  ;;  %6803 = vpow2.f32 %v3914_v60 }
 0x865   : > { %v4173_v6 = vadd.f32 %v4133_v53, %v4052_v32  ;;  %6805 = vpow2.f32 %v3920_v62  ;;  %v3902_v32 = vsub.f32 %v7687_v22, %v9848_v41 }
 0x867   : > { %v4205_v44 = vmul.f32 %v6796_v1, %v4173_v6  ;;  %v3928_v25 = vmul.f32 1.442695, %v3902_v32 }
 0x869   : > { %4221 = vst.msk [vmem:[%s7841_s7] sm:$0xff] %vm3695_vm2, %v4205_v44  ;;  %v6802_v57 = vpop.eup %6801 }
 0x86a   : > { %v6804_v38 = vpop.eup %6803 }
 0x86b   : > { %v3991_v30 = vmul.f32 %v7651_v12, %v6804_v38  ;;  %v6806_v29 = vpop.eup %6805  ;;  %v4055_v21 = vmul.f32 %v7587_v58, %v6804_v38  ;;  %v3900_v12 = vsub.f32 %v7695_v24, %v9883_v0  ;;  %v3903_v58 = vsub.f32 %v7683_v20, %v9858_v2 }
 0x86c   : > { %v4135_v14 = vpop.f32.mrf.mxu1  ;;  %v3994_v22 = vmul.f32 %v7639_v8, %v6806_v29  ;;  %v3905_v24 = vsub.f32 %v7675_v18, %v9876_v47  ;;  %v3904_v0 = vsub.f32 %v7679_v19, %v9868_v35  ;;  %v3901_v20 = vsub.f32 %v7691_v23, %v9893_v10 }
 0x86d   : > { %v4174_v4 = vadd.f32 %v4135_v14, %v4053_v54  ;;  %v3924_v44 = vmul.f32 1.442695, %v3900_v12  ;;  %v3930_v49 = vmul.f32 1.442695, %v3903_v58  ;;  %v4058_v19 = vmul.f32 %v10309_v55, %v6806_v29  ;;  %v10332_v55 = vld [vmem:[#allocation79_spill] sm:$0xff] }
 0x86e   : > { %v3934_v14 = vmul.f32 1.442695, %v3905_v24  ;;  %v3906_v23 = vsub.f32 %v7671_v17, %v9888_v48 }
 0x86f   : > { %v4206_v27 = vmul.f32 %v6800_v61, %v4174_v4  ;;  %v3932_v61 = vmul.f32 1.442695, %v3904_v0 }
 0x871   : > { %4222 = vst.msk [vmem:[%s7841_s7 + $0x8] sm:$0xff] %vm3695_vm2, %v4206_v27 }
 0x874   : > { %v4138_v45 = vpop.f32.mrf.mxu1 }
 0x875   : > { %v4175_v39 = vadd.f32 %v4138_v45, %v4054_v42  ;;  %v3926_v42 = vmul.f32 1.442695, %v3901_v20 }
 0x877   : > { %v4207_v34 = vmul.f32 %v6802_v57, %v4175_v39 }
 0x879   : > { %4223 = vst.msk [vmem:[%s7841_s7 + $0x10] sm:$0xff] %vm3695_vm2, %v4207_v34  ;;  %v10331_v34 = vld [vmem:[#allocation76_spill] sm:$0xff] }
 0x87c   : > { %v4140_v13 = vpop.f32.mrf.mxu1 }
 0x87d   : > { %v4176_v53 = vadd.f32 %v4140_v13, %v4055_v21 }
 0x880   : > { %v4017_v40 = vpop.xlane.xlu1 %4016 }
 0x881   : > { %v4042_v31 = vadd.f32 %v4017_v40, %v3994_v22 }
 0x884   : > { %v4143_v56 = vpop.f32.mrf.mxu1 }
 0x888   : > { %v4011_v33 = vpop.xlane.xlu1 %4010 }
 0x889   : > { %v4039_v46 = vadd.f32 %v4011_v33, %v3991_v30  ;;  %v3936_v30 = vmul.f32 1.442695, %v3906_v23  ;;  %v10333_v33 = vld [vmem:[#allocation78_spill] sm:$0xff] }
 0x88b   : > { %6807 = vrcp.f32 %v4039_v46 }
 0x88c   : > { %6809 = vpow2.f32 %v3916_v52  ;;  %v9939_v36 = vpop.f32.mrf.mxu1 }
 0x88d   : > { %6811 = vpow2.f32 %v3922_v26 }
 0x88e   : > { %v4019_v43 = vpop.xlane.xlu2 %4018  ;;  %6813 = vpow2.f32 %v3928_v25 }
 0x88f   : > { %6815 = vpow2.f32 %v3918_v9  ;;  %v10335_v9 = vld [vmem:[#allocation68_spill] sm:$0xff] }
 0x890   : > { %v9937_v41 = vpop.f32.mrf.mxu3  ;;  %6817 = vrcp.f32 %v4042_v31 }
 0x891   : > { %v6808_v6 = vpop.eup %6807  ;;  %6819 = vpow2.f32 %v3924_v44  ;;  %v10338_v44 = vld [vmem:[#allocation75_spill] sm:$0xff] }
 0x892   : > { %v6810_v1 = vpop.eup %6809  ;;  %v4208_v28 = vmul.f32 %v6808_v6, %v4176_v53  ;;  %v10336_v6 = vld [vmem:[#allocation16_spill] sm:$0xff] }
 0x893   : > { %v6812_v8 = vpop.eup %6811  ;;  %v3992_v15 = vmul.f32 %v7647_v11, %v6810_v1 }
 0x894   : > { %4224 = vst.msk [vmem:[%s7841_s7 + $0x18] sm:$0xff] %vm3695_vm2, %v4208_v28  ;;  %v3995_v18 = vmul.f32 %v7635_v7, %v6812_v8  ;;  %v6814_v4 = vpop.eup %6813  ;;  %v10330_v7 = vld [vmem:[#allocation17_spill] sm:$0xff]  ;;  %v10337_v28 = vld [vmem:[#allocation73_spill] sm:$0xff] }
 0x895   : > { %v6816_v11 = vpop.eup %6815  ;;  %v4056_v10 = vmul.f32 %v10330_v7, %v6810_v1  ;;  %v3998_v60 = vmul.f32 %v10331_v34, %v6814_v4  ;;  %v4062_v53 = vmul.f32 %v10335_v9, %v6814_v4 }
 0x896   : > { %v4013_v37 = vpop.xlane.xlu2 %4012  ;;  %v4021_v54 = vpop.xlane.xlu0 %4020  ;;  %v4043_v35 = vadd.f32 %v4019_v43, %v3995_v18  ;;  %v3993_v13 = vmul.f32 %v10332_v55, %v6816_v11  ;;  %v3938_v43 = vmul.f32 1.442695, %v3907_v59  ;;  %v4057_v1 = vmul.f32 %v10336_v6, %v6816_v11  ;;  %v10343_v55 = vld [vmem:[#allocation67_spill] sm:$0xff] }
 0x897   : > { %v4040_v2 = vadd.f32 %v4013_v37, %v3992_v15  ;;  %v6818_v39 = vpop.eup %6817  ;;  %v4177_v3 = vadd.f32 %v4143_v56, %v4056_v10  ;;  %v10334_v56 = vld [vmem:[#allocation70_spill] sm:$0xff] }
 0x898   : > { %v9953_v47 = vpop.f32.mrf.mxu3  ;;  %v6820_v57 = vpop.eup %6819  ;;  %v4059_v26 = vmul.f32 %v10334_v56, %v6812_v8  ;;  %v4183_v8 = vadd.f32 %v9937_v41, %v4062_v53  ;;  %v10339_v37 = vld [vmem:[#allocation74_spill] sm:$0xff]  ;;  %v4178_v20 = vadd.f32 %v9939_v36, %v4057_v1  ;;  %v10346_v56 = vld [vmem:[#allocation71_spill] sm:$0xff]  ;;  %v10348_v53 = vld [vmem:[#allocation64_spill] sm:$0xff] }
 0x899   : > { %6821 = vrcp.f32 %v4040_v2  ;;  %v3996_v46 = vmul.f32 %v10333_v33, %v6820_v57 }
 0x89a   : > { %v4148_v27 = vpop.f32.mrf.mxu1  ;;  %6823 = vpow2.f32 %v3930_v49 }
 0x89b   : > { %v4179_v45 = vadd.f32 %v4148_v27, %v4058_v19  ;;  %6825 = vpow2.f32 %v3934_v14  ;;  %v4044_v29 = vadd.f32 %v4021_v54, %v3996_v46  ;;  %v10340_v19 = vld [vmem:[#allocation77_spill] sm:$0xff]  ;;  %v10341_v27 = vld [vmem:[#allocation15_spill] sm:$0xff] }
 0x89c   : > { %6827 = vpow2.f32 %v3932_v61 }
 0x89d   : > { %v4211_v51 = vmul.f32 %v6818_v39, %v4179_v45  ;;  %6829 = vrcp.f32 %v4043_v35 }
 0x89e   : > { %v4025_v40 = vpop.xlane.xlu2 %4024  ;;  %v4015_v62 = vpop.xlane.xlu0 %4014  ;;  %6831 = vpow2.f32 %v3926_v42  ;;  %v4060_v42 = vmul.f32 %v10341_v27, %v6820_v57  ;;  %v10344_v57 = vld [vmem:[#allocation72_spill] sm:$0xff] }
 0x89f   : > { %v6822_v38 = vpop.eup %6821  ;;  %4227 = vst.msk [vmem:[%s7841_s7 + $0x30] sm:$0xff] %vm3695_vm2, %v4211_v51  ;;  %v4046_v17 = vadd.f32 %v4025_v40, %v3998_v60  ;;  %v4041_v48 = vadd.f32 %v4015_v62, %v3993_v13  ;;  %v4023_v50 = vpop.xlane.xlu1 %4022  ;;  %v10342_v51 = vld [vmem:[#allocation65_spill] sm:$0xff]  ;;  %v10345_v62 = vld [vmem:[#allocation66_spill] sm:$0xff] }
 0x8a0   : > { %v4209_v52 = vmul.f32 %v6822_v38, %v4177_v3  ;;  %v6824_v32 = vpop.eup %6823 }
 0x8a1   : > { %6833 = vrcp.f32 %v4046_v17  ;;  %v6826_v5 = vpop.eup %6825  ;;  %v3999_v24 = vmul.f32 %v10338_v44, %v6824_v32  ;;  %v4063_v13 = vmul.f32 %v10343_v55, %v6824_v32 }
 0x8a2   : > { %4225 = vst.msk [vmem:[%s7841_s7 + $0x20] sm:$0xff] %vm3695_vm2, %v4209_v52  ;;  %6835 = vrcp.f32 %v4041_v48  ;;  %v4163_v21 = vpop.f32.mrf.mxu3  ;;  %v4150_v16 = vpop.f32.mrf.mxu1  ;;  %v4001_v58 = vmul.f32 %v10337_v28, %v6826_v5  ;;  %v4065_v34 = vmul.f32 %v10342_v51, %v6826_v5 }
 0x8a3   : > { %v6828_v63 = vpop.eup %6827  ;;  %v4180_v25 = vadd.f32 %v4150_v16, %v4059_v26  ;;  %6837 = vpow2.f32 %v3936_v30  ;;  %v10347_v16 = vld [vmem:[#allocation69_spill] sm:$0xff] }
 0x8a4   : > { %v6830_v12 = vpop.eup %6829  ;;  %6839 = vrcp.f32 %v4044_v29  ;;  %v4000_v54 = vmul.f32 %v10339_v37, %v6828_v63  ;;  %v4064_v38 = vmul.f32 %v10345_v62, %v6828_v63 }
 0x8a5   : > { %v6832_v22 = vpop.eup %6831  ;;  %v4212_v31 = vmul.f32 %v6830_v12, %v4180_v25  ;;  %6841 = vpow2.f32 %v3938_v43 }
 0x8a6   : > { %v4031_v0 = vpop.xlane.xlu2 %4030  ;;  %v4027_v15 = vpop.xlane.xlu0 %4026  ;;  %v3997_v41 = vmul.f32 %v10340_v19, %v6832_v22  ;;  %v4185_v46 = vadd.f32 %v4163_v21, %v4064_v38  ;;  %v4061_v63 = vmul.f32 %v10347_v16, %v6832_v22 }
 0x8a7   : > { %v6834_v49 = vpop.eup %6833  ;;  %4228 = vst.msk [vmem:[%s7841_s7 + $0x38] sm:$0xff] %vm3695_vm2, %v4212_v31  ;;  %v4049_v2 = vadd.f32 %v4031_v0, %v4001_v58  ;;  %v4047_v14 = vadd.f32 %v4027_v15, %v3999_v24  ;;  %v4029_v18 = vpop.xlane.xlu1 %4028  ;;  %v10349_v58 = vld [vmem:[#allocation63_spill] sm:$0xff] }
 0x8a8   : > { %v6836_v4 = vpop.eup %6835  ;;  %v4215_v61 = vmul.f32 %v6834_v49, %v4183_v8  ;;  %v4048_v11 = vadd.f32 %v4029_v18, %v4000_v54  ;;  %v4045_v39 = vadd.f32 %v4023_v50, %v3997_v41  ;;  %v4184_v50 = vadd.f32 %v9953_v47, %v4063_v13 }
 0x8a9   : > { %v4210_v35 = vmul.f32 %v6836_v4, %v4178_v20  ;;  %6843 = vrcp.f32 %v4049_v2  ;;  %v6838_v45 = vpop.eup %6837 }
 0x8aa   : > { %4231 = vst.msk [vmem:[%s7841_s7 + $0x50] sm:$0xff] %vm3695_vm2, %v4215_v61  ;;  %6845 = vrcp.f32 %v4047_v14  ;;  %v4165_v36 = vpop.f32.mrf.mxu3  ;;  %v4153_v23 = vpop.f32.mrf.mxu1  ;;  %v4002_v40 = vmul.f32 %v10344_v57, %v6838_v45  ;;  %v4066_v6 = vmul.f32 %v10348_v53, %v6838_v45 }
 0x8ab   : > { %4226 = vst.msk [vmem:[%s7841_s7 + $0x28] sm:$0xff] %vm3695_vm2, %v4210_v35  ;;  %6847 = vrcp.f32 %v4048_v11  ;;  %v4181_v7 = vadd.f32 %v4153_v23, %v4060_v42  ;;  %v6840_v10 = vpop.eup %6839  ;;  %v4186_v59 = vadd.f32 %v4165_v36, %v4065_v34 }
 0x8ac   : > { %v6842_v60 = vpop.eup %6841  ;;  %6849 = vrcp.f32 %v4045_v39 }
 0x8ad   : > { %v4213_v3 = vmul.f32 %v6840_v10, %v4181_v7  ;;  %v4003_v26 = vmul.f32 %v10346_v56, %v6842_v60  ;;  %v4067_v44 = vmul.f32 %v10349_v58, %v6842_v60 }
 0x8ae   : > { %v4033_v17 = vpop.xlane.xlu0 %4032 }
 0x8af   : > { %v6844_v48 = vpop.eup %6843  ;;  %4229 = vst.msk [vmem:[%s7841_s7 + $0x40] sm:$0xff] %vm3695_vm2, %v4213_v3  ;;  %v4050_v30 = vadd.f32 %v4033_v17, %v4002_v40  ;;  %v4035_v52 = vpop.xlane.xlu1 %4034 }
 0x8b0   : > { %v6846_v33 = vpop.eup %6845  ;;  %v4218_v32 = vmul.f32 %v6844_v48, %v4186_v59  ;;  %v4051_v47 = vadd.f32 %v4035_v52, %v4003_v26 }
 0x8b1   : > { %v6848_v5 = vpop.eup %6847  ;;  %v4216_v29 = vmul.f32 %v6846_v33, %v4184_v50  ;;  %6851 = vrcp.f32 %v4050_v30 }
 0x8b2   : > { %v4217_v43 = vmul.f32 %v6848_v5, %v4185_v46  ;;  %4234 = vst.msk [vmem:[%s7841_s7 + $0x68] sm:$0xff] %vm3695_vm2, %v4218_v32  ;;  %v4168_v25 = vpop.f32.mrf.mxu3  ;;  %v4155_v12 = vpop.f32.mrf.mxu1  ;;  %6853 = vrcp.f32 %v4051_v47 }
 0x8b3   : > { %4232 = vst.msk [vmem:[%s7841_s7 + $0x58] sm:$0xff] %vm3695_vm2, %v4216_v29  ;;  %v4182_v9 = vadd.f32 %v4155_v12, %v4061_v63  ;;  %v6850_v21 = vpop.eup %6849  ;;  %v4187_v31 = vadd.f32 %v4168_v25, %v4066_v6 }
 0x8b4   : > { %4233 = vst.msk [vmem:[%s7841_s7 + $0x60] sm:$0xff] %vm3695_vm2, %v4217_v43 }
 0x8b5   : > { %v4214_v1 = vmul.f32 %v6850_v21, %v4182_v9 }
 0x8b7   : > { %v6852_v22 = vpop.eup %6851  ;;  %4230 = vst.msk [vmem:[%s7841_s7 + $0x48] sm:$0xff] %vm3695_vm2, %v4214_v1 }
 0x8b8   : > { %v4219_v28 = vmul.f32 %v6852_v22, %v4187_v31  ;;  %v6854_v0 = vpop.eup %6853 }
 0x8ba   : > { %4235 = vst.msk [vmem:[%s7841_s7 + $0x70] sm:$0xff] %vm3695_vm2, %v4219_v28  ;;  %v4170_v24 = vpop.f32.mrf.mxu3 }
 0x8bb   : > { %v4188_v8 = vadd.f32 %v4170_v24, %v4067_v44 }
 0x8bd   : > { %v4220_v15 = vmul.f32 %v6854_v0, %v4188_v8 }
 0x8bf   : > { %4236 = vst.msk [vmem:[%s7841_s7 + $0x78] sm:$0xff] %vm3695_vm2, %v4220_v15 }
 0x8c0 PF: > { %s16_s19 = sadd.s32 1, %s7339_s19   ;;  %s10350_s12 = smov %s7315_s13 }
 0x8c1   : > { %p13_p5 = scmp.ge.s32.totalorder %s16_s19, 10   ;;  %s10351_s13 = smov %s7319_s14 }
 0x8c2   : > { %s10352_s14 = smov %s7817_s30  ;;  %s10353_s15 = smov %s7331_s17 }
 0x8c3   : > { %s10354_s16 = smov %s7335_s18  ;;  %s10355_s17 = smov %s10358_s21 }
 0x8c4   : > { %s10356_s18 = smov %s10362_s22  ;;  %15 = sbr.rel (!%p13_p5) target bundleno = 5 (0x5), region = 99 }
 0x8c9   :  { %4267 = vsyncpa [#allocation5], 1 }
 0x8ca   :  { %4269 = vsyncpa [#allocation5 + $0x1], 1 }

</bundles_post_ra>
